<compile_context>
chip_gen: v6e
topology: v6e:2x2x1
jax: 0.10.0
libtpu: 0.0.40
codegen_flags: <defaults>
</compile_context>

<pallas_src>
import functools

import jax
import jax.numpy as jnp
from jax.experimental import pallas as pl
from jax.experimental.pallas import tpu as pltpu


TILE_B = 16          # batch tile: bf16 sublane tile (16) aligned; 32/16 = 2
                     # "parallel" steps -> maps onto v7x's two TensorCores.
FEAT_DIM = 128       # lane-dense channel width for every conv layer
TEXT_DIM = 64
VOCAB_SIZE = 97
NUM_ENTITY_TOKENS = 4


# ----------------------------------------------------------------------------
# Pallas kernel 1: conv3x3 + bias + ReLU + 2x2 maxpool (batch-tiled grid)
# ----------------------------------------------------------------------------
def _conv_block_kernel(x_ref, w_ref, b_ref, o_ref, *, folded, last):
    """One simplified-Res12 conv layer on a batch tile.

    folded=True : x_ref is (H, W, TB, Kfold) -- the 3x3 taps were folded into
                  the channel dim on the host (layer-1 K packing), so the conv
                  is ONE matmul with K = Kfold instead of nine K=Cin passes.
    folded=False: x_ref is (H+2, W+2, TB, Cin), halo already in the buffer.
                  The three dw taps of each dh row are concatenated along the
                  channel (lane) dim and done as one K=3*Cin matmul: 3 MXU
                  passes and 3 accumulator touches instead of 9.
    last=False  : o_ref is (H/2+2, W/2+2, TB, Cout) bf16; pooled activation is
                  written into the interior and the 1-pixel halo border is
                  zeroed here, so the next layer needs no XLA pad round-trip.
    last=True   : o_ref is (TB, Cout) f32; the global average pool is fused
                  into the epilogue and only the per-sample mean is stored.
    """
    cout = w_ref.shape[-1]
    if folded:
        h, w, tb, kin = x_ref.shape
        lhs = x_ref[...].reshape(h * w * tb, kin)
        acc = jnp.dot(lhs, w_ref[...], preferred_element_type=jnp.float32)
    else:
        hp, wpd, tb, cin = x_ref.shape
        h, w = hp - 2, wpd - 2
        x = x_ref[...]                                  # single block load
        acc = None
        for dh in range(3):
            # dw-concatenated lhs slab: lane-aligned (multiples of 128) pieces.
            slab = jnp.concatenate(
                [x[dh:dh + h, dw:dw + w] for dw in range(3)], axis=-1)
            lhs = slab.reshape(h * w * tb, 3 * cin)
            part = jnp.dot(lhs, w_ref[dh],
                           preferred_element_type=jnp.float32)
            acc = part if acc is None else acc + part   # value-level accum

    # Epilogue: bias + ReLU + 2x2 max-pool (stride 2).
    y = jnp.maximum(acc + b_ref[...], 0.0)              # (h*w*tb, cout) f32
    y = y.reshape(h, w // 2, 2, tb, cout)
    y = jnp.maximum(y[:, :, 0], y[:, :, 1])             # pool over W
    y = y.reshape(h // 2, 2, w // 2, tb, cout)
    y = jnp.maximum(y[:, 0], y[:, 1])                   # pool over H
    ho, wo = h // 2, w // 2                             # y: (ho, wo, tb, cout)

    if last:
        # fused global average pool -> (tb, cout) f32, lane-dense store
        o_ref[...] = jnp.mean(y, axis=(0, 1)).astype(o_ref.dtype)
    else:
        # halo-padded bf16 writeback: zero border + pooled interior
        zrow = jnp.zeros((1, wo + 2, tb, cout), o_ref.dtype)
        zcol = jnp.zeros((ho, 1, tb, cout), o_ref.dtype)
        o_ref[0:1] = zrow
        o_ref[ho + 1:ho + 2] = zrow
        o_ref[1:ho + 1, 0:1] = zcol
        o_ref[1:ho + 1, wo + 1:wo + 2] = zcol
        o_ref[1:ho + 1, 1:wo + 1] = y.astype(o_ref.dtype)


def conv_block(x, w, b, *, folded, last):
    """One conv layer as one pallas_call over batch tiles.

    folded: x is (H, W, B, Kfold) (layer-1 K-packed), w is (Kfold, Cout).
    else  : x is (H+2, W+2, B, Cin) halo-padded,      w is (3, 3*Cin, Cout).
    """
    if folded:
        h, wdt, bsz, kin = x.shape
        x_block = (h, wdt, TILE_B, kin)
    else:
        hp, wpd, bsz, cin = x.shape
        h, wdt = hp - 2, wpd - 2
        x_block = (hp, wpd, TILE_B, cin)
    assert h % 2 == 0 and wdt % 2 == 0, "2x2 max-pool expects even spatial dims"
    assert bsz % TILE_B == 0
    cout = w.shape[-1]
    ho, wo = h // 2, wdt // 2

    if last:
        out_shape = jax.ShapeDtypeStruct((bsz, cout), jnp.float32)
        out_spec = pl.BlockSpec((TILE_B, cout), lambda i: (i, 0))
    else:
        out_shape = jax.ShapeDtypeStruct((ho + 2, wo + 2, bsz, cout),
                                         jnp.bfloat16)
        out_spec = pl.BlockSpec((ho + 2, wo + 2, TILE_B, cout),
                                lambda i: (0, 0, i, 0))

    w_index_map = (lambda i: (0, 0)) if w.ndim == 2 else (lambda i: (0, 0, 0))

    return pl.pallas_call(
        functools.partial(_conv_block_kernel, folded=folded, last=last),
        out_shape=out_shape,
        grid=(bsz // TILE_B,),
        in_specs=[
            pl.BlockSpec(x_block, lambda i: (0, 0, i, 0)),
            pl.BlockSpec(w.shape, w_index_map),     # resident across the grid
            pl.BlockSpec(b.shape, lambda i: (0, 0)),  # resident across the grid
        ],
        out_specs=out_spec,
        compiler_params=pltpu.CompilerParams(
            dimension_semantics=("parallel",),
            vmem_limit_bytes=48 * 1024 * 1024),
    )(x, w, b)


def pack_conv_weight(w9, *, folded):
    """Pack a canonical (9, Cin, Cout) conv weight for the Pallas kernels.

    Canonical tap order is k = kh*3 + kw (cross-correlation, same convention
    as nn.Conv2d -- no spatial flip).  Pretrained PyTorch Conv2d weights
    (Cout, Cin, kh, kw) map here via permute(2, 3, 1, 0).reshape(9, Cin, Cout).

    folded=True : returns (pad8(9*Cin), Cout) -- all 9 taps stacked along Cin
                  (layer-1 K packing), rows zero-padded to a multiple of 8.
    folded=False: returns (3, 3*Cin, Cout) -- the three dw taps of each dh row
                  stacked along Cin (dw-fused layout expected by the kernel).
    """
    k, cin, cout = w9.shape
    assert k == 9
    if folded:
        wf = w9.reshape(9 * cin, cout)
        pad = (-wf.shape[0]) % 8
        if pad:
            wf = jnp.pad(wf, ((0, pad), (0, 0)))
        return wf
    return w9.reshape(3, 3 * cin, cout)


def image_encoder(images_nchw, conv_params):
    """Simplified Res12: 3x (conv3x3 + ReLU + maxpool2) + global avg pool.

    Layout is (H, W, B, C) throughout.  Layer 1 (Cin=3) is K-packed on the
    host; later layers consume the previous kernel's halo-padded output
    directly, and the last layer returns the pooled feature mean directly.
    """
    # TODO(synk): real Res12 has BatchNorm + residual blocks + 4 stages; omitted.
    b = images_nchw.shape[0]
    pad_b = (-b) % TILE_B
    x = jnp.transpose(images_nchw, (2, 3, 0, 1)).astype(jnp.bfloat16)  # (H,W,B,C)
    if pad_b:
        x = jnp.pad(x, ((0, 0), (0, 0), (0, pad_b), (0, 0)))
    h, wdt = x.shape[0], x.shape[1]

    # layer-1 K packing: fold the 3x3 neighbourhood into the channel dim
    # (tiny at Cin=3: 27 channels, zero-padded to match the packed weight).
    xp = jnp.pad(x, ((1, 1), (1, 1), (0, 0), (0, 0)))
    x = jnp.concatenate(
        [xp[dh:dh + h, dw:dw + wdt] for dh in range(3) for dw in range(3)],
        axis=-1)                                             # (H, W, B, 9*Cin)
    k_target = conv_params[0][0].shape[0]
    if x.shape[-1] < k_target:
        x = jnp.pad(x, ((0, 0), (0, 0), (0, 0), (0, k_target - x.shape[-1])))

    n_layers = len(conv_params)
    for li, (w_l, b_l) in enumerate(conv_params):
        x = conv_block(x, w_l, b_l,
                       folded=(li == 0), last=(li == n_layers - 1))
    # last layer already emitted the (B_pad, D) f32 global-average-pooled
    # features; drop batch-padding rows before the episode head.
    return x[:b]


# ----------------------------------------------------------------------------
# Pallas kernel 2: fused EVG + cross-attention + matching classifier
# ----------------------------------------------------------------------------
def _episode_head_kernel(q_ref, s_ref, cls_ref, tok_ref, wp_ref, bp_ref,
                         wv_ref, bv_ref, onehot_ref, o_ref, *, temperature):
    # --- Entity Vector Generation for all N classes at once -----------------
    cls_emb = cls_ref[...]                                     # (N, Dt)
    tok = tok_ref[...]                                         # (N, M, Dt)
    t_scale = jax.lax.rsqrt(jnp.float32(cls_emb.shape[-1]))
    scores = jnp.sum(tok * cls_emb[:, None, :], axis=-1) * t_scale   # (N, M)
    attn = jax.nn.softmax(scores, axis=-1)
    ctx = jnp.sum(attn[:, :, None] * tok, axis=1)              # (N, Dt)
    ent = jnp.dot(ctx + cls_emb, wp_ref[...],
                  preferred_element_type=jnp.float32) + bp_ref[...]   # (N, D)

    # --- entity-guided cross attention on support features ------------------
    onehot = onehot_ref[...]                                   # (NK, N)
    feat = s_ref[...]                                          # (NK, D)
    ent_per = jnp.dot(onehot, ent, preferred_element_type=jnp.float32)  # (NK,D)
    ent_v = jnp.dot(ent_per, wv_ref[...],
                    preferred_element_type=jnp.float32) + bv_ref[...]
    d_scale = jax.lax.rsqrt(jnp.float32(feat.shape[-1]))
    gate = jax.nn.sigmoid(
        jnp.sum(feat * ent_v, axis=-1, keepdims=True) * d_scale)
    s_att = feat + gate * ent_v                                # (NK, D)

    # --- matching-network classifier: per-class mean cosine similarity ------
    q = q_ref[...]                                             # (NQ, D)
    qn = q * jax.lax.rsqrt(jnp.sum(q * q, axis=-1, keepdims=True) + 1e-8)
    sn = s_att * jax.lax.rsqrt(
        jnp.sum(s_att * s_att, axis=-1, keepdims=True) + 1e-8)
    # cosine values are well-conditioned -> bf16 MXU matmul with f32 accum
    sim = jax.lax.dot_general(qn.astype(jnp.bfloat16), sn.astype(jnp.bfloat16),
                              (((1,), (1,)), ((), ())),
                              preferred_element_type=jnp.float32)   # (NQ, NK)
    counts = jnp.maximum(jnp.sum(onehot, axis=0, keepdims=True), 1.0)  # (1, N)
    logits = jnp.dot(sim, onehot, preferred_element_type=jnp.float32) / counts
    # TODO(synk): if this head ever runs inside a training loop, pad logits to
    # a lane-dense 128-wide store and slice outside (n_way=4 -> masked vst).
    o_ref[...] = logits * temperature


# ----------------------------------------------------------------------------
# synthetic text encoder + entity-token generation (host-side glue)
# ----------------------------------------------------------------------------
def _token_id(s):
    h = 0
    for ch in s:
        h = (h * 31 + ord(ch)) % VOCAB_SIZE
    return h


def text_encoder(strings, emb_table):
    # TODO(synk): real INFUSE uses a pretrained transformer text encoder.
    ids = jnp.asarray([_token_id(s) for s in strings], dtype=jnp.int32)
    return emb_table[ids]                                      # (len, Dt)


def generate_entity_tokens(dataset_name, cls_name, num_tokens=NUM_ENTITY_TOKENS):
    # TODO(synk): real INFUSE generates entity descriptions via an LLM/lexicon.
    return [f"{dataset_name}_{cls_name}_attr{i}" for i in range(num_tokens)]


# ----------------------------------------------------------------------------
# full forward pass
# ----------------------------------------------------------------------------
def infuse_forward(params, support_images, support_labels, query_images,
                   class_names, dataset_name="synthetic", temperature=10.0):
    support_feat = image_encoder(support_images, params["conv"])   # (N*K, D)
    query_feat = image_encoder(query_images, params["conv"])       # (N*Q, D)

    tok_embs, cls_embs = [], []
    for cls_name in class_names:
        entity_tokens = generate_entity_tokens(dataset_name, cls_name)
        tok_embs.append(text_encoder(entity_tokens, params["emb"]))  # (M, Dt)
        cls_embs.append(text_encoder([cls_name], params["emb"])[0])  # (Dt,)
    tok_embs = jnp.stack(tok_embs, axis=0)   # (N, M, Dt)
    cls_embs = jnp.stack(cls_embs, axis=0)   # (N, Dt)

    n_way = len(class_names)
    onehot = jax.nn.one_hot(support_labels, n_way, dtype=jnp.float32)  # (NK, N)

    # one fused launch: EVG + cross-attn + matching classifier (all tiny,
    # everything VMEM-resident)
    vmem_spec = pl.BlockSpec(memory_space=pltpu.MemorySpace.VMEM)
    logits = pl.pallas_call(
        functools.partial(_episode_head_kernel, temperature=temperature),
        out_shape=jax.ShapeDtypeStruct((query_feat.shape[0], n_way),
                                       jnp.float32),
        in_specs=[vmem_spec] * 9,
        out_specs=vmem_spec,
    )(query_feat, support_feat, cls_embs, tok_embs,
      params["wp"], params["bp"], params["wv"], params["bv"], onehot)
    return logits


# ----------------------------------------------------------------------------
# deterministic parameter construction
# ----------------------------------------------------------------------------
def init_params(key, in_ch=3, widths=(FEAT_DIM, FEAT_DIM, FEAT_DIM),
                text_dim=TEXT_DIM):
    keys = jax.random.split(key, len(widths) + 3)
    conv = []
    c_in = in_ch
    for li, c_out in enumerate(widths):
        scale = (2.0 / (9 * c_in)) ** 0.5
        w9 = (jax.random.normal(keys[li], (9, c_in, c_out), jnp.float32)
              * scale).astype(jnp.bfloat16)
        w = pack_conv_weight(w9, folded=(li == 0))
        b = jnp.zeros((1, c_out), jnp.float32)
        conv.append((w, b))
        c_in = c_out
    feat_dim = widths[-1]
    emb = jax.random.normal(keys[-3], (VOCAB_SIZE, text_dim), jnp.float32) * 0.1
    wp = jax.random.normal(keys[-2], (text_dim, feat_dim), jnp.float32) * 0.1
    bp = jnp.zeros((1, feat_dim), jnp.float32)
    wv = jax.random.normal(keys[-1], (feat_dim, feat_dim), jnp.float32) * 0.1
    bv = jnp.zeros((1, feat_dim), jnp.float32)
    return {"conv": conv, "emb": emb, "wp": wp, "bp": bp, "wv": wv, "bv": bv}


# ----------------------------------------------------------------------------
if __name__ == "__main__":
    key = jax.random.PRNGKey(0)
    k_params, k_sup, k_qry = jax.random.split(key, 3)

    n_way, k_shot, q_query = 4, 8, 8       # batch 32 -> 2 parallel grid steps
    c, h, w = 3, 16, 16

    params = init_params(k_params)

    support_images = jax.random.normal(k_sup, (n_way * k_shot, c, h, w),
                                       jnp.float32)
    query_images = jax.random.normal(k_qry, (n_way * q_query, c, h, w),
                                     jnp.float32)
    support_labels = jnp.repeat(jnp.arange(n_way, dtype=jnp.int32), k_shot)
    class_names = ["cat", "dog", "bird", "fish"]

    logits = infuse_forward(params, support_images, support_labels,
                            query_images, class_names)
    logits = jax.block_until_ready(logits)

    assert logits.shape == (n_way * q_query, n_way), logits.shape
    assert bool(jnp.all(jnp.isfinite(logits)))
    print("KERNEL_OK")
</pallas_src>

<mosaic_0001>
module attributes {stable_mosaic.version = 11 : i64} {
  func.func @_conv_block_kernel(%arg0: i32, %arg1: memref<16x16x16x32xbf16, #tpu.memory_space<vmem>>, %arg2: memref<32x128xbf16, #tpu.memory_space<vmem>>, %arg3: memref<1x128xf32, #tpu.memory_space<vmem>>, %arg4: memref<10x10x16x128xbf16, #tpu.memory_space<vmem>>) attributes {dimension_semantics = [#tpu.dimension_semantics<parallel>], iteration_bounds = array<i64: 2>, scalar_prefetch = 0 : i64, scratch_operands = 0 : i64, tpu.core_type = #tpu.core_type<tc>, window_params = [{transform_indices = @transform_0, window_bounds = array<i64: 16, 16, 16, 32>}, {pipeline_mode = #tpu.pipeline_mode<synchronous>, transform_indices = @transform_1, window_bounds = array<i64: 32, 128>}, {pipeline_mode = #tpu.pipeline_mode<synchronous>, transform_indices = @transform_2, window_bounds = array<i64: 1, 128>}, {transform_indices = @transform_3, window_bounds = array<i64: 10, 10, 16, 128>}]} {
    %c0 = arith.constant 0 : index
    %c0_0 = arith.constant 0 : index
    %c0_1 = arith.constant 0 : index
    %c0_2 = arith.constant 0 : index
    %0 = vector.load %arg1[%c0, %c0_0, %c0_1, %c0_2] : memref<16x16x16x32xbf16, #tpu.memory_space<vmem>>, vector<16x16x16x32xbf16>
    %1 = vector.shape_cast %0 : vector<16x16x16x32xbf16> to vector<4096x32xbf16>
    %c0_3 = arith.constant 0 : index
    %c0_4 = arith.constant 0 : index
    %2 = vector.load %arg2[%c0_3, %c0_4] : memref<32x128xbf16, #tpu.memory_space<vmem>>, vector<32x128xbf16>
    %cst = arith.constant dense<0.000000e+00> : vector<4096x128xf32>
    %3 = tpu.matmul %1, %2, %cst {dimension_numbers = #tpu.dot_dimension_numbers<[1], [0], [0], [1], [0, 0, 1, 1], [], []>} : vector<4096x32xbf16>, vector<32x128xbf16>, vector<4096x128xf32> -> vector<4096x128xf32>
    %c0_5 = arith.constant 0 : index
    %c0_6 = arith.constant 0 : index
    %4 = vector.load %arg3[%c0_5, %c0_6] : memref<1x128xf32, #tpu.memory_space<vmem>>, vector<1x128xf32>
    %5 = vector.broadcast %4 : vector<1x128xf32> to vector<4096x128xf32>
    %6 = arith.addf %3, %5 : vector<4096x128xf32>
    %cst_7 = arith.constant 0.000000e+00 : f32
    %7 = vector.broadcast %cst_7 : f32 to vector<4096x128xf32>
    %8 = arith.maximumf %6, %7 : vector<4096x128xf32>
    %9 = vector.shape_cast %8 : vector<4096x128xf32> to vector<16x8x2x16x128xf32>
    %10 = vector.extract_strided_slice %9 {offsets = [0, 0, 0, 0, 0], sizes = [16, 8, 1, 16, 128], strides = [1, 1, 1, 1, 1]} : vector<16x8x2x16x128xf32> to vector<16x8x1x16x128xf32>
    %11 = vector.shape_cast %10 : vector<16x8x1x16x128xf32> to vector<16x8x16x128xf32>
    %12 = vector.extract_strided_slice %9 {offsets = [0, 0, 1, 0, 0], sizes = [16, 8, 1, 16, 128], strides = [1, 1, 1, 1, 1]} : vector<16x8x2x16x128xf32> to vector<16x8x1x16x128xf32>
    %13 = vector.shape_cast %12 : vector<16x8x1x16x128xf32> to vector<16x8x16x128xf32>
    %14 = arith.maximumf %11, %13 : vector<16x8x16x128xf32>
    %15 = vector.shape_cast %14 : vector<16x8x16x128xf32> to vector<8x2x8x16x128xf32>
    %16 = vector.extract_strided_slice %15 {offsets = [0, 0, 0, 0, 0], sizes = [8, 1, 8, 16, 128], strides = [1, 1, 1, 1, 1]} : vector<8x2x8x16x128xf32> to vector<8x1x8x16x128xf32>
    %17 = vector.shape_cast %16 : vector<8x1x8x16x128xf32> to vector<8x8x16x128xf32>
    %18 = vector.extract_strided_slice %15 {offsets = [0, 1, 0, 0, 0], sizes = [8, 1, 8, 16, 128], strides = [1, 1, 1, 1, 1]} : vector<8x2x8x16x128xf32> to vector<8x1x8x16x128xf32>
    %19 = vector.shape_cast %18 : vector<8x1x8x16x128xf32> to vector<8x8x16x128xf32>
    %20 = arith.maximumf %17, %19 : vector<8x8x16x128xf32>
    %cst_8 = arith.constant 0.000000e+00 : bf16
    %21 = vector.broadcast %cst_8 : bf16 to vector<1x10x16x128xbf16>
    %cst_9 = arith.constant 0.000000e+00 : bf16
    %22 = vector.broadcast %cst_9 : bf16 to vector<8x1x16x128xbf16>
    %c0_10 = arith.constant 0 : index
    %c0_11 = arith.constant 0 : index
    %c0_12 = arith.constant 0 : index
    %c0_13 = arith.constant 0 : index
    %23 = vector.load %arg4[%c0_10, %c0_11, %c0_12, %c0_13] : memref<10x10x16x128xbf16, #tpu.memory_space<vmem>>, vector<1x10x16x128xbf16>
    tpu.vector_store %arg4[%c0_10, %c0_11, %c0_12, %c0_13], %21 {strides = array<i32>} : memref<10x10x16x128xbf16, #tpu.memory_space<vmem>>, vector<1x10x16x128xbf16>,
    %c9 = arith.constant 9 : index
    %c0_14 = arith.constant 0 : index
    %c0_15 = arith.constant 0 : index
    %c0_16 = arith.constant 0 : index
    %24 = vector.load %arg4[%c9, %c0_14, %c0_15, %c0_16] : memref<10x10x16x128xbf16, #tpu.memory_space<vmem>>, vector<1x10x16x128xbf16>
    tpu.vector_store %arg4[%c9, %c0_14, %c0_15, %c0_16], %21 {strides = array<i32>} : memref<10x10x16x128xbf16, #tpu.memory_space<vmem>>, vector<1x10x16x128xbf16>,
    %c1 = arith.constant 1 : index
    %c0_17 = arith.constant 0 : index
    %c0_18 = arith.constant 0 : index
    %c0_19 = arith.constant 0 : index
    %25 = vector.load %arg4[%c1, %c0_17, %c0_18, %c0_19] : memref<10x10x16x128xbf16, #tpu.memory_space<vmem>>, vector<8x1x16x128xbf16>
    tpu.vector_store %arg4[%c1, %c0_17, %c0_18, %c0_19], %22 {strides = array<i32>} : memref<10x10x16x128xbf16, #tpu.memory_space<vmem>>, vector<8x1x16x128xbf16>,
    %c1_20 = arith.constant 1 : index
    %c9_21 = arith.constant 9 : index
    %c0_22 = arith.constant 0 : index
    %c0_23 = arith.constant 0 : index
    %26 = vector.load %arg4[%c1_20, %c9_21, %c0_22, %c0_23] : memref<10x10x16x128xbf16, #tpu.memory_space<vmem>>, vector<8x1x16x128xbf16>
    tpu.vector_store %arg4[%c1_20, %c9_21, %c0_22, %c0_23], %22 {strides = array<i32>} : memref<10x10x16x128xbf16, #tpu.memory_space<vmem>>, vector<8x1x16x128xbf16>,
    %27 = arith.truncf %20 : vector<8x8x16x128xf32> to vector<8x8x16x128xbf16>
    %c1_24 = arith.constant 1 : index
    %c1_25 = arith.constant 1 : index
    %c0_26 = arith.constant 0 : index
    %c0_27 = arith.constant 0 : index
    %28 = vector.load %arg4[%c1_24, %c1_25, %c0_26, %c0_27] : memref<10x10x16x128xbf16, #tpu.memory_space<vmem>>, vector<8x8x16x128xbf16>
    tpu.vector_store %arg4[%c1_24, %c1_25, %c0_26, %c0_27], %27 {strides = array<i32>} : memref<10x10x16x128xbf16, #tpu.memory_space<vmem>>, vector<8x8x16x128xbf16>,
    return
  }
  func.func @transform_0(%arg0: i32) -> (i32, i32, i32, i32) {
    %c0_i32 = arith.constant 0 : i32
    %c0_i32_0 = arith.constant 0 : i32
    %c0_i32_1 = arith.constant 0 : i32
    %c0_i32_2 = arith.constant 0 : i32
    return %c0_i32, %c0_i32_0, %arg0, %c0_i32_1 : i32, i32, i32, i32
  }
  func.func @transform_1(%arg0: i32) -> (i32, i32) {
    %c0_i32 = arith.constant 0 : i32
    %c0_i32_0 = arith.constant 0 : i32
    %c0_i32_1 = arith.constant 0 : i32
    return %c0_i32, %c0_i32_0 : i32, i32
  }
  func.func @transform_2(%arg0: i32) -> (i32, i32) {
    %c0_i32 = arith.constant 0 : i32
    %c0_i32_0 = arith.constant 0 : i32
    %c0_i32_1 = arith.constant 0 : i32
    return %c0_i32, %c0_i32_0 : i32, i32
  }
  func.func @transform_3(%arg0: i32) -> (i32, i32, i32, i32) {
    %c0_i32 = arith.constant 0 : i32
    %c0_i32_0 = arith.constant 0 : i32
    %c0_i32_1 = arith.constant 0 : i32
    %c0_i32_2 = arith.constant 0 : i32
    return %c0_i32, %c0_i32_0, %arg0, %c0_i32_1 : i32, i32, i32, i32
  }
}

</mosaic_0001>

<bundles_post_ra>
// kernel: tpu_custom_call.1
= control target key start
LH: loop header
LB: loop body
LE: loop exit
PB: predicated region body
PF: predicated region fallthrough
CT: control target
= control target key end

     0   :  { %8 = vsyncpa [#allocation3], 0  ;;  %s11069_s0 = inlined_call_operand.hbm [shape: bf16[16,16,32,32], index: 0, kind: input, shape index: {}]   ;;  %s11070_s1 = inlined_call_operand.hbm [shape: bf16[32,128], index: 1, kind: input, shape index: {}]   ;;  %s11071_s2 = inlined_call_operand.hbm [shape: f32[1,128], index: 2, kind: input, shape index: {}]   ;;  %s11072_s3 = inlined_call_operand.hbm [shape: bf16[10,10,32,128], index: 3, kind: output, shape index: {}]  }
   0x1   :  { %10 = vsyncpa [#allocation3 + $0x1], 0 }
   0x2   :  { %11 = vsyncpa [#allocation6], 0 }
   0x3   :  { %12 = vsyncpa [#allocation4], 0 }
   0x4   :  { %14 = vsyncpa [#allocation4 + $0x1], 0  ;;  %s9271_s12 = smov 0   ;;  %s9273_s13 = smov 0  }
   0x5   :  { %s9275_s14 = smov 0   ;;  %s9277_s15 = smov 0  }
   0x6 LB: > { %s9292_s16 = sadd.s32 4294967295, %s9231_s15   ;;  %s6650_s17 = sadd.s32 4294967294, %s9231_s15   ;;  %s9231_s15 = sphi %s9277_s15, %s11088_s15   ;;  %s9227_s14 = sphi %s9275_s14, %s11087_s14   ;;  %s9223_s13 = sphi %s9273_s13, %s11086_s13   ;;  %s9219_s12 = sphi %s9271_s12, %s11085_s12  }
   0x7   : > { %s9296_s18 = sadd.s32 1, %s9231_s15   ;;  %s27_s19 = sadd.s32 1, %s9227_s14 }
   0x8   : > { %s24_s20 = ssub.s32 %s9231_s15, %s9296_s18  ;;  %p34_p0 = scmp.ne.s32.totalorder %s9227_s14, %s9223_s13 }
   0x9   : > { %p25_p1 = scmp.eq.s32.totalorder %s24_s20, 0  ;;  %p35_p2 = scmp.eq.s32.totalorder %s9231_s15, 0 }
   0xa   : > { %p40_p3 = scmp.ne.s32.totalorder %s9223_s13, %s9219_s12  ;;  %p11073_p4 = scmp.eq.s32.totalorder %s9292_s16, 0 }
   0xb   : > { %s9308_s21 = scalar_select %p25_p1, %s9227_s14, %s27_s19  }
   0xc   : > { %p9310_p5 = por %p35_p2, %p34_p0  ;;  %p9316_p6 = por %p11073_p4, %p40_p3 }
   0xd   : > { %p106_p7 = scmp.eq.s32.totalorder %s9292_s16, 1  ;;  %p112_p8 = scmp.eq.s32.totalorder %s6650_s17, 1 }
   0xe   : > { %p6651_p9 = scmp.ge.s32.totalorder %s9231_s15, 1  ;;  %p119_p10 = scmp.lt.s32.totalorder %s9231_s15, 3 }
   0xf   : > { %p9323_p11 = por %p106_p7, %p34_p0  ;;  %p9327_p12 = por %p112_p8, %p40_p3 }
  0x10   : > { %p9331_p13 = pnand %p6651_p9, %p119_p10  ;;  %s9233_s27 = smov [#allocation5]  }
  0x11   : > { %s11077_s24 = scalar_select %p9323_p11, 1, 0 }
  0x12   : > { %s11078_s25 = scalar_select %p9327_p12, 1, 0 }
  0x13   : > { %p8809_p1 = pneg %p9331_p13  ;;  %s131_s28 = sshll.u32 %s9233_s27, 4  ;;  %s132_s28 = int_to_ptr.vmem [resolvable:$true] %s131_s28 }
  0x14   : > { %s9234_s30 = smov [#allocation7]   ;;  %s9148_s5 = scalar_lea.vmem %s132_s28, 256 }
  0x15   : > { %p9339_p2 = pnand %p8809_p1, %p11073_p4  ;;  %s145_s4 = sshll.u32 %s9234_s30, 4  ;;  %s146_s4 = int_to_ptr.vmem [resolvable:$true] %s145_s4 }
  0x16   : > { %p9149_p3 = scmp.ne.s32.totalorder %s132_s28, %s9148_s5  ;;  %p9156_p9 = scmp.lt.s32.totalorder %s132_s28, %s132_s28 }
  0x17   : > { %p9139_p0 = pneg %p9339_p2  ;;  %p9157_p10 = scmp.lt.s32.totalorder %s9148_s5, %s9148_s5 }
  0x19   : > { %p9151_p7 = pnand %p9149_p3, %p9139_p0  ;;  %p9158_p12 = por %p9157_p10, %p9156_p9 }
  0x1b   : > { %p9152_p8 = pneg %p9151_p7 }
  0x1d   : > { %p9159_p1 = pnand %p9158_p12, %p9152_p8 }
  0x1f   : > { %9162 = shalt.err (!%p9159_p1)
}
  0x20   : > { %s9235_s6 = smov 64   ;;  %s9236_s7 = smov 4  }
  0x21   : > { %8812 = dma.hbm_to_vmem [thread:$0]  (!%p9339_p2), %s11070_s1, 256, %s132_s28, [#allocation6], %s9235_s6, %s9235_s6, %s9236_s7  }
  0x22   : > { %s9174_s10 = scalar_lea.vmem %s146_s4, 16  ;;  %s9181_s11 = scalar_lea.vmem %s146_s4, 32 }
  0x23   : > { %p9175_p4 = scmp.ne.s32.totalorder %s146_s4, %s9174_s10  ;;  %p9182_p11 = scmp.lt.s32.totalorder %s146_s4, %s146_s4 }
  0x24   : > { %p9183_p9 = scmp.lt.s32.totalorder %s9181_s11, %s9174_s10 }
  0x25   : > { %p9177_p3 = pnand %p9175_p4, %p9139_p0 }
  0x26   : > { %p9184_p12 = por %p9183_p9, %p9182_p11 }
  0x27   : > { %p9178_p7 = pneg %p9177_p3 }
  0x29   : > { %p9185_p8 = pnand %p9184_p12, %p9178_p7 }
  0x2b   : > { %9188 = shalt.err (!%p9185_p8)
}
  0x2c   : > { %8815 = dma.hbm_to_vmem [thread:$0]  (!%p9339_p2), %s11071_s2, 16, %s146_s4, [#allocation6]  }
  0x2d   : > { %p6654_p10 = scmp.ge.s32.totalorder %s9231_s15, 2 }
  0x2f   : > { %152 = sbr.rel (%p6654_p10) target bundleno = 65 (0x41), region = 24 }
  0x34   : > { %s156_s20 = sand.u32 1, %s9227_s14   ;;  %s7491_s27 = sshll.u32 %s9231_s15, 7 }
  0x35   : > { %s6655_s28 = sshll.u32 %s156_s20, 11  ;;  %s166_s4 = scalar_lea.hbm %s11069_s0, %s7491_s27 }
  0x36   : > { %s8788_s5 = scalar_select %p9310_p5, [#allocation0], [#allocation13] }
  0x37   : > { %s160_s6 = scalar_lea.vmem [#allocation2], %s6655_s28  ;;  %s9237_s9 = smov 256  }
  0x38   : > { %s179_s7 = sshll.u32 %s160_s6, 4  ;;  %s171_s8 = sld [smem:[%s8788_s5]]   ;;  %s180_s7 = int_to_ptr.vmem [resolvable:$true] %s179_s7 }
  0x39   : > { %8789 = sst [smem:[#allocation10]] (%p9310_p5), %s9237_s9  ;;  %s9238_s10 = smov 128  }
  0x3a   : > { %8790 = sst [smem:[#allocation10 + $0x1]] (%p9310_p5), %s9238_s10  ;;  %s9239_s11 = smov 2  }
  0x3b   : > { %8791 = sst [smem:[#allocation10 + $0x2]] (%p9310_p5), %s9239_s11  ;;  %s9240_s17 = smov 64  }
  0x3c   : > { %8792 = sst [smem:[#allocation10 + $0x3]] (%p9310_p5), %s9240_s17  ;;  %s9241_s27 = smov 4  }
  0x3d   : > { %8793 = sst [smem:[#allocation10 + $0x4]] (%p9310_p5), %s9240_s17  ;;  %s157_s29 = scalar_lea.sflag [#allocation3], %s156_s20 }
  0x3e   : > { %s6658_s19 = sshll.u32 %s171_s8, 26  ;;  %8794 = sst [smem:[#allocation10 + $0x5]] (%p9310_p5), %s9241_s27 }
  0x3f   : > { %s6659_s28 = sadd.s32 134217728, %s6658_s19  ;;  %s9242_s30 = smov 131072  }
  0x40   : > { %8795 = dma.general (%p9310_p5), %s166_s4, 32768, %s180_s7, %s157_s29, %s9242_s30, [#allocation10], %s6659_s28, 0  }
  0x41 PF: > { %204 = sbr.rel (%p9331_p13) target bundleno = 808 (0x328), region = 32  ;;  %s9388_s5 = sand.u32 (!%p9331_p13), 1, %s9223_s13  }
  0x42   : > { %s6661_s6 = sshll.u32 (!%p9331_p13), %s9388_s5, 11  ;;  %s207_s8 = scalar_lea.sflag (!%p9331_p13), [#allocation3], %s9388_s5 }
  0x43   : > { %s9392_s9 = scalar_lea.vmem (!%p9331_p13), [#allocation2], %s6661_s6 }
  0x46   : > { %9206 = dma.done.wait (%p9316_p6), %s207_s8, 32768  }
  0x47   : > { %9208 = vsyncadd (%p9316_p6), %s207_s8, 4294934528  ;;  %p11081_p4 = scmp.eq.s32.totalorder %s9292_s16, 0 }
  0x49   : > { %9210 = dma.done.wait (%p11081_p4), [#allocation6], 272   ;;  %p11082_p5 = pmov %p11081_p4 }
  0x4a   : > { %s8783_s22 = smul.u32 800, %s9388_s5  ;;  %v9243_v0 = vmov 0   ;;  %v8875_v1 = vld [vmem:[#allocation5 + $0x8] sm:$0xff]   ;;  %v8876_v2 = vld [vmem:[#allocation5] sm:$0xff]   ;;  %vm2059_vm0 = vcmask 261120   ;;  %v8881_v7 = vld [vmem:[%s9392_s9 + $0x10] sm:$0xff]  }
  0x4b   : > { %9212 = vsyncadd (%p11082_p5), [#allocation6], 4294967024  ;;  %8263 = vmatprep.subr.bf16.mxu0 %v8875_v1  ;;  %8779 = vmatprep.subr.bf16.mxu1 %v8875_v1  ;;  %v8877_v3 = vld [vmem:[%s9392_s9] sm:$0xff]   ;;  %v8879_v5 = vld [vmem:[%s9392_s9 + $0x8] sm:$0xff]   ;;  %s6522_s23 = scalar_lea.sflag [#allocation4], %s9388_s5 }
  0x4c   : > { %s9403_s26 = scalar_lea.vmem [#allocation8], %s8783_s22  ;;  %8264 = vmatpush3.bf16.msra.mxu0 %v8875_v1  ;;  %8781 = vmatpush3.bf16.msra.mxu1 %v8875_v1  ;;  %v8878_v4 = vld [vmem:[%s9392_s9 + $0x400] sm:$0xff]   ;;  %v8880_v6 = vld [vmem:[%s9392_s9 + $0x408] sm:$0xff]   ;;  %v8882_v8 = vld [vmem:[%s9392_s9 + $0x410] sm:$0xff]  }
  0x4d   : > { %5805 = vst [vmem:[%s9403_s26] sm:$0xf] %v9243_v0  ;;  %5806 = vst [vmem:[%s9403_s26 + $0x4] sm:$0xf] %v9243_v0  ;;  %8265 = vmatprep.subr.bf16.mxu0 %v8876_v2  ;;  %8780 = vmatprep.subr.bf16.mxu1 %v8876_v2  ;;  %v8883_v9 = vld [vmem:[%s9392_s9 + $0x18] sm:$0xff]   ;;  %v8885_v11 = vld [vmem:[%s9392_s9 + $0x20] sm:$0xff]  }
  0x4e   : > { %5807 = vst [vmem:[%s9403_s26 + $0x8] sm:$0xf] %v9243_v0  ;;  %5808 = vst [vmem:[%s9403_s26 + $0xc] sm:$0xf] %v9243_v0  ;;  %8267 = vmatprep.mubr.msk.bf16.mxu0 %vm2059_vm0, %v8877_v3  ;;  %8523 = vmatprep.mubr.msk.bf16.mxu1 %vm2059_vm0, %v8878_v4  ;;  %v8884_v10 = vld [vmem:[%s9392_s9 + $0x418] sm:$0xff]   ;;  %v8886_v12 = vld [vmem:[%s9392_s9 + $0x420] sm:$0xff]  }
  0x4f   : > { %5809 = vst [vmem:[%s9403_s26 + $0x10] sm:$0xf] %v9243_v0  ;;  %5810 = vst [vmem:[%s9403_s26 + $0x14] sm:$0xf] %v9243_v0  ;;  %v8887_v13 = vld [vmem:[%s9392_s9 + $0x28] sm:$0xff]   ;;  %v8889_v15 = vld [vmem:[%s9392_s9 + $0x30] sm:$0xff]  }
  0x50   : > { %5811 = vst [vmem:[%s9403_s26 + $0x18] sm:$0xf] %v9243_v0  ;;  %5812 = vst [vmem:[%s9403_s26 + $0x1c] sm:$0xf] %v9243_v0  ;;  %8266 = vmatpush3.bf16.msra.mxu0 %v8876_v2  ;;  %8782 = vmatpush3.bf16.msra.mxu1 %v8876_v2  ;;  %v8888_v14 = vld [vmem:[%s9392_s9 + $0x428] sm:$0xff]   ;;  %v8890_v16 = vld [vmem:[%s9392_s9 + $0x430] sm:$0xff]  }
  0x51   : > { %5813 = vst [vmem:[%s9403_s26 + $0x20] sm:$0xf] %v9243_v0  ;;  %5814 = vst [vmem:[%s9403_s26 + $0x24] sm:$0xf] %v9243_v0  ;;  %v8891_v17 = vld [vmem:[%s9392_s9 + $0x38] sm:$0xff]   ;;  %v8893_v19 = vld [vmem:[%s9392_s9 + $0x40] sm:$0xff]  }
  0x52   : > { %5815 = vst [vmem:[%s9403_s26 + $0x28] sm:$0xf] %v9243_v0  ;;  %5816 = vst [vmem:[%s9403_s26 + $0x2c] sm:$0xf] %v9243_v0  ;;  %v8892_v18 = vld [vmem:[%s9392_s9 + $0x438] sm:$0xff]   ;;  %v8894_v20 = vld [vmem:[%s9392_s9 + $0x440] sm:$0xff]  }
  0x53   : > { %5817 = vst [vmem:[%s9403_s26 + $0x30] sm:$0xf] %v9243_v0  ;;  %5818 = vst [vmem:[%s9403_s26 + $0x34] sm:$0xf] %v9243_v0  ;;  %8268 = vmatmul.mubr.msk.bf16.vlgmr.msra.gmra.mxu0 %vm2059_vm0, %v8879_v5  ;;  %8524 = vmatmul.mubr.msk.bf16.vlgmr.msra.gmra.mxu1 %vm2059_vm0, %v8880_v6  ;;  %v8895_v21 = vld [vmem:[%s9392_s9 + $0x48] sm:$0xff]   ;;  %v8897_v23 = vld [vmem:[%s9392_s9 + $0x50] sm:$0xff]  }
  0x54   : > { %5819 = vst [vmem:[%s9403_s26 + $0x38] sm:$0xf] %v9243_v0  ;;  %5820 = vst [vmem:[%s9403_s26 + $0x3c] sm:$0xf] %v9243_v0  ;;  %8271 = vmatprep.mubr.msk.bf16.mxu0 %vm2059_vm0, %v8881_v7  ;;  %8527 = vmatprep.mubr.msk.bf16.mxu1 %vm2059_vm0, %v8882_v8  ;;  %v8896_v22 = vld [vmem:[%s9392_s9 + $0x448] sm:$0xff]   ;;  %v8898_v24 = vld [vmem:[%s9392_s9 + $0x450] sm:$0xff]  }
  0x55   : > { %5821 = vst [vmem:[%s9403_s26 + $0x40] sm:$0xf] %v9243_v0  ;;  %5822 = vst [vmem:[%s9403_s26 + $0x44] sm:$0xf] %v9243_v0  ;;  %v8899_v25 = vld [vmem:[%s9392_s9 + $0x58] sm:$0xff]   ;;  %v8901_v27 = vld [vmem:[%s9392_s9 + $0x60] sm:$0xff]  }
  0x56   : > { %5823 = vst [vmem:[%s9403_s26 + $0x48] sm:$0xf] %v9243_v0  ;;  %5824 = vst [vmem:[%s9403_s26 + $0x4c] sm:$0xf] %v9243_v0  ;;  %v8900_v26 = vld [vmem:[%s9392_s9 + $0x458] sm:$0xff]   ;;  %v8902_v28 = vld [vmem:[%s9392_s9 + $0x460] sm:$0xff]  }
  0x57   : > { %7179 = vst [vmem:[%s9403_s26 + $0x2d0] sm:$0xf] %v9243_v0  ;;  %7180 = vst [vmem:[%s9403_s26 + $0x2d4] sm:$0xf] %v9243_v0  ;;  %v8903_v29 = vld [vmem:[%s9392_s9 + $0x68] sm:$0xff]   ;;  %v8905_v31 = vld [vmem:[%s9392_s9 + $0x70] sm:$0xff]  }
  0x58   : > { %7181 = vst [vmem:[%s9403_s26 + $0x2d8] sm:$0xf] %v9243_v0  ;;  %7182 = vst [vmem:[%s9403_s26 + $0x2dc] sm:$0xf] %v9243_v0  ;;  %v8904_v30 = vld [vmem:[%s9392_s9 + $0x468] sm:$0xff]   ;;  %v8906_v32 = vld [vmem:[%s9392_s9 + $0x470] sm:$0xff]  }
  0x59   : > { %7183 = vst [vmem:[%s9403_s26 + $0x2e0] sm:$0xf] %v9243_v0  ;;  %7184 = vst [vmem:[%s9403_s26 + $0x2e4] sm:$0xf] %v9243_v0  ;;  %v8907_v33 = vld [vmem:[%s9392_s9 + $0x78] sm:$0xff]   ;;  %v8909_v35 = vld [vmem:[%s9392_s9 + $0x80] sm:$0xff]  }
  0x5a   : > { %7185 = vst [vmem:[%s9403_s26 + $0x2e8] sm:$0xf] %v9243_v0  ;;  %7186 = vst [vmem:[%s9403_s26 + $0x2ec] sm:$0xf] %v9243_v0  ;;  %v8908_v34 = vld [vmem:[%s9392_s9 + $0x478] sm:$0xff]   ;;  %v8910_v36 = vld [vmem:[%s9392_s9 + $0x480] sm:$0xff]  }
  0x5b   : > { %7187 = vst [vmem:[%s9403_s26 + $0x2f0] sm:$0xf] %v9243_v0  ;;  %7188 = vst [vmem:[%s9403_s26 + $0x2f4] sm:$0xf] %v9243_v0  ;;  %8272 = vmatmul.mubr.msk.bf16.gmra.mxu0 %vm2059_vm0, %v8883_v9  ;;  %8528 = vmatmul.mubr.msk.bf16.gmra.mxu1 %vm2059_vm0, %v8884_v10  ;;  %v8911_v37 = vld [vmem:[%s9392_s9 + $0x88] sm:$0xff]   ;;  %v8913_v39 = vld [vmem:[%s9392_s9 + $0x90] sm:$0xff]  }
  0x5c   : > { %7189 = vst [vmem:[%s9403_s26 + $0x2f8] sm:$0xf] %v9243_v0  ;;  %7190 = vst [vmem:[%s9403_s26 + $0x2fc] sm:$0xf] %v9243_v0  ;;  %8275 = vmatprep.mubr.msk.bf16.mxu0 %vm2059_vm0, %v8885_v11  ;;  %8531 = vmatprep.mubr.msk.bf16.mxu1 %vm2059_vm0, %v8886_v12  ;;  %v8912_v38 = vld [vmem:[%s9392_s9 + $0x488] sm:$0xff]   ;;  %v8914_v40 = vld [vmem:[%s9392_s9 + $0x490] sm:$0xff]  }
  0x5d   : > { %7191 = vst [vmem:[%s9403_s26 + $0x300] sm:$0xf] %v9243_v0  ;;  %7192 = vst [vmem:[%s9403_s26 + $0x304] sm:$0xf] %v9243_v0  ;;  %v8915_v41 = vld [vmem:[%s9392_s9 + $0x98] sm:$0xff]   ;;  %v8917_v43 = vld [vmem:[%s9392_s9 + $0xa0] sm:$0xff]  }
  0x5e   : > { %7193 = vst [vmem:[%s9403_s26 + $0x308] sm:$0xf] %v9243_v0  ;;  %7194 = vst [vmem:[%s9403_s26 + $0x30c] sm:$0xf] %v9243_v0  ;;  %v8916_v42 = vld [vmem:[%s9392_s9 + $0x498] sm:$0xff]   ;;  %v8918_v44 = vld [vmem:[%s9392_s9 + $0x4a0] sm:$0xff]  }
  0x5f   : > { %7195 = vst [vmem:[%s9403_s26 + $0x310] sm:$0xf] %v9243_v0  ;;  %7196 = vst [vmem:[%s9403_s26 + $0x314] sm:$0xf] %v9243_v0  ;;  %v8919_v45 = vld [vmem:[%s9392_s9 + $0xa8] sm:$0xff]   ;;  %v8921_v47 = vld [vmem:[%s9392_s9 + $0xb0] sm:$0xff]  }
  0x60   : > { %7197 = vst [vmem:[%s9403_s26 + $0x318] sm:$0xf] %v9243_v0  ;;  %7198 = vst [vmem:[%s9403_s26 + $0x31c] sm:$0xf] %v9243_v0  ;;  %v8920_v46 = vld [vmem:[%s9392_s9 + $0x4a8] sm:$0xff]   ;;  %v8922_v48 = vld [vmem:[%s9392_s9 + $0x4b0] sm:$0xff]  }
  0x61   : > { %7199 = vst [vmem:[%s9403_s26 + $0x50] sm:$0xf] %v9243_v0  ;;  %7200 = vst [vmem:[%s9403_s26 + $0x54] sm:$0xf] %v9243_v0  ;;  %v8923_v49 = vld [vmem:[%s9392_s9 + $0xb8] sm:$0xff]   ;;  %v8925_v51 = vld [vmem:[%s9392_s9 + $0xc0] sm:$0xff]  }
  0x62   : > { %7201 = vst [vmem:[%s9403_s26 + $0xa0] sm:$0xf] %v9243_v0  ;;  %7202 = vst [vmem:[%s9403_s26 + $0xa4] sm:$0xf] %v9243_v0  ;;  %v8924_v50 = vld [vmem:[%s9392_s9 + $0x4b8] sm:$0xff]   ;;  %v8926_v52 = vld [vmem:[%s9392_s9 + $0x4c0] sm:$0xff]  }
  0x63   : > { %7203 = vst [vmem:[%s9403_s26 + $0xf0] sm:$0xf] %v9243_v0  ;;  %7204 = vst [vmem:[%s9403_s26 + $0xf4] sm:$0xf] %v9243_v0  ;;  %8276 = vmatmul.mubr.msk.bf16.gmra.mxu0 %vm2059_vm0, %v8887_v13  ;;  %8532 = vmatmul.mubr.msk.bf16.gmra.mxu1 %vm2059_vm0, %v8888_v14  ;;  %v8927_v53 = vld [vmem:[%s9392_s9 + $0xc8] sm:$0xff]   ;;  %v8929_v55 = vld [vmem:[%s9392_s9 + $0xd0] sm:$0xff]  }
  0x64   : > { %7205 = vst [vmem:[%s9403_s26 + $0x140] sm:$0xf] %v9243_v0  ;;  %7206 = vst [vmem:[%s9403_s26 + $0x144] sm:$0xf] %v9243_v0  ;;  %8279 = vmatprep.mubr.msk.bf16.mxu0 %vm2059_vm0, %v8889_v15  ;;  %8535 = vmatprep.mubr.msk.bf16.mxu1 %vm2059_vm0, %v8890_v16  ;;  %v8928_v54 = vld [vmem:[%s9392_s9 + $0x4c8] sm:$0xff]   ;;  %v8930_v56 = vld [vmem:[%s9392_s9 + $0x4d0] sm:$0xff]  }
  0x65   : > { %7207 = vst [vmem:[%s9403_s26 + $0x190] sm:$0xf] %v9243_v0  ;;  %7208 = vst [vmem:[%s9403_s26 + $0x194] sm:$0xf] %v9243_v0  ;;  %v8931_v57 = vld [vmem:[%s9392_s9 + $0xd8] sm:$0xff]   ;;  %v8933_v59 = vld [vmem:[%s9392_s9 + $0xe0] sm:$0xff]  }
  0x66   : > { %7209 = vst [vmem:[%s9403_s26 + $0x1e0] sm:$0xf] %v9243_v0  ;;  %7210 = vst [vmem:[%s9403_s26 + $0x1e4] sm:$0xf] %v9243_v0  ;;  %v8932_v58 = vld [vmem:[%s9392_s9 + $0x4d8] sm:$0xff]   ;;  %v8934_v60 = vld [vmem:[%s9392_s9 + $0x4e0] sm:$0xff]  }
  0x67   : > { %7211 = vst [vmem:[%s9403_s26 + $0x230] sm:$0xf] %v9243_v0  ;;  %7212 = vst [vmem:[%s9403_s26 + $0x234] sm:$0xf] %v9243_v0  ;;  %v8935_v61 = vld [vmem:[%s9392_s9 + $0xe8] sm:$0xff]   ;;  %v8937_v63 = vld [vmem:[%s9392_s9 + $0xf0] sm:$0xff]  }
  0x68   : > { %7213 = vst [vmem:[%s9403_s26 + $0x280] sm:$0xf] %v9243_v0  ;;  %7214 = vst [vmem:[%s9403_s26 + $0x284] sm:$0xf] %v9243_v0  ;;  %v8936_v62 = vld [vmem:[%s9392_s9 + $0x4e8] sm:$0xff]   ;;  %v8939_v1 = vld [vmem:[%s9392_s9 + $0xf8] sm:$0xff]  }
  0x69   : > { %7215 = vst [vmem:[%s9403_s26 + $0x98] sm:$0xf] %v9243_v0  ;;  %7216 = vst [vmem:[%s9403_s26 + $0x9c] sm:$0xf] %v9243_v0  ;;  %v8940_v2 = vld [vmem:[%s9392_s9 + $0x4f8] sm:$0xff]   ;;  %v8941_v3 = vld [vmem:[%s9392_s9 + $0x100] sm:$0xff]  }
  0x6a   : > { %7217 = vst [vmem:[%s9403_s26 + $0xe8] sm:$0xf] %v9243_v0  ;;  %7218 = vst [vmem:[%s9403_s26 + $0xec] sm:$0xf] %v9243_v0  ;;  %v8942_v4 = vld [vmem:[%s9392_s9 + $0x500] sm:$0xff]   ;;  %v8943_v5 = vld [vmem:[%s9392_s9 + $0x108] sm:$0xff]  }
  0x6b   : > { %7219 = vst [vmem:[%s9403_s26 + $0x138] sm:$0xf] %v9243_v0  ;;  %7220 = vst [vmem:[%s9403_s26 + $0x13c] sm:$0xf] %v9243_v0  ;;  %8280 = vmatmul.mubr.msk.bf16.gmra.mxu0 %vm2059_vm0, %v8891_v17  ;;  %8536 = vmatmul.mubr.msk.bf16.gmra.mxu1 %vm2059_vm0, %v8892_v18  ;;  %v8944_v6 = vld [vmem:[%s9392_s9 + $0x508] sm:$0xff]   ;;  %v8945_v7 = vld [vmem:[%s9392_s9 + $0x110] sm:$0xff]  }
  0x6c   : > { %7221 = vst [vmem:[%s9403_s26 + $0x188] sm:$0xf] %v9243_v0  ;;  %7222 = vst [vmem:[%s9403_s26 + $0x18c] sm:$0xf] %v9243_v0  ;;  %8283 = vmatprep.mubr.msk.bf16.mxu0 %vm2059_vm0, %v8893_v19  ;;  %8539 = vmatprep.mubr.msk.bf16.mxu1 %vm2059_vm0, %v8894_v20  ;;  %v8946_v8 = vld [vmem:[%s9392_s9 + $0x510] sm:$0xff]   ;;  %v8947_v9 = vld [vmem:[%s9392_s9 + $0x118] sm:$0xff]  }
  0x6d   : > { %7223 = vst [vmem:[%s9403_s26 + $0x1d8] sm:$0xf] %v9243_v0  ;;  %7224 = vst [vmem:[%s9403_s26 + $0x1dc] sm:$0xf] %v9243_v0  ;;  %v8948_v10 = vld [vmem:[%s9392_s9 + $0x518] sm:$0xff]   ;;  %v8949_v11 = vld [vmem:[%s9392_s9 + $0x120] sm:$0xff]  }
  0x6e   : > { %7225 = vst [vmem:[%s9403_s26 + $0x228] sm:$0xf] %v9243_v0  ;;  %7226 = vst [vmem:[%s9403_s26 + $0x22c] sm:$0xf] %v9243_v0  ;;  %v8950_v12 = vld [vmem:[%s9392_s9 + $0x520] sm:$0xff]   ;;  %v8951_v13 = vld [vmem:[%s9392_s9 + $0x128] sm:$0xff]  }
  0x6f   : > { %7227 = vst [vmem:[%s9403_s26 + $0x278] sm:$0xf] %v9243_v0  ;;  %7228 = vst [vmem:[%s9403_s26 + $0x27c] sm:$0xf] %v9243_v0  ;;  %v8952_v14 = vld [vmem:[%s9392_s9 + $0x528] sm:$0xff]   ;;  %v8953_v15 = vld [vmem:[%s9392_s9 + $0x130] sm:$0xff]  }
  0x70   : > { %7229 = vst [vmem:[%s9403_s26 + $0x2c8] sm:$0xf] %v9243_v0  ;;  %7230 = vst [vmem:[%s9403_s26 + $0x2cc] sm:$0xf] %v9243_v0  ;;  %v8938_v0 = vld [vmem:[%s9392_s9 + $0x4f0] sm:$0xff]   ;;  %v8955_v17 = vld [vmem:[%s9392_s9 + $0x138] sm:$0xff]  }
  0x71   : > { %v8954_v16 = vld [vmem:[%s9392_s9 + $0x530] sm:$0xff]   ;;  %v8956_v18 = vld [vmem:[%s9392_s9 + $0x538] sm:$0xff]   ;;  %v8957_v19 = vld [vmem:[%s9392_s9 + $0x140] sm:$0xff]  }
  0x72   : > { %v8958_v20 = vld [vmem:[%s9392_s9 + $0x540] sm:$0xff]  }
  0x73   : > { %8284 = vmatmul.mubr.msk.bf16.gmra.mxu0 %vm2059_vm0, %v8895_v21  ;;  %8540 = vmatmul.mubr.msk.bf16.gmra.mxu1 %vm2059_vm0, %v8896_v22  ;;  %v8959_v21 = vld [vmem:[%s9392_s9 + $0x148] sm:$0xff]  }
  0x74   : > { %8287 = vmatprep.mubr.msk.bf16.mxu0 %vm2059_vm0, %v8897_v23  ;;  %8543 = vmatprep.mubr.msk.bf16.mxu1 %vm2059_vm0, %v8898_v24  ;;  %v8960_v22 = vld [vmem:[%s9392_s9 + $0x548] sm:$0xff]   ;;  %v8961_v23 = vld [vmem:[%s9392_s9 + $0x150] sm:$0xff]  }
  0x75   : > { %v8962_v24 = vld [vmem:[%s9392_s9 + $0x550] sm:$0xff]  }
  0x7b   : > { %8288 = vmatmul.mubr.msk.bf16.gmra.mxu0 %vm2059_vm0, %v8899_v25  ;;  %8544 = vmatmul.mubr.msk.bf16.gmra.mxu1 %vm2059_vm0, %v8900_v26  ;;  %v8963_v25 = vld [vmem:[%s9392_s9 + $0x158] sm:$0xff]  }
  0x7c   : > { %8291 = vmatprep.mubr.msk.bf16.mxu0 %vm2059_vm0, %v8901_v27  ;;  %8547 = vmatprep.mubr.msk.bf16.mxu1 %vm2059_vm0, %v8902_v28  ;;  %v8964_v26 = vld [vmem:[%s9392_s9 + $0x558] sm:$0xff]   ;;  %v8965_v27 = vld [vmem:[%s9392_s9 + $0x160] sm:$0xff]  }
  0x7d   : > { %v8966_v28 = vld [vmem:[%s9392_s9 + $0x560] sm:$0xff]  }
  0x83   : > { %8292 = vmatmul.mubr.msk.bf16.gmra.mxu0 %vm2059_vm0, %v8903_v29  ;;  %8548 = vmatmul.mubr.msk.bf16.gmra.mxu1 %vm2059_vm0, %v8904_v30  ;;  %v8967_v29 = vld [vmem:[%s9392_s9 + $0x168] sm:$0xff]  }
  0x84   : > { %8295 = vmatprep.mubr.msk.bf16.mxu0 %vm2059_vm0, %v8905_v31  ;;  %8551 = vmatprep.mubr.msk.bf16.mxu1 %vm2059_vm0, %v8906_v32  ;;  %v8968_v30 = vld [vmem:[%s9392_s9 + $0x568] sm:$0xff]   ;;  %v8969_v31 = vld [vmem:[%s9392_s9 + $0x170] sm:$0xff]  }
  0x85   : > { %v8970_v32 = vld [vmem:[%s9392_s9 + $0x570] sm:$0xff]  }
  0x8b   : > { %8296 = vmatmul.mubr.msk.bf16.gmra.mxu0 %vm2059_vm0, %v8907_v33  ;;  %8552 = vmatmul.mubr.msk.bf16.gmra.mxu1 %vm2059_vm0, %v8908_v34  ;;  %v8971_v33 = vld [vmem:[%s9392_s9 + $0x178] sm:$0xff]  }
  0x8c   : > { %8299 = vmatprep.mubr.msk.bf16.mxu0 %vm2059_vm0, %v8909_v35  ;;  %8555 = vmatprep.mubr.msk.bf16.mxu1 %vm2059_vm0, %v8910_v36  ;;  %v8972_v34 = vld [vmem:[%s9392_s9 + $0x578] sm:$0xff]   ;;  %v8973_v35 = vld [vmem:[%s9392_s9 + $0x180] sm:$0xff]  }
  0x8d   : > { %v8974_v36 = vld [vmem:[%s9392_s9 + $0x580] sm:$0xff]  }
  0x93   : > { %8300 = vmatmul.mubr.msk.bf16.gmra.mxu0 %vm2059_vm0, %v8911_v37  ;;  %8556 = vmatmul.mubr.msk.bf16.gmra.mxu1 %vm2059_vm0, %v8912_v38  ;;  %v8975_v37 = vld [vmem:[%s9392_s9 + $0x188] sm:$0xff]  }
  0x94   : > { %8303 = vmatprep.mubr.msk.bf16.mxu0 %vm2059_vm0, %v8913_v39  ;;  %8559 = vmatprep.mubr.msk.bf16.mxu1 %vm2059_vm0, %v8914_v40  ;;  %v8976_v38 = vld [vmem:[%s9392_s9 + $0x588] sm:$0xff]   ;;  %v8977_v39 = vld [vmem:[%s9392_s9 + $0x190] sm:$0xff]  }
  0x95   : > { %v8978_v40 = vld [vmem:[%s9392_s9 + $0x590] sm:$0xff]  }
  0x9b   : > { %8304 = vmatmul.mubr.msk.bf16.gmra.mxu0 %vm2059_vm0, %v8915_v41  ;;  %8560 = vmatmul.mubr.msk.bf16.gmra.mxu1 %vm2059_vm0, %v8916_v42  ;;  %v9749_v41 = vld [vmem:[#allocation7] ss:$0 sm:$0xff] }
  0x9c   : > { %8307 = vmatprep.mubr.msk.bf16.mxu0 %vm2059_vm0, %v8917_v43  ;;  %8563 = vmatprep.mubr.msk.bf16.mxu1 %vm2059_vm0, %v8918_v44 }
  0xa3   : > { %8308 = vmatmul.mubr.msk.bf16.gmra.mxu0 %vm2059_vm0, %v8919_v45  ;;  %8564 = vmatmul.mubr.msk.bf16.gmra.mxu1 %vm2059_vm0, %v8920_v46 }
  0xa4   : > { %8311 = vmatprep.mubr.msk.bf16.mxu0 %vm2059_vm0, %v8921_v47  ;;  %8567 = vmatprep.mubr.msk.bf16.mxu1 %vm2059_vm0, %v8922_v48  ;;  %v8979_v48 = vld [vmem:[%s9392_s9 + $0x198] sm:$0xff]  }
  0xab   : > { %8312 = vmatmul.mubr.msk.bf16.gmra.mxu0 %vm2059_vm0, %v8923_v49  ;;  %8568 = vmatmul.mubr.msk.bf16.gmra.mxu1 %vm2059_vm0, %v8924_v50  ;;  %v8980_v49 = vld [vmem:[%s9392_s9 + $0x598] sm:$0xff]  }
  0xac   : > { %8315 = vmatprep.mubr.msk.bf16.mxu0 %vm2059_vm0, %v8925_v51  ;;  %8571 = vmatprep.mubr.msk.bf16.mxu1 %vm2059_vm0, %v8926_v52 }
  0xb3   : > { %8316 = vmatmul.mubr.msk.bf16.gmra.mxu0 %vm2059_vm0, %v8927_v53  ;;  %8572 = vmatmul.mubr.msk.bf16.gmra.mxu1 %vm2059_vm0, %v8928_v54  ;;  %v8981_v54 = vld [vmem:[%s9392_s9 + $0x1a0] sm:$0xff]  }
  0xb4   : > { %8319 = vmatprep.mubr.msk.bf16.mxu0 %vm2059_vm0, %v8929_v55  ;;  %8575 = vmatprep.mubr.msk.bf16.mxu1 %vm2059_vm0, %v8930_v56  ;;  %v8982_v55 = vld [vmem:[%s9392_s9 + $0x5a0] sm:$0xff]  }
  0xbb   : > { %8320 = vmatmul.mubr.msk.bf16.gmra.mxu0 %vm2059_vm0, %v8931_v57  ;;  %8576 = vmatmul.mubr.msk.bf16.gmra.mxu1 %vm2059_vm0, %v8932_v58 }
  0xbc   : > { %8323 = vmatprep.mubr.msk.bf16.mxu0 %vm2059_vm0, %v8933_v59  ;;  %8579 = vmatprep.mubr.msk.bf16.mxu1 %vm2059_vm0, %v8934_v60 }
  0xc3   : > { %8324 = vmatmul.mubr.msk.bf16.gmra.mxu0 %vm2059_vm0, %v8935_v61  ;;  %8580 = vmatmul.mubr.msk.bf16.gmra.mxu1 %vm2059_vm0, %v8936_v62 }
  0xc4   : > { %8327 = vmatprep.mubr.msk.bf16.mxu0 %vm2059_vm0, %v8937_v63  ;;  %8583 = vmatprep.mubr.msk.bf16.mxu1 %vm2059_vm0, %v8938_v0 }
  0xcb   : > { %8328 = vmatmul.mubr.msk.bf16.gmra.mxu0 %vm2059_vm0, %v8939_v1  ;;  %8584 = vmatmul.mubr.msk.bf16.gmra.mxu1 %vm2059_vm0, %v8940_v2 }
  0xcc   : > { %8331 = vmatprep.mubr.msk.bf16.mxu0 %vm2059_vm0, %v8941_v3  ;;  %8587 = vmatprep.mubr.msk.bf16.mxu1 %vm2059_vm0, %v8942_v4 }
  0xd3   : > { %8332 = vmatmul.mubr.msk.bf16.gmra.mxu0 %vm2059_vm0, %v8943_v5  ;;  %8588 = vmatmul.mubr.msk.bf16.gmra.mxu1 %vm2059_vm0, %v8944_v6 }
  0xd4   : > { %8335 = vmatprep.mubr.msk.bf16.mxu0 %vm2059_vm0, %v8945_v7  ;;  %8591 = vmatprep.mubr.msk.bf16.mxu1 %vm2059_vm0, %v8946_v8 }
  0xdb   : > { %8336 = vmatmul.mubr.msk.bf16.gmra.mxu0 %vm2059_vm0, %v8947_v9  ;;  %8592 = vmatmul.mubr.msk.bf16.gmra.mxu1 %vm2059_vm0, %v8948_v10 }
  0xdc   : > { %8339 = vmatprep.mubr.msk.bf16.mxu0 %vm2059_vm0, %v8949_v11  ;;  %8595 = vmatprep.mubr.msk.bf16.mxu1 %vm2059_vm0, %v8950_v12 }
  0xe3   : > { %8340 = vmatmul.mubr.msk.bf16.gmra.mxu0 %vm2059_vm0, %v8951_v13  ;;  %8596 = vmatmul.mubr.msk.bf16.gmra.mxu1 %vm2059_vm0, %v8952_v14  ;;  %v8983_v14 = vld [vmem:[%s9392_s9 + $0x1a8] sm:$0xff]  }
  0xe4   : > { %8343 = vmatprep.mubr.msk.bf16.mxu0 %vm2059_vm0, %v8953_v15  ;;  %8599 = vmatprep.mubr.msk.bf16.mxu1 %vm2059_vm0, %v8954_v16  ;;  %v8984_v15 = vld [vmem:[%s9392_s9 + $0x5a8] sm:$0xff]  }
  0xeb   : > { %8344 = vmatmul.mubr.msk.bf16.gmra.mxu0 %vm2059_vm0, %v8955_v17  ;;  %8600 = vmatmul.mubr.msk.bf16.gmra.mxu1 %vm2059_vm0, %v8956_v18 }
  0xec   : > { %8347 = vmatprep.mubr.msk.bf16.mxu0 %vm2059_vm0, %v8957_v19  ;;  %8603 = vmatprep.mubr.msk.bf16.mxu1 %vm2059_vm0, %v8958_v20  ;;  %v8985_v20 = vld [vmem:[%s9392_s9 + $0x1b0] sm:$0xff]  }
  0xf3   : > { %8348 = vmatmul.mubr.msk.bf16.gmra.mxu0 %vm2059_vm0, %v8959_v21  ;;  %8604 = vmatmul.mubr.msk.bf16.gmra.mxu1 %vm2059_vm0, %v8960_v22  ;;  %v8986_v21 = vld [vmem:[%s9392_s9 + $0x5b0] sm:$0xff]  }
  0xf4   : > { %8351 = vmatprep.mubr.msk.bf16.mxu0 %vm2059_vm0, %v8961_v23  ;;  %8607 = vmatprep.mubr.msk.bf16.mxu1 %vm2059_vm0, %v8962_v24 }
  0xfb   : > { %8352 = vmatmul.mubr.msk.bf16.gmra.mxu0 %vm2059_vm0, %v8963_v25  ;;  %8608 = vmatmul.mubr.msk.bf16.gmra.mxu1 %vm2059_vm0, %v8964_v26 }
  0xfc   : > { %8355 = vmatprep.mubr.msk.bf16.mxu0 %vm2059_vm0, %v8965_v27  ;;  %8611 = vmatprep.mubr.msk.bf16.mxu1 %vm2059_vm0, %v8966_v28 }
 0x103   : > { %8356 = vmatmul.mubr.msk.bf16.gmra.mxu0 %vm2059_vm0, %v8967_v29  ;;  %8612 = vmatmul.mubr.msk.bf16.gmra.mxu1 %vm2059_vm0, %v8968_v30 }
 0x104   : > { %8359 = vmatprep.mubr.msk.bf16.mxu0 %vm2059_vm0, %v8969_v31  ;;  %8615 = vmatprep.mubr.msk.bf16.mxu1 %vm2059_vm0, %v8970_v32 }
 0x10b   : > { %8360 = vmatmul.mubr.msk.bf16.gmra.mxu0 %vm2059_vm0, %v8971_v33  ;;  %8616 = vmatmul.mubr.msk.bf16.gmra.mxu1 %vm2059_vm0, %v8972_v34 }
 0x10c   : > { %8363 = vmatprep.mubr.msk.bf16.mxu0 %vm2059_vm0, %v8973_v35  ;;  %8619 = vmatprep.mubr.msk.bf16.mxu1 %vm2059_vm0, %v8974_v36 }
 0x113   : > { %v8269_v42 = vpop.f32.mrf.mxu0  ;;  %8364 = vmatmul.mubr.msk.bf16.gmra.mxu0 %vm2059_vm0, %v8975_v37  ;;  %v8525_v43 = vpop.f32.mrf.mxu1  ;;  %8620 = vmatmul.mubr.msk.bf16.gmra.mxu1 %vm2059_vm0, %v8976_v38 }
 0x114   : > { %v2871_v44 = vadd.f32 %v8269_v42, %v9749_v41  ;;  %v3895_v45 = vadd.f32 %v8525_v43, %v9749_v41  ;;  %8367 = vmatprep.mubr.msk.bf16.mxu0 %vm2059_vm0, %v8977_v39  ;;  %8623 = vmatprep.mubr.msk.bf16.mxu1 %vm2059_vm0, %v8978_v40 }
 0x115   : > { %v2862_v46 = vpop.f32.mrf.mxu0  ;;  %v3886_v47 = vpop.f32.mrf.mxu1 }
 0x116   : > { %v4911_v50 = vmax.f32 %v2871_v44, 0.0  ;;  %v5167_v51 = vmax.f32 %v3895_v45, 0.0  ;;  %v2863_v52 = vadd.f32 %v9749_v41, %v2862_v46  ;;  %v3887_v53 = vadd.f32 %v9749_v41, %v3886_v47  ;;  %v8987_v47 = vld [vmem:[%s9392_s9 + $0x1b8] sm:$0xff]  }
 0x117   : > { %v8270_v56 = vpop.f32.mrf.mxu0  ;;  %v8526_v57 = vpop.f32.mrf.mxu1 }
 0x118   : > { %v4909_v58 = vmax.f32 %v2863_v52, 0.0  ;;  %v5165_v59 = vmax.f32 %v3887_v53, 0.0  ;;  %v2874_v60 = vadd.f32 %v8270_v56, %v9749_v41  ;;  %v3898_v61 = vadd.f32 %v8526_v57, %v9749_v41  ;;  %v8989_v53 = vld [vmem:[%s9392_s9 + $0x1c0] sm:$0xff]  }
 0x119   : > { %v2865_v62 = vpop.f32.mrf.mxu0  ;;  %v3889_v63 = vpop.f32.mrf.mxu1 }
 0x11a   : > { %v9765_v0 = vmax.f32 %v4909_v58, %v4911_v50  ;;  %v9767_v1 = vmax.f32 %v5165_v59, %v5167_v51  ;;  %v4912_v2 = vmax.f32 %v2874_v60, 0.0  ;;  %v5168_v3 = vmax.f32 %v3898_v61, 0.0 }
 0x11b   : > { %v2866_v4 = vadd.f32 %v9749_v41, %v2865_v62  ;;  %v3890_v5 = vadd.f32 %v9749_v41, %v3889_v63  ;;  %v8273_v6 = vpop.f32.mrf.mxu0  ;;  %8368 = vmatmul.mubr.msk.bf16.gmra.mxu0 %vm2059_vm0, %v8979_v48  ;;  %v8529_v7 = vpop.f32.mrf.mxu1  ;;  %8624 = vmatmul.mubr.msk.bf16.gmra.mxu1 %vm2059_vm0, %v8980_v49  ;;  %v8988_v48 = vld [vmem:[%s9392_s9 + $0x5b8] sm:$0xff]  }
 0x11c   : > { %v2887_v8 = vadd.f32 %v8273_v6, %v9749_v41  ;;  %v3911_v9 = vadd.f32 %v8529_v7, %v9749_v41  ;;  %8371 = vmatprep.mubr.msk.bf16.mxu0 %vm2059_vm0, %v8981_v54  ;;  %8627 = vmatprep.mubr.msk.bf16.mxu1 %vm2059_vm0, %v8982_v55  ;;  %v8990_v54 = vld [vmem:[%s9392_s9 + $0x5c0] sm:$0xff]  }
 0x11d   : > { %v4910_v10 = vmax.f32 %v2866_v4, 0.0  ;;  %v5166_v11 = vmax.f32 %v3890_v5, 0.0  ;;  %v2878_v12 = vpop.f32.mrf.mxu0  ;;  %v3902_v13 = vpop.f32.mrf.mxu1 }
 0x11e   : > { %v4915_v16 = vmax.f32 %v2887_v8, 0.0  ;;  %v5171_v17 = vmax.f32 %v3911_v9, 0.0  ;;  %v2879_v18 = vadd.f32 %v9749_v41, %v2878_v12  ;;  %v3903_v19 = vadd.f32 %v9749_v41, %v3902_v13 }
 0x11f   : > { %v9783_v22 = vmax.f32 %v4910_v10, %v4912_v2  ;;  %v9785_v23 = vmax.f32 %v5166_v11, %v5168_v3  ;;  %v8274_v24 = vpop.f32.mrf.mxu0  ;;  %v8530_v25 = vpop.f32.mrf.mxu1 }
 0x120   : > { %v4913_v26 = vmax.f32 %v2879_v18, 0.0  ;;  %v5169_v27 = vmax.f32 %v3903_v19, 0.0  ;;  %v2890_v28 = vadd.f32 %v8274_v24, %v9749_v41  ;;  %v3914_v29 = vadd.f32 %v8530_v25, %v9749_v41  ;;  %v8992_v18 = vld [vmem:[%s9392_s9 + $0x5c8] sm:$0xff]   ;;  %v8993_v25 = vld [vmem:[%s9392_s9 + $0x1d0] sm:$0xff]  }
 0x121   : > { %v2881_v30 = vpop.f32.mrf.mxu0  ;;  %v3905_v31 = vpop.f32.mrf.mxu1 }
 0x122   : > { %v9789_v32 = vmax.f32 %v4913_v26, %v4915_v16  ;;  %v9791_v33 = vmax.f32 %v5169_v27, %v5171_v17  ;;  %v4916_v34 = vmax.f32 %v2890_v28, 0.0  ;;  %v5172_v35 = vmax.f32 %v3914_v29, 0.0  ;;  %v8991_v17 = vld [vmem:[%s9392_s9 + $0x1c8] sm:$0xff]   ;;  %v8994_v26 = vld [vmem:[%s9392_s9 + $0x5d0] sm:$0xff]  }
 0x123   : > { %v2882_v36 = vadd.f32 %v9749_v41, %v2881_v30  ;;  %v3906_v37 = vadd.f32 %v9749_v41, %v3905_v31  ;;  %v8277_v38 = vpop.f32.mrf.mxu0  ;;  %8372 = vmatmul.mubr.msk.bf16.gmra.mxu0 %vm2059_vm0, %v8983_v14  ;;  %v8533_v39 = vpop.f32.mrf.mxu1  ;;  %8628 = vmatmul.mubr.msk.bf16.gmra.mxu1 %vm2059_vm0, %v8984_v15 }
 0x124   : > { %v2903_v40 = vadd.f32 %v8277_v38, %v9749_v41  ;;  %v3927_v42 = vadd.f32 %v8533_v39, %v9749_v41  ;;  %8375 = vmatprep.mubr.msk.bf16.mxu0 %vm2059_vm0, %v8985_v20  ;;  %8631 = vmatprep.mubr.msk.bf16.mxu1 %vm2059_vm0, %v8986_v21 }
 0x125   : > { %v4914_v43 = vmax.f32 %v2882_v36, 0.0  ;;  %v5170_v44 = vmax.f32 %v3906_v37, 0.0  ;;  %v2894_v45 = vpop.f32.mrf.mxu0  ;;  %v3918_v46 = vpop.f32.mrf.mxu1 }
 0x126   : > { %v4919_v49 = vmax.f32 %v2903_v40, 0.0  ;;  %v5175_v50 = vmax.f32 %v3927_v42, 0.0  ;;  %v2895_v51 = vadd.f32 %v9749_v41, %v2894_v45  ;;  %v3919_v52 = vadd.f32 %v9749_v41, %v3918_v46 }
 0x127   : > { %v9807_v55 = vmax.f32 %v4914_v43, %v4916_v34  ;;  %v9809_v56 = vmax.f32 %v5170_v44, %v5172_v35  ;;  %v8278_v57 = vpop.f32.mrf.mxu0  ;;  %v8534_v58 = vpop.f32.mrf.mxu1 }
 0x128   : > { %v4917_v59 = vmax.f32 %v2895_v51, 0.0  ;;  %v5173_v60 = vmax.f32 %v3919_v52, 0.0  ;;  %v2906_v61 = vadd.f32 %v8278_v57, %v9749_v41  ;;  %v3930_v62 = vadd.f32 %v8534_v58, %v9749_v41 }
 0x129   : > { %v2897_v63 = vpop.f32.mrf.mxu0  ;;  %v3921_v2 = vpop.f32.mrf.mxu1 }
 0x12a   : > { %v9813_v3 = vmax.f32 %v4917_v59, %v4919_v49  ;;  %v9815_v4 = vmax.f32 %v5173_v60, %v5175_v50  ;;  %v4920_v5 = vmax.f32 %v2906_v61, 0.0  ;;  %v5176_v6 = vmax.f32 %v3930_v62, 0.0  ;;  %v8995_v62 = vld [vmem:[%s9392_s9 + $0x1d8] sm:$0xff]  }
 0x12b   : > { %v2898_v7 = vadd.f32 %v9749_v41, %v2897_v63  ;;  %v3922_v8 = vadd.f32 %v9749_v41, %v3921_v2  ;;  %v8281_v9 = vpop.f32.mrf.mxu0  ;;  %8376 = vmatmul.mubr.msk.bf16.gmra.mxu0 %vm2059_vm0, %v8987_v47  ;;  %v8537_v10 = vpop.f32.mrf.mxu1  ;;  %8632 = vmatmul.mubr.msk.bf16.gmra.mxu1 %vm2059_vm0, %v8988_v48  ;;  %v8996_v63 = vld [vmem:[%s9392_s9 + $0x5d8] sm:$0xff]  }
 0x12c   : > { %v2919_v11 = vadd.f32 %v8281_v9, %v9749_v41  ;;  %v3943_v12 = vadd.f32 %v8537_v10, %v9749_v41  ;;  %8379 = vmatprep.mubr.msk.bf16.mxu0 %vm2059_vm0, %v8989_v53  ;;  %8635 = vmatprep.mubr.msk.bf16.mxu1 %vm2059_vm0, %v8990_v54  ;;  %v8998_v9 = vld [vmem:[%s9392_s9 + $0x5e0] sm:$0xff]  }
 0x12d   : > { %v4918_v13 = vmax.f32 %v2898_v7, 0.0  ;;  %v5174_v14 = vmax.f32 %v3922_v8, 0.0  ;;  %v2910_v15 = vpop.f32.mrf.mxu0  ;;  %v3934_v16 = vpop.f32.mrf.mxu1  ;;  %v8997_v8 = vld [vmem:[%s9392_s9 + $0x1e0] sm:$0xff]  }
 0x12e   : > { %v4923_v19 = vmax.f32 %v2919_v11, 0.0  ;;  %v5179_v20 = vmax.f32 %v3943_v12, 0.0  ;;  %v2911_v21 = vadd.f32 %v9749_v41, %v2910_v15  ;;  %v3935_v24 = vadd.f32 %v9749_v41, %v3934_v16 }
 0x12f   : > { %v9831_v27 = vmax.f32 %v4918_v13, %v4920_v5  ;;  %v9833_v28 = vmax.f32 %v5174_v14, %v5176_v6  ;;  %v8282_v29 = vpop.f32.mrf.mxu0  ;;  %v8538_v30 = vpop.f32.mrf.mxu1 }
 0x130   : > { %v4921_v31 = vmax.f32 %v2911_v21, 0.0  ;;  %v5177_v34 = vmax.f32 %v3935_v24, 0.0  ;;  %v2922_v35 = vadd.f32 %v8282_v29, %v9749_v41  ;;  %v3946_v36 = vadd.f32 %v8538_v30, %v9749_v41 }
 0x131   : > { %v2913_v37 = vpop.f32.mrf.mxu0  ;;  %v3937_v38 = vpop.f32.mrf.mxu1 }
 0x132   : > { %v9837_v39 = vmax.f32 %v4921_v31, %v4923_v19  ;;  %v9839_v40 = vmax.f32 %v5177_v34, %v5179_v20  ;;  %v4924_v42 = vmax.f32 %v2922_v35, 0.0  ;;  %v5180_v43 = vmax.f32 %v3946_v36, 0.0 }
 0x133   : > { %v2914_v44 = vadd.f32 %v9749_v41, %v2913_v37  ;;  %v3938_v45 = vadd.f32 %v9749_v41, %v3937_v38  ;;  %v8285_v46 = vpop.f32.mrf.mxu0  ;;  %8380 = vmatmul.mubr.msk.bf16.gmra.mxu0 %vm2059_vm0, %v8991_v17  ;;  %v8541_v47 = vpop.f32.mrf.mxu1  ;;  %8636 = vmatmul.mubr.msk.bf16.gmra.mxu1 %vm2059_vm0, %v8992_v18 }
 0x134   : > { %v2935_v48 = vadd.f32 %v8285_v46, %v9749_v41  ;;  %v3959_v49 = vadd.f32 %v8541_v47, %v9749_v41  ;;  %8383 = vmatprep.mubr.msk.bf16.mxu0 %vm2059_vm0, %v8993_v25  ;;  %8639 = vmatprep.mubr.msk.bf16.mxu1 %vm2059_vm0, %v8994_v26 }
 0x135   : > { %v4922_v50 = vmax.f32 %v2914_v44, 0.0  ;;  %v5178_v51 = vmax.f32 %v3938_v45, 0.0  ;;  %v2926_v52 = vpop.f32.mrf.mxu0  ;;  %v3950_v53 = vpop.f32.mrf.mxu1  ;;  %v9000_v44 = vld [vmem:[%s9392_s9 + $0x5e8] sm:$0xff]  }
 0x136   : > { %v2927_v54 = vadd.f32 %v9749_v41, %v2926_v52  ;;  %v3951_v57 = vadd.f32 %v9749_v41, %v3950_v53  ;;  %v4927_v2 = vmax.f32 %v2935_v48, 0.0  ;;  %v5183_v5 = vmax.f32 %v3959_v49, 0.0  ;;  %v9001_v49 = vld [vmem:[%s9392_s9 + $0x1f0] sm:$0xff]  }
 0x137   : > { %v9851_v58 = vmax.f32 %v4922_v50, %v4924_v42  ;;  %v9853_v59 = vmax.f32 %v5178_v51, %v5180_v43  ;;  %v8286_v60 = vpop.f32.mrf.mxu0  ;;  %v8542_v61 = vpop.f32.mrf.mxu1  ;;  %v8999_v43 = vld [vmem:[%s9392_s9 + $0x1e8] sm:$0xff]   ;;  %v9002_v50 = vld [vmem:[%s9392_s9 + $0x5f0] sm:$0xff]  }
 0x138   : > { %v4925_v6 = vmax.f32 %v2927_v54, 0.0  ;;  %v5181_v7 = vmax.f32 %v3951_v57, 0.0  ;;  %v2938_v10 = vadd.f32 %v8286_v60, %v9749_v41  ;;  %v3962_v11 = vadd.f32 %v8542_v61, %v9749_v41 }
 0x139   : > { %v2929_v12 = vpop.f32.mrf.mxu0  ;;  %v3953_v13 = vpop.f32.mrf.mxu1 }
 0x13a   : > { %v9861_v14 = vmax.f32 %v4925_v6, %v4927_v2  ;;  %v9863_v15 = vmax.f32 %v5181_v7, %v5183_v5  ;;  %v2930_v16 = vadd.f32 %v9749_v41, %v2929_v12  ;;  %v3954_v17 = vadd.f32 %v9749_v41, %v3953_v13 }
 0x13b   : > { %v8289_v18 = vpop.f32.mrf.mxu0  ;;  %8384 = vmatmul.mubr.msk.bf16.gmra.mxu0 %vm2059_vm0, %v8995_v62  ;;  %v8545_v19 = vpop.f32.mrf.mxu1  ;;  %8640 = vmatmul.mubr.msk.bf16.gmra.mxu1 %vm2059_vm0, %v8996_v63  ;;  %v4928_v24 = vmax.f32 %v2938_v10, 0.0  ;;  %v5184_v25 = vmax.f32 %v3962_v11, 0.0 }
 0x13c   : > { %v2951_v20 = vadd.f32 %v8289_v18, %v9749_v41  ;;  %v3975_v21 = vadd.f32 %v8545_v19, %v9749_v41  ;;  %8387 = vmatprep.mubr.msk.bf16.mxu0 %vm2059_vm0, %v8997_v8  ;;  %8643 = vmatprep.mubr.msk.bf16.mxu1 %vm2059_vm0, %v8998_v9  ;;  %v4926_v26 = vmax.f32 %v2930_v16, 0.0  ;;  %v5182_v29 = vmax.f32 %v3954_v17, 0.0 }
 0x13d   : > { %v2942_v30 = vpop.f32.mrf.mxu0  ;;  %v3966_v31 = vpop.f32.mrf.mxu1 }
 0x13e   : > { %v2943_v34 = vadd.f32 %v9749_v41, %v2942_v30  ;;  %v3967_v35 = vadd.f32 %v9749_v41, %v3966_v31  ;;  %v9875_v36 = vmax.f32 %v4926_v26, %v4928_v24  ;;  %v9877_v37 = vmax.f32 %v5182_v29, %v5184_v25  ;;  %v9004_v24 = vld [vmem:[%s9392_s9 + $0x5f8] sm:$0xff]   ;;  %v9005_v31 = vld [vmem:[%s9392_s9 + $0x200] sm:$0xff]  }
 0x13f   : > { %v8290_v38 = vpop.f32.mrf.mxu0  ;;  %v8546_v42 = vpop.f32.mrf.mxu1  ;;  %v4931_v45 = vmax.f32 %v2951_v20, 0.0  ;;  %v5187_v46 = vmax.f32 %v3975_v21, 0.0  ;;  %v9003_v21 = vld [vmem:[%s9392_s9 + $0x1f8] sm:$0xff]  }
 0x140   : > { %v4929_v47 = vmax.f32 %v2943_v34, 0.0  ;;  %v5185_v48 = vmax.f32 %v3967_v35, 0.0  ;;  %v2954_v51 = vadd.f32 %v8290_v38, %v9749_v41  ;;  %v3978_v52 = vadd.f32 %v8546_v42, %v9749_v41  ;;  %v9006_v34 = vld [vmem:[%s9392_s9 + $0x600] sm:$0xff]  }
 0x141   : > { %v2945_v53 = vpop.f32.mrf.mxu0  ;;  %v3969_v54 = vpop.f32.mrf.mxu1 }
 0x142   : > { %v9885_v57 = vmax.f32 %v4929_v47, %v4931_v45  ;;  %v9887_v60 = vmax.f32 %v5185_v48, %v5187_v46  ;;  %v2946_v61 = vadd.f32 %v9749_v41, %v2945_v53  ;;  %v3970_v62 = vadd.f32 %v9749_v41, %v3969_v54 }
 0x143   : > { %v8293_v63 = vpop.f32.mrf.mxu0  ;;  %8388 = vmatmul.mubr.msk.bf16.gmra.mxu0 %vm2059_vm0, %v8999_v43  ;;  %v8549_v2 = vpop.f32.mrf.mxu1  ;;  %8644 = vmatmul.mubr.msk.bf16.gmra.mxu1 %vm2059_vm0, %v9000_v44  ;;  %v4932_v7 = vmax.f32 %v2954_v51, 0.0  ;;  %v5188_v8 = vmax.f32 %v3978_v52, 0.0 }
 0x144   : > { %v2967_v5 = vadd.f32 %v8293_v63, %v9749_v41  ;;  %v3991_v6 = vadd.f32 %v8549_v2, %v9749_v41  ;;  %8391 = vmatprep.mubr.msk.bf16.mxu0 %vm2059_vm0, %v9001_v49  ;;  %8647 = vmatprep.mubr.msk.bf16.mxu1 %vm2059_vm0, %v9002_v50  ;;  %v4930_v9 = vmax.f32 %v2946_v61, 0.0  ;;  %v5186_v10 = vmax.f32 %v3970_v62, 0.0 }
 0x145   : > { %v2958_v11 = vpop.f32.mrf.mxu0  ;;  %v3982_v12 = vpop.f32.mrf.mxu1 }
 0x146   : > { %v2959_v13 = vadd.f32 %v9749_v41, %v2958_v11  ;;  %v3983_v16 = vadd.f32 %v9749_v41, %v3982_v12  ;;  %v9899_v17 = vmax.f32 %v4930_v9, %v4932_v7  ;;  %v9901_v18 = vmax.f32 %v5186_v10, %v5188_v8  ;;  %v9007_v11 = vld [vmem:[%s9392_s9 + $0x208] sm:$0xff]  }
 0x147   : > { %v8294_v19 = vpop.f32.mrf.mxu0  ;;  %v8550_v20 = vpop.f32.mrf.mxu1  ;;  %v4935_v25 = vmax.f32 %v2967_v5, 0.0  ;;  %v5191_v26 = vmax.f32 %v3991_v6, 0.0  ;;  %v9008_v12 = vld [vmem:[%s9392_s9 + $0x608] sm:$0xff]  }
 0x148   : > { %v4933_v29 = vmax.f32 %v2959_v13, 0.0  ;;  %v5189_v30 = vmax.f32 %v3983_v16, 0.0  ;;  %v2970_v35 = vadd.f32 %v8294_v19, %v9749_v41  ;;  %v3994_v38 = vadd.f32 %v8550_v20, %v9749_v41 }
 0x149   : > { %v2961_v42 = vpop.f32.mrf.mxu0  ;;  %v3985_v43 = vpop.f32.mrf.mxu1 }
 0x14a   : > { %v9909_v44 = vmax.f32 %v4933_v29, %v4935_v25  ;;  %v9911_v45 = vmax.f32 %v5189_v30, %v5191_v26  ;;  %v2962_v46 = vadd.f32 %v9749_v41, %v2961_v42  ;;  %v3986_v47 = vadd.f32 %v9749_v41, %v3985_v43 }
 0x14b   : > { %v8297_v48 = vpop.f32.mrf.mxu0  ;;  %8392 = vmatmul.mubr.msk.bf16.gmra.mxu0 %vm2059_vm0, %v9003_v21  ;;  %v8553_v49 = vpop.f32.mrf.mxu1  ;;  %8648 = vmatmul.mubr.msk.bf16.gmra.mxu1 %vm2059_vm0, %v9004_v24  ;;  %v4936_v52 = vmax.f32 %v2970_v35, 0.0  ;;  %v5192_v53 = vmax.f32 %v3994_v38, 0.0  ;;  %v9009_v21 = vld [vmem:[%s9392_s9 + $0x210] sm:$0xff]  }
 0x14c   : > { %v2983_v50 = vadd.f32 %v8297_v48, %v9749_v41  ;;  %v4007_v51 = vadd.f32 %v8553_v49, %v9749_v41  ;;  %8395 = vmatprep.mubr.msk.bf16.mxu0 %vm2059_vm0, %v9005_v31  ;;  %8651 = vmatprep.mubr.msk.bf16.mxu1 %vm2059_vm0, %v9006_v34  ;;  %v4934_v54 = vmax.f32 %v2962_v46, 0.0  ;;  %v5190_v61 = vmax.f32 %v3986_v47, 0.0  ;;  %v9010_v24 = vld [vmem:[%s9392_s9 + $0x610] sm:$0xff]  }
 0x14d   : > { %v2974_v62 = vpop.f32.mrf.mxu0  ;;  %v3998_v63 = vpop.f32.mrf.mxu1 }
 0x14e   : > { %v2975_v2 = vadd.f32 %v9749_v41, %v2974_v62  ;;  %v3999_v5 = vadd.f32 %v9749_v41, %v3998_v63  ;;  %v9923_v6 = vmax.f32 %v4934_v54, %v4936_v52  ;;  %v9925_v7 = vmax.f32 %v5190_v61, %v5192_v53 }
 0x14f   : > { %v4939_v8 = vmax.f32 %v2983_v50, 0.0  ;;  %v8298_v9 = vpop.f32.mrf.mxu0  ;;  %v8554_v10 = vpop.f32.mrf.mxu1  ;;  %v5195_v13 = vmax.f32 %v4007_v51, 0.0 }
 0x150   : > { %v4937_v16 = vmax.f32 %v2975_v2, 0.0  ;;  %v5193_v19 = vmax.f32 %v3999_v5, 0.0  ;;  %v2986_v20 = vadd.f32 %v8298_v9, %v9749_v41  ;;  %v4010_v25 = vadd.f32 %v8554_v10, %v9749_v41  ;;  %v9011_v5 = vld [vmem:[%s9392_s9 + $0x218] sm:$0xff]  }
 0x151   : > { %v2977_v26 = vpop.f32.mrf.mxu0  ;;  %v4001_v29 = vpop.f32.mrf.mxu1 }
 0x152   : > { %v9933_v30 = vmax.f32 %v4937_v16, %v4939_v8  ;;  %v9935_v31 = vmax.f32 %v5193_v19, %v5195_v13  ;;  %v2978_v34 = vadd.f32 %v9749_v41, %v2977_v26  ;;  %v4002_v35 = vadd.f32 %v9749_v41, %v4001_v29  ;;  %v9012_v8 = vld [vmem:[%s9392_s9 + $0x618] sm:$0xff]  }
 0x153   : > { %v8301_v38 = vpop.f32.mrf.mxu0  ;;  %8396 = vmatmul.mubr.msk.bf16.gmra.mxu0 %vm2059_vm0, %v9007_v11  ;;  %v8557_v42 = vpop.f32.mrf.mxu1  ;;  %8652 = vmatmul.mubr.msk.bf16.gmra.mxu1 %vm2059_vm0, %v9008_v12  ;;  %v4940_v43 = vmax.f32 %v2986_v20, 0.0  ;;  %v5196_v47 = vmax.f32 %v4010_v25, 0.0  ;;  %v9013_v12 = vld [vmem:[%s9392_s9 + $0x220] sm:$0xff]  }
 0x154   : > { %v2999_v46 = vadd.f32 %v8301_v38, %v9749_v41  ;;  %8399 = vmatprep.mubr.msk.bf16.mxu0 %vm2059_vm0, %v9009_v21  ;;  %8655 = vmatprep.mubr.msk.bf16.mxu1 %vm2059_vm0, %v9010_v24  ;;  %v4938_v48 = vmax.f32 %v2978_v34, 0.0  ;;  %v5194_v49 = vmax.f32 %v4002_v35, 0.0  ;;  %v4023_v50 = vadd.f32 %v8557_v42, %v9749_v41  ;;  %v9014_v24 = vld [vmem:[%s9392_s9 + $0x620] sm:$0xff]  }
 0x155   : > { %v2990_v51 = vpop.f32.mrf.mxu0  ;;  %v4014_v52 = vpop.f32.mrf.mxu1 }
 0x156   : > { %v2991_v53 = vadd.f32 %v9749_v41, %v2990_v51  ;;  %v4015_v54 = vadd.f32 %v9749_v41, %v4014_v52  ;;  %v9947_v61 = vmax.f32 %v4938_v48, %v4940_v43  ;;  %v9949_v62 = vmax.f32 %v5194_v49, %v5196_v47 }
 0x157   : > { %v8302_v63 = vpop.f32.mrf.mxu0  ;;  %v8558_v2 = vpop.f32.mrf.mxu1  ;;  %v4943_v9 = vmax.f32 %v2999_v46, 0.0  ;;  %v5199_v13 = vmax.f32 %v4023_v50, 0.0 }
 0x158   : > { %v4941_v10 = vmax.f32 %v2991_v53, 0.0  ;;  %v5197_v11 = vmax.f32 %v4015_v54, 0.0  ;;  %v3002_v16 = vadd.f32 %v8302_v63, %v9749_v41  ;;  %v4026_v19 = vadd.f32 %v8558_v2, %v9749_v41 }
 0x159   : > { %v2993_v20 = vpop.f32.mrf.mxu0  ;;  %v4017_v21 = vpop.f32.mrf.mxu1 }
 0x15a   : > { %v5437_v25 = vmax.f32 %v4941_v10, %v4943_v9  ;;  %v5565_v26 = vmax.f32 %v5197_v11, %v5199_v13  ;;  %v2994_v29 = vadd.f32 %v9749_v41, %v2993_v20  ;;  %v4018_v34 = vadd.f32 %v9749_v41, %v4017_v21  ;;  %v9015_v10 = vld [vmem:[%s9392_s9 + $0x228] sm:$0xff]  }
 0x15b   : > { %v8305_v35 = vpop.f32.mrf.mxu0  ;;  %8400 = vmatmul.mubr.msk.bf16.gmra.mxu0 %vm2059_vm0, %v9011_v5  ;;  %v8561_v38 = vpop.f32.mrf.mxu1  ;;  %8656 = vmatmul.mubr.msk.bf16.gmra.mxu1 %vm2059_vm0, %v9012_v8  ;;  %v4944_v46 = vmax.f32 %v3002_v16, 0.0  ;;  %v5200_v47 = vmax.f32 %v4026_v19, 0.0  ;;  %v9016_v19 = vld [vmem:[%s9392_s9 + $0x628] sm:$0xff]  }
 0x15c   : > { %v3015_v42 = vadd.f32 %v8305_v35, %v9749_v41  ;;  %v4039_v43 = vadd.f32 %v8561_v38, %v9749_v41  ;;  %8403 = vmatprep.mubr.msk.bf16.mxu0 %vm2059_vm0, %v9013_v12  ;;  %v4942_v48 = vmax.f32 %v2994_v29, 0.0  ;;  %v5198_v49 = vmax.f32 %v4018_v34, 0.0  ;;  %8659 = vmatprep.mubr.msk.bf16.mxu1 %vm2059_vm0, %v9014_v24  ;;  %v9018_v29 = vld [vmem:[%s9392_s9 + $0x630] sm:$0xff]  }
 0x15d   : > { %v3006_v50 = vpop.f32.mrf.mxu0  ;;  %v4030_v51 = vpop.f32.mrf.mxu1  ;;  %v5677_v54 = vmax.f32 %v9765_v0, %v5437_v25  ;;  %v5741_v63 = vmax.f32 %v9767_v1, %v5565_v26  ;;  %v9017_v26 = vld [vmem:[%s9392_s9 + $0x230] sm:$0xff]  }
 0x15e   : > { %v3007_v52 = vadd.f32 %v9749_v41, %v3006_v50  ;;  %v4031_v53 = vadd.f32 %v9749_v41, %v4030_v51  ;;  %v5438_v2 = vmax.f32 %v4942_v48, %v4944_v46  ;;  %v5566_v5 = vmax.f32 %v5198_v49, %v5200_v47 }
 0x15f   : > { %v8306_v8 = vpop.f32.mrf.mxu0  ;;  %v8562_v9 = vpop.f32.mrf.mxu1  ;;  %v4947_v11 = vmax.f32 %v3015_v42, 0.0  ;;  %v5203_v12 = vmax.f32 %v4039_v43, 0.0 }
 0x160   : > { %v4945_v13 = vmax.f32 %v3007_v52, 0.0  ;;  %v5201_v16 = vmax.f32 %v4031_v53, 0.0  ;;  %v5678_v20 = vmax.f32 %v9783_v22, %v5438_v2  ;;  %v5742_v21 = vmax.f32 %v9785_v23, %v5566_v5 }
 0x161   : > { %v3018_v0 = vadd.f32 %v8306_v8, %v9749_v41  ;;  %v4042_v1 = vadd.f32 %v8562_v9, %v9749_v41  ;;  %v3009_v24 = vpop.f32.mrf.mxu0  ;;  %v4033_v25 = vpop.f32.mrf.mxu1 }
 0x162   : > { %v5439_v34 = vmax.f32 %v4945_v13, %v4947_v11  ;;  %v5567_v35 = vmax.f32 %v5201_v16, %v5203_v12  ;;  %v7624_v38 = vpack.c.bf16 %v5678_v20, %v5677_v54  ;;  %v7784_v42 = vpack.c.bf16 %v5742_v21, %v5741_v63  ;;  %v9019_v13 = vld [vmem:[%s9392_s9 + $0x238] sm:$0xff]  }
 0x163   : > { %v3010_v43 = vadd.f32 %v9749_v41, %v3009_v24  ;;  %v4034_v22 = vadd.f32 %v9749_v41, %v4033_v25  ;;  %v8309_v46 = vpop.f32.mrf.mxu0  ;;  %8404 = vmatmul.mubr.msk.bf16.gmra.mxu0 %vm2059_vm0, %v9015_v10  ;;  %v8565_v23 = vpop.f32.mrf.mxu1  ;;  %8660 = vmatmul.mubr.msk.bf16.gmra.mxu1 %vm2059_vm0, %v9016_v19  ;;  %v4948_v49 = vmax.f32 %v3018_v0, 0.0  ;;  %v5204_v50 = vmax.f32 %v4042_v1, 0.0  ;;  %v9020_v0 = vld [vmem:[%s9392_s9 + $0x638] sm:$0xff]  }
 0x164   : > { %v3031_v47 = vadd.f32 %v8309_v46, %v9749_v41  ;;  %v4055_v48 = vadd.f32 %v8565_v23, %v9749_v41  ;;  %7941 = vst [vmem:[%s9403_s26 + $0x58] sm:$0xff] %v7624_v38   ;;  %7973 = vst [vmem:[%s9403_s26 + $0x198] sm:$0xff] %v7784_v42   ;;  %8407 = vmatprep.mubr.msk.bf16.mxu0 %vm2059_vm0, %v9017_v26  ;;  %8663 = vmatprep.mubr.msk.bf16.mxu1 %vm2059_vm0, %v9018_v29  ;;  %v9021_v29 = vld [vmem:[%s9392_s9 + $0x240] sm:$0xff]  }
 0x165   : > { %v4946_v51 = vmax.f32 %v3010_v43, 0.0  ;;  %v5202_v52 = vmax.f32 %v4034_v22, 0.0  ;;  %v3022_v53 = vpop.f32.mrf.mxu0  ;;  %v4046_v54 = vpop.f32.mrf.mxu1  ;;  %v5679_v5 = vmax.f32 %v9789_v32, %v5439_v34  ;;  %v5743_v8 = vmax.f32 %v9791_v33, %v5567_v35  ;;  %v9022_v34 = vld [vmem:[%s9392_s9 + $0x640] sm:$0xff]  }
 0x166   : > { %v3023_v63 = vadd.f32 %v9749_v41, %v3022_v53  ;;  %v4047_v2 = vadd.f32 %v9749_v41, %v4046_v54  ;;  %v4951_v16 = vmax.f32 %v3031_v47, 0.0  ;;  %v5207_v19 = vmax.f32 %v4055_v48, 0.0 }
 0x167   : > { %v5440_v9 = vmax.f32 %v4946_v51, %v4948_v49  ;;  %v5568_v10 = vmax.f32 %v5202_v52, %v5204_v50  ;;  %v8310_v11 = vpop.f32.mrf.mxu0  ;;  %v8566_v12 = vpop.f32.mrf.mxu1 }
 0x168   : > { %v4949_v20 = vmax.f32 %v3023_v63, 0.0  ;;  %v5205_v21 = vmax.f32 %v4047_v2, 0.0  ;;  %v3034_v32 = vadd.f32 %v8310_v11, %v9749_v41  ;;  %v4058_v33 = vadd.f32 %v8566_v12, %v9749_v41  ;;  %v9023_v12 = vld [vmem:[%s9392_s9 + $0x248] sm:$0xff]  }
 0x169   : > { %v5680_v1 = vmax.f32 %v9807_v55, %v5440_v9  ;;  %v5744_v24 = vmax.f32 %v9809_v56, %v5568_v10  ;;  %v3025_v25 = vpop.f32.mrf.mxu0  ;;  %v4049_v26 = vpop.f32.mrf.mxu1 }
 0x16a   : > { %v5441_v35 = vmax.f32 %v4949_v20, %v4951_v16  ;;  %v5569_v38 = vmax.f32 %v5205_v21, %v5207_v19  ;;  %v3026_v22 = vadd.f32 %v9749_v41, %v3025_v25  ;;  %v4050_v55 = vadd.f32 %v9749_v41, %v4049_v26  ;;  %v9024_v21 = vld [vmem:[%s9392_s9 + $0x648] sm:$0xff]   ;;  %v9026_v25 = vld [vmem:[%s9392_s9 + $0x650] sm:$0xff]  }
 0x16b   : > { %v7629_v42 = vpack.c.bf16 %v5680_v1, %v5679_v5  ;;  %v7789_v43 = vpack.c.bf16 %v5744_v24, %v5743_v8  ;;  %v8313_v46 = vpop.f32.mrf.mxu0  ;;  %8408 = vmatmul.mubr.msk.bf16.gmra.mxu0 %vm2059_vm0, %v9019_v13  ;;  %v8569_v56 = vpop.f32.mrf.mxu1  ;;  %8664 = vmatmul.mubr.msk.bf16.gmra.mxu1 %vm2059_vm0, %v9020_v0  ;;  %v4952_v48 = vmax.f32 %v3034_v32, 0.0  ;;  %v5208_v49 = vmax.f32 %v4058_v33, 0.0  ;;  %v10017_v1 = vld [vmem:[#allocation7] ss:$0 sm:$0xff] }
 0x16c   : > { %v3047_v23 = vadd.f32 %v8313_v46, %v9749_v41  ;;  %v4071_v47 = vadd.f32 %v8569_v56, %v9749_v41  ;;  %v4950_v50 = vmax.f32 %v3026_v22, 0.0  ;;  %v5206_v51 = vmax.f32 %v4050_v55, 0.0  ;;  %8411 = vmatprep.mubr.msk.bf16.mxu0 %vm2059_vm0, %v9021_v29  ;;  %8667 = vmatprep.mubr.msk.bf16.mxu1 %vm2059_vm0, %v9022_v34  ;;  %v9025_v33 = vld [vmem:[%s9392_s9 + $0x250] sm:$0xff]  }
 0x16d   : > { %7942 = vst [vmem:[%s9403_s26 + $0x60] sm:$0xff] %v7629_v42   ;;  %7974 = vst [vmem:[%s9403_s26 + $0x1a0] sm:$0xff] %v7789_v43   ;;  %v3038_v52 = vpop.f32.mrf.mxu0  ;;  %v4062_v53 = vpop.f32.mrf.mxu1  ;;  %v5681_v2 = vmax.f32 %v9813_v3, %v5441_v35  ;;  %v5745_v5 = vmax.f32 %v9815_v4, %v5569_v38 }
 0x16e   : > { %v3039_v54 = vadd.f32 %v9749_v41, %v3038_v52  ;;  %v4063_v63 = vadd.f32 %v9749_v41, %v4062_v53  ;;  %v5442_v8 = vmax.f32 %v4950_v50, %v4952_v48  ;;  %v5570_v9 = vmax.f32 %v5206_v51, %v5208_v49 }
 0x16f   : > { %v8314_v10 = vpop.f32.mrf.mxu0  ;;  %v8570_v11 = vpop.f32.mrf.mxu1  ;;  %v4955_v13 = vmax.f32 %v3047_v23, 0.0  ;;  %v5211_v16 = vmax.f32 %v4071_v47, 0.0 }
 0x170   : > { %v4953_v19 = vmax.f32 %v3039_v54, 0.0  ;;  %v5209_v20 = vmax.f32 %v4063_v63, 0.0  ;;  %v5682_v0 = vmax.f32 %v9831_v27, %v5442_v8  ;;  %v5746_v41 = vmax.f32 %v9833_v28, %v5570_v9 }
 0x171   : > { %v3050_v3 = vadd.f32 %v10017_v1, %v8314_v10  ;;  %v4074_v4 = vadd.f32 %v10017_v1, %v8570_v11  ;;  %v3041_v24 = vpop.f32.mrf.mxu0  ;;  %v4065_v32 = vpop.f32.mrf.mxu1 }
 0x172   : > { %v5443_v26 = vmax.f32 %v4953_v19, %v4955_v13  ;;  %v5571_v29 = vmax.f32 %v5209_v20, %v5211_v16  ;;  %v7634_v34 = vpack.c.bf16 %v5682_v0, %v5681_v2  ;;  %v7794_v35 = vpack.c.bf16 %v5746_v41, %v5745_v5  ;;  %v9027_v5 = vld [vmem:[%s9392_s9 + $0x258] sm:$0xff]   ;;  %v9030_v0 = vld [vmem:[%s9392_s9 + $0x660] sm:$0xff]  }
 0x173   : > { %v3042_v27 = vadd.f32 %v10017_v1, %v3041_v24  ;;  %v4066_v28 = vadd.f32 %v10017_v1, %v4065_v32  ;;  %v8317_v38 = vpop.f32.mrf.mxu0  ;;  %8412 = vmatmul.mubr.msk.bf16.gmra.mxu0 %vm2059_vm0, %v9023_v12  ;;  %v8573_v42 = vpop.f32.mrf.mxu1  ;;  %8668 = vmatmul.mubr.msk.bf16.gmra.mxu1 %vm2059_vm0, %v9024_v21  ;;  %v4956_v55 = vmax.f32 %v3050_v3, 0.0  ;;  %v5212_v46 = vmax.f32 %v4074_v4, 0.0  ;;  %v9028_v12 = vld [vmem:[%s9392_s9 + $0x658] sm:$0xff]   ;;  %v9029_v21 = vld [vmem:[%s9392_s9 + $0x260] sm:$0xff]  }
 0x174   : > { %v3063_v43 = vadd.f32 %v10017_v1, %v8317_v38  ;;  %v4087_v22 = vadd.f32 %v10017_v1, %v8573_v42  ;;  %7943 = vst [vmem:[%s9403_s26 + $0x68] sm:$0xff] %v7634_v34   ;;  %7975 = vst [vmem:[%s9403_s26 + $0x1a8] sm:$0xff] %v7794_v35   ;;  %8415 = vmatprep.mubr.msk.bf16.mxu0 %vm2059_vm0, %v9025_v33  ;;  %8671 = vmatprep.mubr.msk.bf16.mxu1 %vm2059_vm0, %v9026_v25 }
 0x175   : > { %v4954_v56 = vmax.f32 %v3042_v27, 0.0  ;;  %v5210_v23 = vmax.f32 %v4066_v28, 0.0  ;;  %v3054_v47 = vpop.f32.mrf.mxu0  ;;  %v4078_v48 = vpop.f32.mrf.mxu1  ;;  %v5683_v51 = vmax.f32 %v9837_v39, %v5443_v26  ;;  %v5747_v52 = vmax.f32 %v9839_v40, %v5571_v29 }
 0x176   : > { %v3055_v49 = vadd.f32 %v10017_v1, %v3054_v47  ;;  %v4079_v50 = vadd.f32 %v10017_v1, %v4078_v48  ;;  %v4959_v8 = vmax.f32 %v3063_v43, 0.0  ;;  %v5215_v9 = vmax.f32 %v4087_v22, 0.0  ;;  %v9031_v48 = vld [vmem:[%s9392_s9 + $0x268] sm:$0xff]  }
 0x177   : > { %v5444_v53 = vmax.f32 %v4954_v56, %v4956_v55  ;;  %v5572_v54 = vmax.f32 %v5210_v23, %v5212_v46  ;;  %v8318_v63 = vpop.f32.mrf.mxu0  ;;  %v8574_v2 = vpop.f32.mrf.mxu1 }
 0x178   : > { %v4957_v10 = vmax.f32 %v3055_v49, 0.0  ;;  %v5213_v11 = vmax.f32 %v4079_v50, 0.0  ;;  %v3066_v39 = vadd.f32 %v10017_v1, %v8318_v63  ;;  %v4090_v40 = vadd.f32 %v10017_v1, %v8574_v2 }
 0x179   : > { %v5684_v13 = vmax.f32 %v9851_v58, %v5444_v53  ;;  %v5748_v16 = vmax.f32 %v9853_v59, %v5572_v54  ;;  %v3057_v19 = vpop.f32.mrf.mxu0  ;;  %v4081_v20 = vpop.f32.mrf.mxu1  ;;  %v9032_v53 = vld [vmem:[%s9392_s9 + $0x668] sm:$0xff]  }
 0x17a   : > { %v5445_v41 = vmax.f32 %v4957_v10, %v4959_v8  ;;  %v5573_v3 = vmax.f32 %v5213_v11, %v5215_v9  ;;  %v3058_v32 = vadd.f32 %v10017_v1, %v3057_v19  ;;  %v4082_v58 = vadd.f32 %v10017_v1, %v4081_v20  ;;  %v9033_v8 = vld [vmem:[%s9392_s9 + $0x270] sm:$0xff]  }
 0x17b   : > { %v7639_v4 = vpack.c.bf16 %v5684_v13, %v5683_v51  ;;  %v7799_v24 = vpack.c.bf16 %v5748_v16, %v5747_v52  ;;  %v8321_v33 = vpop.f32.mrf.mxu0  ;;  %8416 = vmatmul.mubr.msk.bf16.gmra.mxu0 %vm2059_vm0, %v9027_v5  ;;  %v8577_v59 = vpop.f32.mrf.mxu1  ;;  %8672 = vmatmul.mubr.msk.bf16.gmra.mxu1 %vm2059_vm0, %v9028_v12  ;;  %v4960_v29 = vmax.f32 %v3066_v39, 0.0  ;;  %v5216_v34 = vmax.f32 %v4090_v40, 0.0  ;;  %v9034_v9 = vld [vmem:[%s9392_s9 + $0x670] sm:$0xff]  }
 0x17c   : > { %v3079_v25 = vadd.f32 %v10017_v1, %v8321_v33  ;;  %v4103_v26 = vadd.f32 %v10017_v1, %v8577_v59  ;;  %v4958_v35 = vmax.f32 %v3058_v32, 0.0  ;;  %v5214_v27 = vmax.f32 %v4082_v58, 0.0  ;;  %8419 = vmatprep.mubr.msk.bf16.mxu0 %vm2059_vm0, %v9029_v21  ;;  %8675 = vmatprep.mubr.msk.bf16.mxu1 %vm2059_vm0, %v9030_v0 }
 0x17d   : > { %7944 = vst [vmem:[%s9403_s26 + $0x70] sm:$0xff] %v7639_v4   ;;  %7976 = vst [vmem:[%s9403_s26 + $0x1b0] sm:$0xff] %v7799_v24   ;;  %v3070_v28 = vpop.f32.mrf.mxu0  ;;  %v4094_v38 = vpop.f32.mrf.mxu1  ;;  %v5685_v22 = vmax.f32 %v9861_v14, %v5445_v41  ;;  %v5749_v55 = vmax.f32 %v9863_v15, %v5573_v3 }
 0x17e   : > { %v3071_v42 = vadd.f32 %v10017_v1, %v3070_v28  ;;  %v4095_v43 = vadd.f32 %v10017_v1, %v4094_v38  ;;  %v5446_v46 = vmax.f32 %v4958_v35, %v4960_v29  ;;  %v5574_v56 = vmax.f32 %v5214_v27, %v5216_v34  ;;  %v9035_v34 = vld [vmem:[%s9392_s9 + $0x278] sm:$0xff]  }
 0x17f   : > { %v8322_v23 = vpop.f32.mrf.mxu0  ;;  %v8578_v47 = vpop.f32.mrf.mxu1  ;;  %v4963_v49 = vmax.f32 %v3079_v25, 0.0  ;;  %v5219_v50 = vmax.f32 %v4103_v26, 0.0 }
 0x180   : > { %v4961_v51 = vmax.f32 %v3071_v42, 0.0  ;;  %v5217_v52 = vmax.f32 %v4095_v43, 0.0  ;;  %v5686_v54 = vmax.f32 %v9875_v36, %v5446_v46  ;;  %v5750_v63 = vmax.f32 %v9877_v37, %v5574_v56  ;;  %v9036_v42 = vld [vmem:[%s9392_s9 + $0x678] sm:$0xff]   ;;  %v9037_v56 = vld [vmem:[%s9392_s9 + $0x280] sm:$0xff]  }
 0x181   : > { %v3082_v14 = vadd.f32 %v10017_v1, %v8322_v23  ;;  %v4106_v15 = vadd.f32 %v10017_v1, %v8578_v47  ;;  %v3073_v2 = vpop.f32.mrf.mxu0  ;;  %v4097_v5 = vpop.f32.mrf.mxu1  ;;  %v9038_v23 = vld [vmem:[%s9392_s9 + $0x680] sm:$0xff]  }
 0x182   : > { %v5447_v10 = vmax.f32 %v4961_v51, %v4963_v49  ;;  %v5575_v11 = vmax.f32 %v5217_v52, %v5219_v50  ;;  %v7644_v12 = vpack.c.bf16 %v5686_v54, %v5685_v22  ;;  %v7804_v13 = vpack.c.bf16 %v5750_v63, %v5749_v55 }
 0x183   : > { %v3074_v16 = vadd.f32 %v10017_v1, %v3073_v2  ;;  %v4098_v36 = vadd.f32 %v10017_v1, %v4097_v5  ;;  %v8325_v39 = vpop.f32.mrf.mxu0  ;;  %8420 = vmatmul.mubr.msk.bf16.gmra.mxu0 %vm2059_vm0, %v9031_v48  ;;  %v8581_v37 = vpop.f32.mrf.mxu1  ;;  %8676 = vmatmul.mubr.msk.bf16.gmra.mxu1 %vm2059_vm0, %v9032_v53  ;;  %v4964_v20 = vmax.f32 %v3082_v14, 0.0  ;;  %v5220_v21 = vmax.f32 %v4106_v15, 0.0 }
 0x184   : > { %v3095_v40 = vadd.f32 %v10017_v1, %v8325_v39  ;;  %v4119_v19 = vadd.f32 %v10017_v1, %v8581_v37  ;;  %7945 = vst [vmem:[%s9403_s26 + $0x78] sm:$0xff] %v7644_v12   ;;  %7977 = vst [vmem:[%s9403_s26 + $0x1b8] sm:$0xff] %v7804_v13   ;;  %8423 = vmatprep.mubr.msk.bf16.mxu0 %vm2059_vm0, %v9033_v8  ;;  %8679 = vmatprep.mubr.msk.bf16.mxu1 %vm2059_vm0, %v9034_v9  ;;  %v9039_v37 = vld [vmem:[%s9392_s9 + $0x288] sm:$0xff]  }
 0x185   : > { %v4962_v0 = vmax.f32 %v3074_v16, 0.0  ;;  %v5218_v41 = vmax.f32 %v4098_v36, 0.0  ;;  %v3086_v3 = vpop.f32.mrf.mxu0  ;;  %v4110_v4 = vpop.f32.mrf.mxu1  ;;  %v5687_v58 = vmax.f32 %v9885_v57, %v5447_v10  ;;  %v5751_v33 = vmax.f32 %v9887_v60, %v5575_v11 }
 0x186   : > { %v3087_v24 = vadd.f32 %v10017_v1, %v3086_v3  ;;  %v4111_v32 = vadd.f32 %v10017_v1, %v4110_v4  ;;  %v4967_v35 = vmax.f32 %v3095_v40, 0.0  ;;  %v5223_v27 = vmax.f32 %v4119_v19, 0.0 }
 0x187   : > { %v5448_v59 = vmax.f32 %v4962_v0, %v4964_v20  ;;  %v5576_v25 = vmax.f32 %v5218_v41, %v5220_v21  ;;  %v8326_v26 = vpop.f32.mrf.mxu0  ;;  %v8582_v29 = vpop.f32.mrf.mxu1  ;;  %v9040_v0 = vld [vmem:[%s9392_s9 + $0x688] sm:$0xff]  }
 0x188   : > { %v4965_v28 = vmax.f32 %v3087_v24, 0.0  ;;  %v5221_v38 = vmax.f32 %v4111_v32, 0.0  ;;  %v3098_v57 = vadd.f32 %v10017_v1, %v8326_v26  ;;  %v4122_v60 = vadd.f32 %v10017_v1, %v8582_v29  ;;  %v9041_v32 = vld [vmem:[%s9392_s9 + $0x290] sm:$0xff]  }
 0x189   : > { %v5688_v43 = vmax.f32 %v9899_v17, %v5448_v59  ;;  %v5752_v22 = vmax.f32 %v9901_v18, %v5576_v25  ;;  %v3089_v55 = vpop.f32.mrf.mxu0  ;;  %v4113_v46 = vpop.f32.mrf.mxu1 }
 0x18a   : > { %v5449_v47 = vmax.f32 %v4965_v28, %v4967_v35  ;;  %v5577_v48 = vmax.f32 %v5221_v38, %v5223_v27  ;;  %v3090_v51 = vadd.f32 %v10017_v1, %v3089_v55  ;;  %v4114_v17 = vadd.f32 %v10017_v1, %v4113_v46 }
 0x18b   : > { %v7649_v49 = vpack.c.bf16 %v5688_v43, %v5687_v58  ;;  %v7809_v50 = vpack.c.bf16 %v5752_v22, %v5751_v33  ;;  %v8329_v52 = vpop.f32.mrf.mxu0  ;;  %8424 = vmatmul.mubr.msk.bf16.gmra.mxu0 %vm2059_vm0, %v9035_v34  ;;  %v8585_v18 = vpop.f32.mrf.mxu1  ;;  %8680 = vmatmul.mubr.msk.bf16.gmra.mxu1 %vm2059_vm0, %v9036_v42  ;;  %v4968_v63 = vmax.f32 %v3098_v57, 0.0  ;;  %v5224_v14 = vmax.f32 %v4122_v60, 0.0  ;;  %v9042_v58 = vld [vmem:[%s9392_s9 + $0x690] sm:$0xff]  }
 0x18c   : > { %v3111_v53 = vadd.f32 %v10017_v1, %v8329_v52  ;;  %v4135_v54 = vadd.f32 %v10017_v1, %v8585_v18  ;;  %v4966_v15 = vmax.f32 %v3090_v51, 0.0  ;;  %v5222_v2 = vmax.f32 %v4114_v17, 0.0  ;;  %8427 = vmatprep.mubr.msk.bf16.mxu0 %vm2059_vm0, %v9037_v56  ;;  %8683 = vmatprep.mubr.msk.bf16.mxu1 %vm2059_vm0, %v9038_v23 }
 0x18d   : > { %7946 = vst [vmem:[%s9403_s26 + $0x80] sm:$0xff] %v7649_v49   ;;  %7978 = vst [vmem:[%s9403_s26 + $0x1c0] sm:$0xff] %v7809_v50   ;;  %v3102_v5 = vpop.f32.mrf.mxu0  ;;  %v4126_v8 = vpop.f32.mrf.mxu1  ;;  %v5689_v11 = vmax.f32 %v9909_v44, %v5449_v47  ;;  %v5753_v12 = vmax.f32 %v9911_v45, %v5577_v48  ;;  %v9043_v50 = vld [vmem:[%s9392_s9 + $0x298] sm:$0xff]  }
 0x18e   : > { %v3103_v9 = vadd.f32 %v10017_v1, %v3102_v5  ;;  %v4127_v10 = vadd.f32 %v10017_v1, %v4126_v8  ;;  %v5450_v13 = vmax.f32 %v4966_v15, %v4968_v63  ;;  %v5578_v16 = vmax.f32 %v5222_v2, %v5224_v14  ;;  %v9046_v5 = vld [vmem:[%s9392_s9 + $0x6a0] sm:$0xff]  }
 0x18f   : > { %v8330_v36 = vpop.f32.mrf.mxu0  ;;  %v8586_v39 = vpop.f32.mrf.mxu1  ;;  %v4971_v40 = vmax.f32 %v3111_v53, 0.0  ;;  %v5227_v19 = vmax.f32 %v4135_v54, 0.0  ;;  %v9044_v53 = vld [vmem:[%s9392_s9 + $0x698] sm:$0xff]   ;;  %v9045_v54 = vld [vmem:[%s9392_s9 + $0x2a0] sm:$0xff]  }
 0x190   : > { %v4969_v20 = vmax.f32 %v3103_v9, 0.0  ;;  %v5225_v21 = vmax.f32 %v4127_v10, 0.0  ;;  %v5690_v41 = vmax.f32 %v9923_v6, %v5450_v13  ;;  %v5754_v3 = vmax.f32 %v9925_v7, %v5578_v16 }
 0x191   : > { %v3114_v44 = vadd.f32 %v10017_v1, %v8330_v36  ;;  %v4138_v45 = vadd.f32 %v10017_v1, %v8586_v39  ;;  %v3105_v4 = vpop.f32.mrf.mxu0  ;;  %v4129_v24 = vpop.f32.mrf.mxu1 }
 0x192   : > { %v5451_v33 = vmax.f32 %v4969_v20, %v4971_v40  ;;  %v5579_v59 = vmax.f32 %v5225_v21, %v5227_v19  ;;  %v7654_v25 = vpack.c.bf16 %v5690_v41, %v5689_v11  ;;  %v7814_v26 = vpack.c.bf16 %v5754_v3, %v5753_v12 }
 0x193   : > { %v3106_v29 = vadd.f32 %v10017_v1, %v3105_v4  ;;  %v4130_v6 = vadd.f32 %v10017_v1, %v4129_v24  ;;  %v8333_v34 = vpop.f32.mrf.mxu0  ;;  %8428 = vmatmul.mubr.msk.bf16.gmra.mxu0 %vm2059_vm0, %v9039_v37  ;;  %v8589_v7 = vpop.f32.mrf.mxu1  ;;  %8684 = vmatmul.mubr.msk.bf16.gmra.mxu1 %vm2059_vm0, %v9040_v0  ;;  %v4972_v28 = vmax.f32 %v3114_v44, 0.0  ;;  %v5228_v38 = vmax.f32 %v4138_v45, 0.0  ;;  %v9047_v24 = vld [vmem:[%s9392_s9 + $0x2a8] sm:$0xff]  }
 0x194   : > { %v3127_v35 = vadd.f32 %v10017_v1, %v8333_v34  ;;  %v4151_v27 = vadd.f32 %v10017_v1, %v8589_v7  ;;  %7947 = vst [vmem:[%s9403_s26 + $0x88] sm:$0xff] %v7654_v25   ;;  %7979 = vst [vmem:[%s9403_s26 + $0x1c8] sm:$0xff] %v7814_v26   ;;  %8431 = vmatprep.mubr.msk.bf16.mxu0 %vm2059_vm0, %v9041_v32  ;;  %8687 = vmatprep.mubr.msk.bf16.mxu1 %vm2059_vm0, %v9042_v58  ;;  %v9048_v25 = vld [vmem:[%s9392_s9 + $0x6a8] sm:$0xff]   ;;  %v9049_v26 = vld [vmem:[%s9392_s9 + $0x2b0] sm:$0xff]  }
 0x195   : > { %v4970_v42 = vmax.f32 %v3106_v29, 0.0  ;;  %v5226_v43 = vmax.f32 %v4130_v6, 0.0  ;;  %v3118_v22 = vpop.f32.mrf.mxu0  ;;  %v4142_v57 = vpop.f32.mrf.mxu1  ;;  %v5691_v46 = vmax.f32 %v9933_v30, %v5451_v33  ;;  %v5755_v56 = vmax.f32 %v9935_v31, %v5579_v59 }
 0x196   : > { %v3119_v60 = vadd.f32 %v10017_v1, %v3118_v22  ;;  %v4143_v55 = vadd.f32 %v10017_v1, %v4142_v57  ;;  %v4975_v51 = vmax.f32 %v3127_v35, 0.0  ;;  %v5231_v17 = vmax.f32 %v4151_v27, 0.0  ;;  %v9050_v35 = vld [vmem:[%s9392_s9 + $0x6b0] sm:$0xff]  }
 0x197   : > { %v5452_v23 = vmax.f32 %v4970_v42, %v4972_v28  ;;  %v5580_v47 = vmax.f32 %v5226_v43, %v5228_v38  ;;  %v8334_v48 = vpop.f32.mrf.mxu0  ;;  %v8590_v49 = vpop.f32.mrf.mxu1 }
 0x198   : > { %v4973_v52 = vmax.f32 %v3119_v60, 0.0  ;;  %v5229_v18 = vmax.f32 %v4143_v55, 0.0  ;;  %v3130_v30 = vadd.f32 %v10017_v1, %v8334_v48  ;;  %v4154_v31 = vadd.f32 %v10017_v1, %v8590_v49 }
 0x199   : > { %v5692_v63 = vmax.f32 %v9947_v61, %v5452_v23  ;;  %v5756_v14 = vmax.f32 %v9949_v62, %v5580_v47  ;;  %v3121_v15 = vpop.f32.mrf.mxu0  ;;  %v4145_v2 = vpop.f32.mrf.mxu1 }
 0x19a   : > { %v10133_v8 = vmax.f32 %v4973_v52, %v4975_v51  ;;  %v10135_v9 = vmax.f32 %v5229_v18, %v5231_v17  ;;  %v3122_v12 = vadd.f32 %v10017_v1, %v3121_v15  ;;  %v4146_v61 = vadd.f32 %v10017_v1, %v4145_v2  ;;  %v9053_v15 = vld [vmem:[%s9392_s9 + $0x2c0] sm:$0xff]  }
 0x19b   : > { %v7659_v10 = vpack.c.bf16 %v5692_v63, %v5691_v46  ;;  %v7819_v11 = vpack.c.bf16 %v5756_v14, %v5755_v56  ;;  %v8337_v62 = vpop.f32.mrf.mxu0  ;;  %8432 = vmatmul.mubr.msk.bf16.gmra.mxu0 %vm2059_vm0, %v9043_v50  ;;  %v8593_v13 = vpop.f32.mrf.mxu1  ;;  %8688 = vmatmul.mubr.msk.bf16.gmra.mxu1 %vm2059_vm0, %v9044_v53  ;;  %v4976_v39 = vmax.f32 %v3130_v30, 0.0  ;;  %v5232_v37 = vmax.f32 %v4154_v31, 0.0  ;;  %v9051_v53 = vld [vmem:[%s9392_s9 + $0x2b8] sm:$0xff]  }
 0x19c   : > { %v3143_v16 = vadd.f32 %v10017_v1, %v8337_v62  ;;  %v4167_v36 = vadd.f32 %v10017_v1, %v8593_v13  ;;  %8435 = vmatprep.mubr.msk.bf16.mxu0 %vm2059_vm0, %v9045_v54  ;;  %v4974_v40 = vmax.f32 %v3122_v12, 0.0  ;;  %v5230_v19 = vmax.f32 %v4146_v61, 0.0  ;;  %8691 = vmatprep.mubr.msk.bf16.mxu1 %vm2059_vm0, %v9046_v5  ;;  %v9052_v31 = vld [vmem:[%s9392_s9 + $0x6b8] sm:$0xff]   ;;  %v9054_v12 = vld [vmem:[%s9392_s9 + $0x6c0] sm:$0xff]  }
 0x19d   : > { %7948 = vst [vmem:[%s9403_s26 + $0x90] sm:$0xff] %v7659_v10   ;;  %7980 = vst [vmem:[%s9403_s26 + $0x1d0] sm:$0xff] %v7819_v11   ;;  %v3134_v20 = vpop.f32.mrf.mxu0  ;;  %v4158_v21 = vpop.f32.mrf.mxu1 }
 0x19e   : > { %v3135_v0 = vadd.f32 %v10017_v1, %v3134_v20  ;;  %v4159_v41 = vadd.f32 %v10017_v1, %v4158_v21  ;;  %v10149_v3 = vmax.f32 %v4974_v40, %v4976_v39  ;;  %v10151_v44 = vmax.f32 %v5230_v19, %v5232_v37 }
 0x19f   : > { %v8338_v45 = vpop.f32.mrf.mxu0  ;;  %v8594_v4 = vpop.f32.mrf.mxu1  ;;  %v4979_v32 = vmax.f32 %v3143_v16, 0.0  ;;  %v5235_v58 = vmax.f32 %v4167_v36, 0.0 }
 0x1a0   : > { %v4977_v33 = vmax.f32 %v3135_v0, 0.0  ;;  %v5233_v59 = vmax.f32 %v4159_v41, 0.0  ;;  %v3146_v29 = vadd.f32 %v10017_v1, %v8338_v45  ;;  %v4170_v6 = vadd.f32 %v10017_v1, %v8594_v4 }
 0x1a1   : > { %v3137_v34 = vpop.f32.mrf.mxu0  ;;  %v4161_v7 = vpop.f32.mrf.mxu1 }
 0x1a2   : > { %v10159_v27 = vmax.f32 %v4977_v33, %v4979_v32  ;;  %v10161_v28 = vmax.f32 %v5233_v59, %v5235_v58  ;;  %v3138_v38 = vadd.f32 %v10017_v1, %v3137_v34  ;;  %v4162_v42 = vadd.f32 %v10017_v1, %v4161_v7  ;;  %v9056_v7 = vld [vmem:[%s9392_s9 + $0x6c8] sm:$0xff]  }
 0x1a3   : > { %v8341_v43 = vpop.f32.mrf.mxu0  ;;  %8436 = vmatmul.mubr.msk.bf16.gmra.mxu0 %vm2059_vm0, %v9047_v24  ;;  %v8597_v22 = vpop.f32.mrf.mxu1  ;;  %8692 = vmatmul.mubr.msk.bf16.gmra.mxu1 %vm2059_vm0, %v9048_v25  ;;  %v4980_v55 = vmax.f32 %v3146_v29, 0.0  ;;  %v5236_v46 = vmax.f32 %v4170_v6, 0.0  ;;  %v9055_v25 = vld [vmem:[%s9392_s9 + $0x2c8] sm:$0xff]  }
 0x1a4   : > { %v3159_v57 = vadd.f32 %v10017_v1, %v8341_v43  ;;  %v4183_v60 = vadd.f32 %v10017_v1, %v8597_v22  ;;  %8439 = vmatprep.mubr.msk.bf16.mxu0 %vm2059_vm0, %v9049_v26  ;;  %v4978_v56 = vmax.f32 %v3138_v38, 0.0  ;;  %v5234_v23 = vmax.f32 %v4162_v42, 0.0  ;;  %8695 = vmatprep.mubr.msk.bf16.mxu1 %vm2059_vm0, %v9050_v35  ;;  %v9057_v35 = vld [vmem:[%s9392_s9 + $0x2d0] sm:$0xff]  }
 0x1a5   : > { %v3150_v47 = vpop.f32.mrf.mxu0  ;;  %v4174_v48 = vpop.f32.mrf.mxu1 }
 0x1a6   : > { %v3151_v49 = vadd.f32 %v10017_v1, %v3150_v47  ;;  %v4175_v50 = vadd.f32 %v10017_v1, %v4174_v48  ;;  %v10173_v51 = vmax.f32 %v4978_v56, %v4980_v55  ;;  %v10175_v17 = vmax.f32 %v5234_v23, %v5236_v46 }
 0x1a7   : > { %v8342_v52 = vpop.f32.mrf.mxu0  ;;  %v8598_v18 = vpop.f32.mrf.mxu1  ;;  %v4983_v54 = vmax.f32 %v3159_v57, 0.0  ;;  %v5239_v63 = vmax.f32 %v4183_v60, 0.0  ;;  %v9058_v57 = vld [vmem:[%s9392_s9 + $0x6d0] sm:$0xff]  }
 0x1a8   : > { %v4981_v14 = vmax.f32 %v3151_v49, 0.0  ;;  %v5237_v30 = vmax.f32 %v4175_v50, 0.0  ;;  %v3162_v2 = vadd.f32 %v10017_v1, %v8342_v52  ;;  %v4186_v5 = vadd.f32 %v10017_v1, %v8598_v18 }
 0x1a9   : > { %v3153_v10 = vpop.f32.mrf.mxu0  ;;  %v4177_v11 = vpop.f32.mrf.mxu1 }
 0x1aa   : > { %v10183_v61 = vmax.f32 %v4981_v14, %v4983_v54  ;;  %v10185_v62 = vmax.f32 %v5237_v30, %v5239_v63  ;;  %v3154_v13 = vadd.f32 %v10017_v1, %v3153_v10  ;;  %v4178_v16 = vadd.f32 %v10017_v1, %v4177_v11  ;;  %v9059_v10 = vld [vmem:[%s9392_s9 + $0x2d8] sm:$0xff]  }
 0x1ab   : > { %v8345_v36 = vpop.f32.mrf.mxu0  ;;  %8440 = vmatmul.mubr.msk.bf16.gmra.mxu0 %vm2059_vm0, %v9051_v53  ;;  %v8601_v39 = vpop.f32.mrf.mxu1  ;;  %8696 = vmatmul.mubr.msk.bf16.gmra.mxu1 %vm2059_vm0, %v9052_v31  ;;  %v4984_v19 = vmax.f32 %v3162_v2, 0.0  ;;  %v5240_v20 = vmax.f32 %v4186_v5, 0.0 }
 0x1ac   : > { %v3175_v37 = vadd.f32 %v10017_v1, %v8345_v36  ;;  %v4199_v40 = vadd.f32 %v10017_v1, %v8601_v39  ;;  %8443 = vmatprep.mubr.msk.bf16.mxu0 %vm2059_vm0, %v9053_v15  ;;  %v4982_v21 = vmax.f32 %v3154_v13, 0.0  ;;  %v5238_v0 = vmax.f32 %v4178_v16, 0.0  ;;  %8699 = vmatprep.mubr.msk.bf16.mxu1 %vm2059_vm0, %v9054_v12  ;;  %v9060_v36 = vld [vmem:[%s9392_s9 + $0x6d8] sm:$0xff]   ;;  %v9061_v39 = vld [vmem:[%s9392_s9 + $0x2e0] sm:$0xff]  }
 0x1ad   : > { %v3166_v41 = vpop.f32.mrf.mxu0  ;;  %v4190_v45 = vpop.f32.mrf.mxu1 }
 0x1ae   : > { %v3167_v4 = vadd.f32 %v10017_v1, %v3166_v41  ;;  %v4191_v24 = vadd.f32 %v10017_v1, %v4190_v45  ;;  %v10197_v32 = vmax.f32 %v4982_v21, %v4984_v19  ;;  %v10199_v58 = vmax.f32 %v5238_v0, %v5240_v20  ;;  %v9062_v21 = vld [vmem:[%s9392_s9 + $0x6e0] sm:$0xff]  }
 0x1af   : > { %v8346_v33 = vpop.f32.mrf.mxu0  ;;  %v8602_v59 = vpop.f32.mrf.mxu1  ;;  %v4987_v26 = vmax.f32 %v3175_v37, 0.0  ;;  %v5243_v29 = vmax.f32 %v4199_v40, 0.0 }
 0x1b0   : > { %v4985_v6 = vmax.f32 %v3167_v4, 0.0  ;;  %v5241_v34 = vmax.f32 %v4191_v24, 0.0  ;;  %v3178_v38 = vadd.f32 %v10017_v1, %v8346_v33  ;;  %v4202_v42 = vadd.f32 %v10017_v1, %v8602_v59 }
 0x1b1   : > { %v3169_v43 = vpop.f32.mrf.mxu0  ;;  %v4193_v22 = vpop.f32.mrf.mxu1 }
 0x1b2   : > { %v10207_v60 = vmax.f32 %v4985_v6, %v4987_v26  ;;  %v10209_v55 = vmax.f32 %v5241_v34, %v5243_v29  ;;  %v3170_v46 = vadd.f32 %v10017_v1, %v3169_v43  ;;  %v4194_v56 = vadd.f32 %v10017_v1, %v4193_v22 }
 0x1b3   : > { %v8349_v23 = vpop.f32.mrf.mxu0  ;;  %8444 = vmatmul.mubr.msk.bf16.gmra.mxu0 %vm2059_vm0, %v9055_v25  ;;  %v8605_v47 = vpop.f32.mrf.mxu1  ;;  %8700 = vmatmul.mubr.msk.bf16.gmra.mxu1 %vm2059_vm0, %v9056_v7  ;;  %v4988_v50 = vmax.f32 %v3178_v38, 0.0  ;;  %v5244_v52 = vmax.f32 %v4202_v42, 0.0 }
 0x1b4   : > { %v3191_v48 = vadd.f32 %v10017_v1, %v8349_v23  ;;  %v4215_v49 = vadd.f32 %v10017_v1, %v8605_v47  ;;  %8447 = vmatprep.mubr.msk.bf16.mxu0 %vm2059_vm0, %v9057_v35  ;;  %v4986_v18 = vmax.f32 %v3170_v46, 0.0  ;;  %v5242_v53 = vmax.f32 %v4194_v56, 0.0  ;;  %8703 = vmatprep.mubr.msk.bf16.mxu1 %vm2059_vm0, %v9058_v57  ;;  %v9063_v56 = vld [vmem:[%s9392_s9 + $0x2e8] sm:$0xff]  }
 0x1b5   : > { %v3182_v54 = vpop.f32.mrf.mxu0  ;;  %v4206_v63 = vpop.f32.mrf.mxu1 }
 0x1b6   : > { %v3183_v14 = vadd.f32 %v10017_v1, %v3182_v54  ;;  %v4207_v30 = vadd.f32 %v10017_v1, %v4206_v63  ;;  %v10221_v31 = vmax.f32 %v4986_v18, %v4988_v50  ;;  %v10223_v15 = vmax.f32 %v5242_v53, %v5244_v52  ;;  %v9064_v50 = vld [vmem:[%s9392_s9 + $0x6e8] sm:$0xff]   ;;  %v9065_v52 = vld [vmem:[%s9392_s9 + $0x2f0] sm:$0xff]  }
 0x1b7   : > { %v8350_v2 = vpop.f32.mrf.mxu0  ;;  %v8606_v5 = vpop.f32.mrf.mxu1  ;;  %v4991_v11 = vmax.f32 %v3191_v48, 0.0  ;;  %v5247_v12 = vmax.f32 %v4215_v49, 0.0 }
 0x1b8   : > { %v4989_v13 = vmax.f32 %v3183_v14, 0.0  ;;  %v5245_v16 = vmax.f32 %v4207_v30, 0.0  ;;  %v3194_v37 = vadd.f32 %v10017_v1, %v8350_v2  ;;  %v4218_v40 = vadd.f32 %v10017_v1, %v8606_v5  ;;  %v9066_v14 = vld [vmem:[%s9392_s9 + $0x6f0] sm:$0xff]  }
 0x1b9   : > { %v3185_v19 = vpop.f32.mrf.mxu0  ;;  %v4209_v20 = vpop.f32.mrf.mxu1 }
 0x1ba   : > { %v10231_v0 = vmax.f32 %v4989_v13, %v4991_v11  ;;  %v10233_v41 = vmax.f32 %v5245_v16, %v5247_v12  ;;  %v3186_v45 = vadd.f32 %v10017_v1, %v3185_v19  ;;  %v4210_v4 = vadd.f32 %v10017_v1, %v4209_v20 }
 0x1bb   : > { %v8353_v24 = vpop.f32.mrf.mxu0  ;;  %8448 = vmatmul.mubr.msk.bf16.gmra.mxu0 %vm2059_vm0, %v9059_v10  ;;  %v8609_v33 = vpop.f32.mrf.mxu1  ;;  %8704 = vmatmul.mubr.msk.bf16.gmra.mxu1 %vm2059_vm0, %v9060_v36  ;;  %v4992_v26 = vmax.f32 %v3194_v37, 0.0  ;;  %v5248_v29 = vmax.f32 %v4218_v40, 0.0 }
 0x1bc   : > { %v3207_v59 = vadd.f32 %v10017_v1, %v8353_v24  ;;  %v4231_v25 = vadd.f32 %v10017_v1, %v8609_v33  ;;  %8451 = vmatprep.mubr.msk.bf16.mxu0 %vm2059_vm0, %v9061_v39  ;;  %v4990_v6 = vmax.f32 %v3186_v45, 0.0  ;;  %v5246_v34 = vmax.f32 %v4210_v4, 0.0  ;;  %8707 = vmatprep.mubr.msk.bf16.mxu1 %vm2059_vm0, %v9062_v21 }
 0x1bd   : > { %v3198_v7 = vpop.f32.mrf.mxu0  ;;  %v4222_v35 = vpop.f32.mrf.mxu1 }
 0x1be   : > { %v3199_v38 = vadd.f32 %v10017_v1, %v3198_v7  ;;  %v4223_v42 = vadd.f32 %v10017_v1, %v4222_v35  ;;  %v10245_v43 = vmax.f32 %v4990_v6, %v4992_v26  ;;  %v10247_v22 = vmax.f32 %v5246_v34, %v5248_v29  ;;  %v9068_v7 = vld [vmem:[%s9392_s9 + $0x6f8] sm:$0xff]   ;;  %v9069_v35 = vld [vmem:[%s9392_s9 + $0x300] sm:$0xff]  }
 0x1bf   : > { %v8354_v57 = vpop.f32.mrf.mxu0  ;;  %v8610_v46 = vpop.f32.mrf.mxu1  ;;  %v4995_v23 = vmax.f32 %v3207_v59, 0.0  ;;  %v5251_v47 = vmax.f32 %v4231_v25, 0.0  ;;  %v9067_v25 = vld [vmem:[%s9392_s9 + $0x2f8] sm:$0xff]  }
 0x1c0   : > { %v4993_v48 = vmax.f32 %v3199_v38, 0.0  ;;  %v5249_v49 = vmax.f32 %v4223_v42, 0.0  ;;  %v3210_v18 = vadd.f32 %v10017_v1, %v8354_v57  ;;  %v4234_v53 = vadd.f32 %v10017_v1, %v8610_v46 }
 0x1c1   : > { %v3201_v54 = vpop.f32.mrf.mxu0  ;;  %v4225_v63 = vpop.f32.mrf.mxu1 }
 0x1c2   : > { %v10255_v30 = vmax.f32 %v4993_v48, %v4995_v23  ;;  %v10257_v2 = vmax.f32 %v5249_v49, %v5251_v47  ;;  %v3202_v5 = vadd.f32 %v10017_v1, %v3201_v54  ;;  %v4226_v10 = vadd.f32 %v10017_v1, %v4225_v63 }
 0x1c3   : > { %v8357_v11 = vpop.f32.mrf.mxu0  ;;  %8452 = vmatmul.mubr.msk.bf16.gmra.mxu0 %vm2059_vm0, %v9063_v56  ;;  %v8613_v12 = vpop.f32.mrf.mxu1  ;;  %8708 = vmatmul.mubr.msk.bf16.gmra.mxu1 %vm2059_vm0, %v9064_v50  ;;  %v4996_v36 = vmax.f32 %v3210_v18, 0.0  ;;  %v5252_v39 = vmax.f32 %v4234_v53, 0.0  ;;  %v9070_v56 = vld [vmem:[%s9392_s9 + $0x700] sm:$0xff]  }
 0x1c4   : > { %v3223_v13 = vadd.f32 %v10017_v1, %v8357_v11  ;;  %v4247_v16 = vadd.f32 %v10017_v1, %v8613_v12  ;;  %8455 = vmatprep.mubr.msk.bf16.mxu0 %vm2059_vm0, %v9065_v52  ;;  %v4994_v37 = vmax.f32 %v3202_v5, 0.0  ;;  %v5250_v40 = vmax.f32 %v4226_v10, 0.0  ;;  %8711 = vmatprep.mubr.msk.bf16.mxu1 %vm2059_vm0, %v9066_v14 }
 0x1c5   : > { %v3214_v19 = vpop.f32.mrf.mxu0  ;;  %v4238_v20 = vpop.f32.mrf.mxu1 }
 0x1c6   : > { %v3215_v21 = vadd.f32 %v10017_v1, %v3214_v19  ;;  %v4239_v45 = vadd.f32 %v10017_v1, %v4238_v20  ;;  %v10269_v4 = vmax.f32 %v4994_v37, %v4996_v36  ;;  %v10271_v24 = vmax.f32 %v5250_v40, %v5252_v39  ;;  %v9071_v20 = vld [vmem:[%s9392_s9 + $0x308] sm:$0xff]  }
 0x1c7   : > { %v8358_v33 = vpop.f32.mrf.mxu0  ;;  %v8614_v59 = vpop.f32.mrf.mxu1  ;;  %v4999_v26 = vmax.f32 %v3223_v13, 0.0  ;;  %v5255_v29 = vmax.f32 %v4247_v16, 0.0 }
 0x1c8   : > { %v4997_v6 = vmax.f32 %v3215_v21, 0.0  ;;  %v5253_v34 = vmax.f32 %v4239_v45, 0.0  ;;  %v3226_v38 = vadd.f32 %v10017_v1, %v8358_v33  ;;  %v4250_v42 = vadd.f32 %v10017_v1, %v8614_v59 }
 0x1c9   : > { %v3217_v57 = vpop.f32.mrf.mxu0  ;;  %v4241_v46 = vpop.f32.mrf.mxu1 }
 0x1ca   : > { %v10279_v23 = vmax.f32 %v4997_v6, %v4999_v26  ;;  %v10281_v47 = vmax.f32 %v5253_v34, %v5255_v29  ;;  %v3218_v48 = vadd.f32 %v10017_v1, %v3217_v57  ;;  %v4242_v49 = vadd.f32 %v10017_v1, %v4241_v46  ;;  %v9073_v26 = vld [vmem:[%s9392_s9 + $0x310] sm:$0xff]  }
 0x1cb   : > { %v8361_v50 = vpop.f32.mrf.mxu0  ;;  %8456 = vmatmul.mubr.msk.bf16.gmra.mxu0 %vm2059_vm0, %v9067_v25  ;;  %v8617_v52 = vpop.f32.mrf.mxu1  ;;  %8712 = vmatmul.mubr.msk.bf16.gmra.mxu1 %vm2059_vm0, %v9068_v7  ;;  %v5000_v54 = vmax.f32 %v3226_v38, 0.0  ;;  %v5256_v63 = vmax.f32 %v4250_v42, 0.0  ;;  %v9072_v25 = vld [vmem:[%s9392_s9 + $0x708] sm:$0xff]   ;;  %v9074_v34 = vld [vmem:[%s9392_s9 + $0x710] sm:$0xff]  }
 0x1cc   : > { %v3239_v18 = vadd.f32 %v10017_v1, %v8361_v50  ;;  %v4263_v53 = vadd.f32 %v10017_v1, %v8617_v52  ;;  %8459 = vmatprep.mubr.msk.bf16.mxu0 %vm2059_vm0, %v9069_v35  ;;  %v4998_v14 = vmax.f32 %v3218_v48, 0.0  ;;  %v5254_v5 = vmax.f32 %v4242_v49, 0.0  ;;  %8715 = vmatprep.mubr.msk.bf16.mxu1 %vm2059_vm0, %v9070_v56 }
 0x1cd   : > { %v3230_v10 = vpop.f32.mrf.mxu0  ;;  %v4254_v11 = vpop.f32.mrf.mxu1 }
 0x1ce   : > { %v3231_v12 = vadd.f32 %v10017_v1, %v3230_v10  ;;  %v4255_v13 = vadd.f32 %v10017_v1, %v4254_v11  ;;  %v10293_v16 = vmax.f32 %v4998_v14, %v5000_v54  ;;  %v10295_v36 = vmax.f32 %v5254_v5, %v5256_v63 }
 0x1cf   : > { %v5003_v39 = vmax.f32 %v3239_v18, 0.0  ;;  %v5259_v37 = vmax.f32 %v4263_v53, 0.0  ;;  %v8362_v40 = vpop.f32.mrf.mxu0  ;;  %v8618_v19 = vpop.f32.mrf.mxu1 }
 0x1d0   : > { %v5001_v21 = vmax.f32 %v3231_v12, 0.0  ;;  %v5257_v45 = vmax.f32 %v4255_v13, 0.0  ;;  %v3242_v33 = vadd.f32 %v10017_v1, %v8362_v40  ;;  %v4266_v59 = vadd.f32 %v10017_v1, %v8618_v19  ;;  %v9075_v13 = vld [vmem:[%s9392_s9 + $0x318] sm:$0xff]  }
 0x1d1   : > { %v3233_v29 = vpop.f32.mrf.mxu0  ;;  %v4257_v6 = vpop.f32.mrf.mxu1  ;;  %v9076_v40 = vld [vmem:[%s9392_s9 + $0x718] sm:$0xff]  }
 0x1d2   : > { %v10303_v7 = vmax.f32 %v5001_v21, %v5003_v39  ;;  %v10305_v35 = vmax.f32 %v5257_v45, %v5259_v37  ;;  %v3234_v38 = vadd.f32 %v10017_v1, %v3233_v29  ;;  %v4258_v42 = vadd.f32 %v10017_v1, %v4257_v6  ;;  %v10323_v21 = vld [vmem:[#allocation7] ss:$0 sm:$0xff] }
 0x1d3   : > { %v8365_v57 = vpop.f32.mrf.mxu0  ;;  %8460 = vmatmul.mubr.msk.bf16.gmra.mxu0 %vm2059_vm0, %v9071_v20  ;;  %v8621_v46 = vpop.f32.mrf.mxu1  ;;  %v5004_v56 = vmax.f32 %v3242_v33, 0.0  ;;  %v5260_v48 = vmax.f32 %v4266_v59, 0.0  ;;  %8716 = vmatmul.mubr.msk.bf16.gmra.mxu1 %vm2059_vm0, %v9072_v25  ;;  %v9077_v25 = vld [vmem:[%s9392_s9 + $0x320] sm:$0xff]  }
 0x1d4   : > { %8463 = vmatprep.mubr.msk.bf16.mxu0 %vm2059_vm0, %v9073_v26  ;;  %v5002_v49 = vmax.f32 %v3234_v38, 0.0  ;;  %v5258_v50 = vmax.f32 %v4258_v42, 0.0  ;;  %v3255_v52 = vadd.f32 %v10017_v1, %v8365_v57  ;;  %v4279_v18 = vadd.f32 %v10017_v1, %v8621_v46  ;;  %8719 = vmatprep.mubr.msk.bf16.mxu1 %vm2059_vm0, %v9074_v34  ;;  %v9078_v26 = vld [vmem:[%s9392_s9 + $0x720] sm:$0xff]  }
 0x1d5   : > { %v3246_v53 = vpop.f32.mrf.mxu0  ;;  %v4270_v54 = vpop.f32.mrf.mxu1 }
 0x1d6   : > { %v3247_v63 = vadd.f32 %v10017_v1, %v3246_v53  ;;  %v4271_v14 = vadd.f32 %v10017_v1, %v4270_v54  ;;  %v10317_v5 = vmax.f32 %v5002_v49, %v5004_v56  ;;  %v10319_v10 = vmax.f32 %v5258_v50, %v5260_v48 }
 0x1d7   : > { %v8366_v11 = vpop.f32.mrf.mxu0  ;;  %v8622_v12 = vpop.f32.mrf.mxu1  ;;  %v5007_v19 = vmax.f32 %v3255_v52, 0.0  ;;  %v5263_v20 = vmax.f32 %v4279_v18, 0.0 }
 0x1d8   : > { %v5005_v39 = vmax.f32 %v3247_v63, 0.0  ;;  %v5261_v37 = vmax.f32 %v4271_v14, 0.0  ;;  %v3258_v45 = vadd.f32 %v10323_v21, %v8366_v11  ;;  %v4282_v1 = vadd.f32 %v10323_v21, %v8622_v12 }
 0x1d9   : > { %v3249_v33 = vpop.f32.mrf.mxu0  ;;  %v4273_v59 = vpop.f32.mrf.mxu1 }
 0x1da   : > { %v5469_v29 = vmax.f32 %v5005_v39, %v5007_v19  ;;  %v5597_v6 = vmax.f32 %v5261_v37, %v5263_v20  ;;  %v3250_v34 = vadd.f32 %v10323_v21, %v3249_v33  ;;  %v4274_v38 = vadd.f32 %v10323_v21, %v4273_v59  ;;  %v9080_v33 = vld [vmem:[%s9392_s9 + $0x728] sm:$0xff]  }
 0x1db   : > { %v8369_v42 = vpop.f32.mrf.mxu0  ;;  %8464 = vmatmul.mubr.msk.bf16.gmra.mxu0 %vm2059_vm0, %v9075_v13  ;;  %v8625_v57 = vpop.f32.mrf.mxu1  ;;  %8720 = vmatmul.mubr.msk.bf16.gmra.mxu1 %vm2059_vm0, %v9076_v40  ;;  %v5008_v48 = vmax.f32 %v3258_v45, 0.0  ;;  %v5264_v49 = vmax.f32 %v4282_v1, 0.0  ;;  %v9079_v40 = vld [vmem:[%s9392_s9 + $0x328] sm:$0xff]  }
 0x1dc   : > { %v3271_v46 = vadd.f32 %v10323_v21, %v8369_v42  ;;  %v4295_v56 = vadd.f32 %v10323_v21, %v8625_v57  ;;  %v5006_v50 = vmax.f32 %v3250_v34, 0.0  ;;  %v5262_v52 = vmax.f32 %v4274_v38, 0.0  ;;  %8467 = vmatprep.mubr.msk.bf16.mxu0 %vm2059_vm0, %v9077_v25  ;;  %8723 = vmatprep.mubr.msk.bf16.mxu1 %vm2059_vm0, %v9078_v26  ;;  %v9082_v34 = vld [vmem:[%s9392_s9 + $0x730] sm:$0xff]  }
 0x1dd   : > { %v3262_v18 = vpop.f32.mrf.mxu0  ;;  %v4286_v53 = vpop.f32.mrf.mxu1  ;;  %v5693_v14 = vmax.f32 %v10133_v8, %v5469_v29  ;;  %v5757_v11 = vmax.f32 %v10135_v9, %v5597_v6  ;;  %v9081_v6 = vld [vmem:[%s9392_s9 + $0x330] sm:$0xff]  }
 0x1de   : > { %v3263_v54 = vadd.f32 %v10323_v21, %v3262_v18  ;;  %v4287_v63 = vadd.f32 %v10323_v21, %v4286_v53  ;;  %v5470_v12 = vmax.f32 %v5006_v50, %v5008_v48  ;;  %v5598_v13 = vmax.f32 %v5262_v52, %v5264_v49 }
 0x1df   : > { %v8370_v39 = vpop.f32.mrf.mxu0  ;;  %v8626_v37 = vpop.f32.mrf.mxu1  ;;  %v5011_v19 = vmax.f32 %v3271_v46, 0.0  ;;  %v5267_v20 = vmax.f32 %v4295_v56, 0.0 }
 0x1e0   : > { %v5009_v45 = vmax.f32 %v3263_v54, 0.0  ;;  %v5265_v1 = vmax.f32 %v4287_v63, 0.0  ;;  %v5694_v59 = vmax.f32 %v10149_v3, %v5470_v12  ;;  %v5758_v25 = vmax.f32 %v10151_v44, %v5598_v13 }
 0x1e1   : > { %v3274_v8 = vadd.f32 %v10323_v21, %v8370_v39  ;;  %v4298_v9 = vadd.f32 %v10323_v21, %v8626_v37  ;;  %v3265_v26 = vpop.f32.mrf.mxu0  ;;  %v4289_v29 = vpop.f32.mrf.mxu1 }
 0x1e2   : > { %v5471_v38 = vmax.f32 %v5009_v45, %v5011_v19  ;;  %v5599_v42 = vmax.f32 %v5265_v1, %v5267_v20  ;;  %v7664_v57 = vpack.c.bf16 %v5694_v59, %v5693_v14  ;;  %v7824_v46 = vpack.c.bf16 %v5758_v25, %v5757_v11  ;;  %v9083_v45 = vld [vmem:[%s9392_s9 + $0x338] sm:$0xff]  }
 0x1e3   : > { %v3266_v56 = vadd.f32 %v10323_v21, %v3265_v26  ;;  %v4290_v3 = vadd.f32 %v10323_v21, %v4289_v29  ;;  %v8373_v48 = vpop.f32.mrf.mxu0  ;;  %8468 = vmatmul.mubr.msk.bf16.gmra.mxu0 %vm2059_vm0, %v9079_v40  ;;  %v8629_v44 = vpop.f32.mrf.mxu1  ;;  %8724 = vmatmul.mubr.msk.bf16.gmra.mxu1 %vm2059_vm0, %v9080_v33  ;;  %v5012_v52 = vmax.f32 %v3274_v8, 0.0  ;;  %v5268_v18 = vmax.f32 %v4298_v9, 0.0  ;;  %v9084_v8 = vld [vmem:[%s9392_s9 + $0x738] sm:$0xff]  }
 0x1e4   : > { %v3287_v49 = vadd.f32 %v10323_v21, %v8373_v48  ;;  %v4311_v50 = vadd.f32 %v10323_v21, %v8629_v44  ;;  %7949 = vst [vmem:[%s9403_s26 + $0xa8] sm:$0xff] %v7664_v57   ;;  %7981 = vst [vmem:[%s9403_s26 + $0x1e8] sm:$0xff] %v7824_v46   ;;  %8471 = vmatprep.mubr.msk.bf16.mxu0 %vm2059_vm0, %v9081_v6  ;;  %8727 = vmatprep.mubr.msk.bf16.mxu1 %vm2059_vm0, %v9082_v34  ;;  %v9085_v34 = vld [vmem:[%s9392_s9 + $0x340] sm:$0xff]  }
 0x1e5   : > { %v5010_v53 = vmax.f32 %v3266_v56, 0.0  ;;  %v5266_v54 = vmax.f32 %v4290_v3, 0.0  ;;  %v3278_v63 = vpop.f32.mrf.mxu0  ;;  %v4302_v14 = vpop.f32.mrf.mxu1  ;;  %v5695_v13 = vmax.f32 %v10159_v27, %v5471_v38  ;;  %v5759_v39 = vmax.f32 %v10161_v28, %v5599_v42  ;;  %v9086_v38 = vld [vmem:[%s9392_s9 + $0x740] sm:$0xff]  }
 0x1e6   : > { %v3279_v11 = vadd.f32 %v10323_v21, %v3278_v63  ;;  %v4303_v12 = vadd.f32 %v10323_v21, %v4302_v14  ;;  %v5015_v1 = vmax.f32 %v3287_v49, 0.0  ;;  %v5271_v33 = vmax.f32 %v4311_v50, 0.0 }
 0x1e7   : > { %v5472_v37 = vmax.f32 %v5010_v53, %v5012_v52  ;;  %v5600_v40 = vmax.f32 %v5266_v54, %v5268_v18  ;;  %v8374_v19 = vpop.f32.mrf.mxu0  ;;  %v8630_v20 = vpop.f32.mrf.mxu1 }
 0x1e8   : > { %v5013_v59 = vmax.f32 %v3279_v11, 0.0  ;;  %v5269_v25 = vmax.f32 %v4303_v12, 0.0  ;;  %v3290_v27 = vadd.f32 %v10323_v21, %v8374_v19  ;;  %v4314_v28 = vadd.f32 %v10323_v21, %v8630_v20  ;;  %v9087_v20 = vld [vmem:[%s9392_s9 + $0x348] sm:$0xff]  }
 0x1e9   : > { %v5696_v9 = vmax.f32 %v10173_v51, %v5472_v37  ;;  %v5760_v26 = vmax.f32 %v10175_v17, %v5600_v40  ;;  %v3281_v29 = vpop.f32.mrf.mxu0  ;;  %v4305_v6 = vpop.f32.mrf.mxu1 }
 0x1ea   : > { %v5473_v42 = vmax.f32 %v5013_v59, %v5015_v1  ;;  %v5601_v57 = vmax.f32 %v5269_v25, %v5271_v33  ;;  %v3282_v3 = vadd.f32 %v10323_v21, %v3281_v29  ;;  %v4306_v51 = vadd.f32 %v10323_v21, %v4305_v6  ;;  %v9088_v25 = vld [vmem:[%s9392_s9 + $0x748] sm:$0xff]   ;;  %v9090_v29 = vld [vmem:[%s9392_s9 + $0x750] sm:$0xff]  }
 0x1eb   : > { %v7669_v46 = vpack.c.bf16 %v5696_v9, %v5695_v13  ;;  %v7829_v56 = vpack.c.bf16 %v5760_v26, %v5759_v39  ;;  %v8377_v48 = vpop.f32.mrf.mxu0  ;;  %8472 = vmatmul.mubr.msk.bf16.gmra.mxu0 %vm2059_vm0, %v9083_v45  ;;  %v8633_v17 = vpop.f32.mrf.mxu1  ;;  %8728 = vmatmul.mubr.msk.bf16.gmra.mxu1 %vm2059_vm0, %v9084_v8  ;;  %v5016_v50 = vmax.f32 %v3290_v27, 0.0  ;;  %v5272_v52 = vmax.f32 %v4314_v28, 0.0  ;;  %v9089_v28 = vld [vmem:[%s9392_s9 + $0x350] sm:$0xff]  }
 0x1ec   : > { %v3303_v44 = vadd.f32 %v10323_v21, %v8377_v48  ;;  %v4327_v49 = vadd.f32 %v10323_v21, %v8633_v17  ;;  %v5014_v18 = vmax.f32 %v3282_v3, 0.0  ;;  %v5270_v53 = vmax.f32 %v4306_v51, 0.0  ;;  %8475 = vmatprep.mubr.msk.bf16.mxu0 %vm2059_vm0, %v9085_v34  ;;  %8731 = vmatprep.mubr.msk.bf16.mxu1 %vm2059_vm0, %v9086_v38 }
 0x1ed   : > { %7950 = vst [vmem:[%s9403_s26 + $0xb0] sm:$0xff] %v7669_v46   ;;  %7982 = vst [vmem:[%s9403_s26 + $0x1f0] sm:$0xff] %v7829_v56   ;;  %v3294_v54 = vpop.f32.mrf.mxu0  ;;  %v4318_v63 = vpop.f32.mrf.mxu1  ;;  %v5697_v12 = vmax.f32 %v10183_v61, %v5473_v42  ;;  %v5761_v13 = vmax.f32 %v10185_v62, %v5601_v57 }
 0x1ee   : > { %v3295_v14 = vadd.f32 %v10323_v21, %v3294_v54  ;;  %v4319_v11 = vadd.f32 %v10323_v21, %v4318_v63  ;;  %v5474_v39 = vmax.f32 %v5014_v18, %v5016_v50  ;;  %v5602_v37 = vmax.f32 %v5270_v53, %v5272_v52 }
 0x1ef   : > { %v8378_v40 = vpop.f32.mrf.mxu0  ;;  %v8634_v19 = vpop.f32.mrf.mxu1  ;;  %v5019_v45 = vmax.f32 %v3303_v44, 0.0  ;;  %v5275_v1 = vmax.f32 %v4327_v49, 0.0 }
 0x1f0   : > { %v5017_v33 = vmax.f32 %v3295_v14, 0.0  ;;  %v5273_v59 = vmax.f32 %v4319_v11, 0.0  ;;  %v5698_v8 = vmax.f32 %v10197_v32, %v5474_v39  ;;  %v5762_v9 = vmax.f32 %v10199_v58, %v5602_v37 }
 0x1f1   : > { %v3306_v61 = vadd.f32 %v10323_v21, %v8378_v40  ;;  %v4330_v62 = vadd.f32 %v10323_v21, %v8634_v19  ;;  %v3297_v26 = vpop.f32.mrf.mxu0  ;;  %v4321_v27 = vpop.f32.mrf.mxu1 }
 0x1f2   : > { %v5475_v6 = vmax.f32 %v5017_v33, %v5019_v45  ;;  %v5603_v34 = vmax.f32 %v5273_v59, %v5275_v1  ;;  %v7674_v38 = vpack.c.bf16 %v5698_v8, %v5697_v12  ;;  %v7834_v42 = vpack.c.bf16 %v5762_v9, %v5761_v13  ;;  %v9091_v13 = vld [vmem:[%s9392_s9 + $0x358] sm:$0xff]   ;;  %v9094_v8 = vld [vmem:[%s9392_s9 + $0x760] sm:$0xff]  }
 0x1f3   : > { %v3298_v57 = vadd.f32 %v10323_v21, %v3297_v26  ;;  %v4322_v32 = vadd.f32 %v10323_v21, %v4321_v27  ;;  %v8381_v46 = vpop.f32.mrf.mxu0  ;;  %8476 = vmatmul.mubr.msk.bf16.gmra.mxu0 %vm2059_vm0, %v9087_v20  ;;  %v8637_v58 = vpop.f32.mrf.mxu1  ;;  %8732 = vmatmul.mubr.msk.bf16.gmra.mxu1 %vm2059_vm0, %v9088_v25  ;;  %v5020_v51 = vmax.f32 %v3306_v61, 0.0  ;;  %v5276_v48 = vmax.f32 %v4330_v62, 0.0  ;;  %v9092_v20 = vld [vmem:[%s9392_s9 + $0x758] sm:$0xff]   ;;  %v9093_v25 = vld [vmem:[%s9392_s9 + $0x360] sm:$0xff]  }
 0x1f4   : > { %v3319_v56 = vadd.f32 %v10323_v21, %v8381_v46  ;;  %v4343_v3 = vadd.f32 %v10323_v21, %v8637_v58  ;;  %7951 = vst [vmem:[%s9403_s26 + $0xb8] sm:$0xff] %v7674_v38   ;;  %7983 = vst [vmem:[%s9403_s26 + $0x1f8] sm:$0xff] %v7834_v42   ;;  %8479 = vmatprep.mubr.msk.bf16.mxu0 %vm2059_vm0, %v9089_v28  ;;  %8735 = vmatprep.mubr.msk.bf16.mxu1 %vm2059_vm0, %v9090_v29 }
 0x1f5   : > { %v5018_v17 = vmax.f32 %v3298_v57, 0.0  ;;  %v5274_v44 = vmax.f32 %v4322_v32, 0.0  ;;  %v3310_v49 = vpop.f32.mrf.mxu0  ;;  %v4334_v50 = vpop.f32.mrf.mxu1  ;;  %v5699_v53 = vmax.f32 %v10207_v60, %v5475_v6  ;;  %v5763_v54 = vmax.f32 %v10209_v55, %v5603_v34 }
 0x1f6   : > { %v3311_v52 = vadd.f32 %v10323_v21, %v3310_v49  ;;  %v4335_v18 = vadd.f32 %v10323_v21, %v4334_v50  ;;  %v5023_v39 = vmax.f32 %v3319_v56, 0.0  ;;  %v5279_v37 = vmax.f32 %v4343_v3, 0.0  ;;  %v9095_v50 = vld [vmem:[%s9392_s9 + $0x368] sm:$0xff]  }
 0x1f7   : > { %v5476_v63 = vmax.f32 %v5018_v17, %v5020_v51  ;;  %v5604_v14 = vmax.f32 %v5274_v44, %v5276_v48  ;;  %v8382_v11 = vpop.f32.mrf.mxu0  ;;  %v8638_v12 = vpop.f32.mrf.mxu1 }
 0x1f8   : > { %v5021_v40 = vmax.f32 %v3311_v52, 0.0  ;;  %v5277_v19 = vmax.f32 %v4335_v18, 0.0  ;;  %v3322_v60 = vadd.f32 %v10323_v21, %v8382_v11  ;;  %v4346_v55 = vadd.f32 %v10323_v21, %v8638_v12 }
 0x1f9   : > { %v5700_v45 = vmax.f32 %v10221_v31, %v5476_v63  ;;  %v5764_v1 = vmax.f32 %v10223_v15, %v5604_v14  ;;  %v3313_v33 = vpop.f32.mrf.mxu0  ;;  %v4337_v59 = vpop.f32.mrf.mxu1  ;;  %v9096_v63 = vld [vmem:[%s9392_s9 + $0x768] sm:$0xff]  }
 0x1fa   : > { %v5477_v9 = vmax.f32 %v5021_v40, %v5023_v39  ;;  %v5605_v61 = vmax.f32 %v5277_v19, %v5279_v37  ;;  %v3314_v27 = vadd.f32 %v10323_v21, %v3313_v33  ;;  %v4338_v31 = vadd.f32 %v10323_v21, %v4337_v59  ;;  %v9097_v39 = vld [vmem:[%s9392_s9 + $0x370] sm:$0xff]  }
 0x1fb   : > { %v7679_v62 = vpack.c.bf16 %v5700_v45, %v5699_v53  ;;  %v7839_v26 = vpack.c.bf16 %v5764_v1, %v5763_v54  ;;  %v8385_v28 = vpop.f32.mrf.mxu0  ;;  %8480 = vmatmul.mubr.msk.bf16.gmra.mxu0 %vm2059_vm0, %v9091_v13  ;;  %v8641_v15 = vpop.f32.mrf.mxu1  ;;  %8736 = vmatmul.mubr.msk.bf16.gmra.mxu1 %vm2059_vm0, %v9092_v20  ;;  %v5024_v34 = vmax.f32 %v3322_v60, 0.0  ;;  %v5280_v38 = vmax.f32 %v4346_v55, 0.0  ;;  %v9098_v37 = vld [vmem:[%s9392_s9 + $0x770] sm:$0xff]  }
 0x1fc   : > { %v3335_v29 = vadd.f32 %v10323_v21, %v8385_v28  ;;  %v4359_v6 = vadd.f32 %v10323_v21, %v8641_v15  ;;  %v5022_v42 = vmax.f32 %v3314_v27, 0.0  ;;  %v5278_v57 = vmax.f32 %v4338_v31, 0.0  ;;  %8483 = vmatprep.mubr.msk.bf16.mxu0 %vm2059_vm0, %v9093_v25  ;;  %8739 = vmatprep.mubr.msk.bf16.mxu1 %vm2059_vm0, %v9094_v8 }
 0x1fd   : > { %7952 = vst [vmem:[%s9403_s26 + $0xc0] sm:$0xff] %v7679_v62   ;;  %7984 = vst [vmem:[%s9403_s26 + $0x200] sm:$0xff] %v7839_v26   ;;  %v3326_v32 = vpop.f32.mrf.mxu0  ;;  %v4350_v46 = vpop.f32.mrf.mxu1  ;;  %v5701_v3 = vmax.f32 %v10231_v0, %v5477_v9  ;;  %v5765_v51 = vmax.f32 %v10233_v41, %v5605_v61 }
 0x1fe   : > { %v3327_v58 = vadd.f32 %v10323_v21, %v3326_v32  ;;  %v4351_v56 = vadd.f32 %v10323_v21, %v4350_v46  ;;  %v5478_v48 = vmax.f32 %v5022_v42, %v5024_v34  ;;  %v5606_v17 = vmax.f32 %v5278_v57, %v5280_v38  ;;  %v9099_v38 = vld [vmem:[%s9392_s9 + $0x378] sm:$0xff]  }
 0x1ff   : > { %v8386_v44 = vpop.f32.mrf.mxu0  ;;  %v8642_v49 = vpop.f32.mrf.mxu1  ;;  %v5027_v52 = vmax.f32 %v3335_v29, 0.0  ;;  %v5283_v18 = vmax.f32 %v4359_v6, 0.0 }
 0x200   : > { %v5025_v53 = vmax.f32 %v3327_v58, 0.0  ;;  %v5281_v54 = vmax.f32 %v4351_v56, 0.0  ;;  %v5702_v14 = vmax.f32 %v10245_v43, %v5478_v48  ;;  %v5766_v11 = vmax.f32 %v10247_v22, %v5606_v17  ;;  %v9100_v58 = vld [vmem:[%s9392_s9 + $0x778] sm:$0xff]   ;;  %v9101_v17 = vld [vmem:[%s9392_s9 + $0x380] sm:$0xff]  }
 0x201   : > { %v3338_v0 = vadd.f32 %v10323_v21, %v8386_v44  ;;  %v4362_v41 = vadd.f32 %v10323_v21, %v8642_v49  ;;  %v3329_v12 = vpop.f32.mrf.mxu0  ;;  %v4353_v13 = vpop.f32.mrf.mxu1  ;;  %v9102_v44 = vld [vmem:[%s9392_s9 + $0x780] sm:$0xff]  }
 0x202   : > { %v5479_v40 = vmax.f32 %v5025_v53, %v5027_v52  ;;  %v5607_v19 = vmax.f32 %v5281_v54, %v5283_v18  ;;  %v7684_v20 = vpack.c.bf16 %v5702_v14, %v5701_v3  ;;  %v7844_v45 = vpack.c.bf16 %v5766_v11, %v5765_v51 }
 0x203   : > { %v3330_v1 = vadd.f32 %v10323_v21, %v3329_v12  ;;  %v4354_v43 = vadd.f32 %v10323_v21, %v4353_v13  ;;  %v8389_v60 = vpop.f32.mrf.mxu0  ;;  %8484 = vmatmul.mubr.msk.bf16.gmra.mxu0 %vm2059_vm0, %v9095_v50  ;;  %v8645_v22 = vpop.f32.mrf.mxu1  ;;  %8740 = vmatmul.mubr.msk.bf16.gmra.mxu1 %vm2059_vm0, %v9096_v63  ;;  %v5028_v59 = vmax.f32 %v3338_v0, 0.0  ;;  %v5284_v25 = vmax.f32 %v4362_v41, 0.0 }
 0x204   : > { %v3351_v55 = vadd.f32 %v10323_v21, %v8389_v60  ;;  %v4375_v33 = vadd.f32 %v10323_v21, %v8645_v22  ;;  %7953 = vst [vmem:[%s9403_s26 + $0xc8] sm:$0xff] %v7684_v20   ;;  %7985 = vst [vmem:[%s9403_s26 + $0x208] sm:$0xff] %v7844_v45   ;;  %8487 = vmatprep.mubr.msk.bf16.mxu0 %vm2059_vm0, %v9097_v39  ;;  %8743 = vmatprep.mubr.msk.bf16.mxu1 %vm2059_vm0, %v9098_v37  ;;  %v9103_v22 = vld [vmem:[%s9392_s9 + $0x388] sm:$0xff]  }
 0x205   : > { %v5026_v8 = vmax.f32 %v3330_v1, 0.0  ;;  %v5282_v9 = vmax.f32 %v4354_v43, 0.0  ;;  %v3342_v61 = vpop.f32.mrf.mxu0  ;;  %v4366_v62 = vpop.f32.mrf.mxu1  ;;  %v5703_v31 = vmax.f32 %v10255_v30, %v5479_v40  ;;  %v5767_v28 = vmax.f32 %v10257_v2, %v5607_v19 }
 0x206   : > { %v3343_v26 = vadd.f32 %v10323_v21, %v3342_v61  ;;  %v4367_v27 = vadd.f32 %v10323_v21, %v4366_v62  ;;  %v5031_v42 = vmax.f32 %v3351_v55, 0.0  ;;  %v5287_v57 = vmax.f32 %v4375_v33, 0.0 }
 0x207   : > { %v5480_v15 = vmax.f32 %v5026_v8, %v5028_v59  ;;  %v5608_v29 = vmax.f32 %v5282_v9, %v5284_v25  ;;  %v8390_v6 = vpop.f32.mrf.mxu0  ;;  %v8646_v34 = vpop.f32.mrf.mxu1  ;;  %v9104_v8 = vld [vmem:[%s9392_s9 + $0x788] sm:$0xff]  }
 0x208   : > { %v5029_v32 = vmax.f32 %v3343_v26, 0.0  ;;  %v5285_v46 = vmax.f32 %v4367_v27, 0.0  ;;  %v3354_v30 = vadd.f32 %v10323_v21, %v8390_v6  ;;  %v4378_v2 = vadd.f32 %v10323_v21, %v8646_v34  ;;  %v9105_v27 = vld [vmem:[%s9392_s9 + $0x390] sm:$0xff]  }
 0x209   : > { %v5704_v56 = vmax.f32 %v10269_v4, %v5480_v15  ;;  %v5768_v3 = vmax.f32 %v10271_v24, %v5608_v29  ;;  %v3345_v51 = vpop.f32.mrf.mxu0  ;;  %v4369_v48 = vpop.f32.mrf.mxu1 }
 0x20a   : > { %v5481_v49 = vmax.f32 %v5029_v32, %v5031_v42  ;;  %v5609_v50 = vmax.f32 %v5285_v46, %v5287_v57  ;;  %v3346_v53 = vadd.f32 %v10323_v21, %v3345_v51  ;;  %v4370_v4 = vadd.f32 %v10323_v21, %v4369_v48 }
 0x20b   : > { %v7689_v52 = vpack.c.bf16 %v5704_v56, %v5703_v31  ;;  %v7849_v18 = vpack.c.bf16 %v5768_v3, %v5767_v28  ;;  %v8393_v54 = vpop.f32.mrf.mxu0  ;;  %8488 = vmatmul.mubr.msk.bf16.gmra.mxu0 %vm2059_vm0, %v9099_v38  ;;  %v8649_v24 = vpop.f32.mrf.mxu1  ;;  %8744 = vmatmul.mubr.msk.bf16.gmra.mxu1 %vm2059_vm0, %v9100_v58  ;;  %v5032_v11 = vmax.f32 %v3354_v30, 0.0  ;;  %v5288_v0 = vmax.f32 %v4378_v2, 0.0  ;;  %v9106_v31 = vld [vmem:[%s9392_s9 + $0x790] sm:$0xff]  }
 0x20c   : > { %v3367_v63 = vadd.f32 %v10323_v21, %v8393_v54  ;;  %v4391_v14 = vadd.f32 %v10323_v21, %v8649_v24  ;;  %v5030_v41 = vmax.f32 %v3346_v53, 0.0  ;;  %v5286_v12 = vmax.f32 %v4370_v4, 0.0  ;;  %8491 = vmatprep.mubr.msk.bf16.mxu0 %vm2059_vm0, %v9101_v17  ;;  %8747 = vmatprep.mubr.msk.bf16.mxu1 %vm2059_vm0, %v9102_v44 }
 0x20d   : > { %7954 = vst [vmem:[%s9403_s26 + $0xd0] sm:$0xff] %v7689_v52   ;;  %7986 = vst [vmem:[%s9403_s26 + $0x210] sm:$0xff] %v7849_v18   ;;  %v3358_v13 = vpop.f32.mrf.mxu0  ;;  %v4382_v39 = vpop.f32.mrf.mxu1  ;;  %v5705_v19 = vmax.f32 %v10279_v23, %v5481_v49  ;;  %v5769_v20 = vmax.f32 %v10281_v47, %v5609_v50  ;;  %v9107_v18 = vld [vmem:[%s9392_s9 + $0x398] sm:$0xff]  }
 0x20e   : > { %v3359_v37 = vadd.f32 %v10323_v21, %v3358_v13  ;;  %v4383_v40 = vadd.f32 %v10323_v21, %v4382_v39  ;;  %v5482_v45 = vmax.f32 %v5030_v41, %v5032_v11  ;;  %v5610_v1 = vmax.f32 %v5286_v12, %v5288_v0  ;;  %v9110_v13 = vld [vmem:[%s9392_s9 + $0x7a0] sm:$0xff]  }
 0x20f   : > { %v8394_v43 = vpop.f32.mrf.mxu0  ;;  %v8650_v60 = vpop.f32.mrf.mxu1  ;;  %v5035_v55 = vmax.f32 %v3367_v63, 0.0  ;;  %v5291_v33 = vmax.f32 %v4391_v14, 0.0  ;;  %v9108_v63 = vld [vmem:[%s9392_s9 + $0x798] sm:$0xff]   ;;  %v9109_v14 = vld [vmem:[%s9392_s9 + $0x3a0] sm:$0xff]  }
 0x210   : > { %v5033_v59 = vmax.f32 %v3359_v37, 0.0  ;;  %v5289_v25 = vmax.f32 %v4383_v40, 0.0  ;;  %v5706_v9 = vmax.f32 %v10293_v16, %v5482_v45  ;;  %v5770_v61 = vmax.f32 %v10295_v36, %v5610_v1 }
 0x211   : > { %v3370_v23 = vadd.f32 %v10323_v21, %v8394_v43  ;;  %v4394_v47 = vadd.f32 %v10323_v21, %v8650_v60  ;;  %v3361_v62 = vpop.f32.mrf.mxu0  ;;  %v4385_v26 = vpop.f32.mrf.mxu1 }
 0x212   : > { %v5483_v28 = vmax.f32 %v5033_v59, %v5035_v55  ;;  %v5611_v15 = vmax.f32 %v5289_v25, %v5291_v33  ;;  %v7694_v29 = vpack.c.bf16 %v5706_v9, %v5705_v19  ;;  %v7854_v6 = vpack.c.bf16 %v5770_v61, %v5769_v20 }
 0x213   : > { %v3362_v34 = vadd.f32 %v10323_v21, %v3361_v62  ;;  %v4386_v16 = vadd.f32 %v10323_v21, %v4385_v26  ;;  %v8397_v38 = vpop.f32.mrf.mxu0  ;;  %8492 = vmatmul.mubr.msk.bf16.gmra.mxu0 %vm2059_vm0, %v9103_v22  ;;  %v8653_v36 = vpop.f32.mrf.mxu1  ;;  %8748 = vmatmul.mubr.msk.bf16.gmra.mxu1 %vm2059_vm0, %v9104_v8  ;;  %v5036_v32 = vmax.f32 %v3370_v23, 0.0  ;;  %v5292_v46 = vmax.f32 %v4394_v47, 0.0 }
 0x214   : > { %v3383_v42 = vadd.f32 %v10323_v21, %v8397_v38  ;;  %v4407_v57 = vadd.f32 %v10323_v21, %v8653_v36  ;;  %7955 = vst [vmem:[%s9403_s26 + $0xd8] sm:$0xff] %v7694_v29   ;;  %7987 = vst [vmem:[%s9403_s26 + $0x218] sm:$0xff] %v7854_v6   ;;  %8495 = vmatprep.mubr.msk.bf16.mxu0 %vm2059_vm0, %v9105_v27  ;;  %8751 = vmatprep.mubr.msk.bf16.mxu1 %vm2059_vm0, %v9106_v31  ;;  %v9111_v27 = vld [vmem:[%s9392_s9 + $0x3a8] sm:$0xff]  }
 0x215   : > { %v5034_v58 = vmax.f32 %v3362_v34, 0.0  ;;  %v5290_v56 = vmax.f32 %v4386_v16, 0.0  ;;  %v3374_v3 = vpop.f32.mrf.mxu0  ;;  %v4398_v30 = vpop.f32.mrf.mxu1  ;;  %v5707_v48 = vmax.f32 %v10303_v7, %v5483_v28  ;;  %v5771_v17 = vmax.f32 %v10305_v35, %v5611_v15  ;;  %v9112_v6 = vld [vmem:[%s9392_s9 + $0x7a8] sm:$0xff]   ;;  %v9113_v34 = vld [vmem:[%s9392_s9 + $0x3b0] sm:$0xff]  }
 0x216   : > { %v3375_v2 = vadd.f32 %v10323_v21, %v3374_v3  ;;  %v4399_v51 = vadd.f32 %v10323_v21, %v4398_v30  ;;  %v5039_v53 = vmax.f32 %v3383_v42, 0.0  ;;  %v5295_v4 = vmax.f32 %v4407_v57, 0.0  ;;  %v9114_v42 = vld [vmem:[%s9392_s9 + $0x7b0] sm:$0xff]  }
 0x217   : > { %v5484_v44 = vmax.f32 %v5034_v58, %v5036_v32  ;;  %v5612_v49 = vmax.f32 %v5290_v56, %v5292_v46  ;;  %v8398_v50 = vpop.f32.mrf.mxu0  ;;  %v8654_v52 = vpop.f32.mrf.mxu1 }
 0x218   : > { %v5037_v54 = vmax.f32 %v3375_v2, 0.0  ;;  %v5293_v24 = vmax.f32 %v4399_v51, 0.0  ;;  %v3386_v7 = vadd.f32 %v10323_v21, %v8398_v50  ;;  %v4410_v35 = vadd.f32 %v10323_v21, %v8654_v52 }
 0x219   : > { %v5708_v11 = vmax.f32 %v10317_v5, %v5484_v44  ;;  %v5772_v0 = vmax.f32 %v10319_v10, %v5612_v49  ;;  %v3377_v41 = vpop.f32.mrf.mxu0  ;;  %v4401_v12 = vpop.f32.mrf.mxu1 }
 0x21a   : > { %v10503_v39 = vmax.f32 %v5037_v54, %v5039_v53  ;;  %v10505_v37 = vmax.f32 %v5293_v24, %v5295_v4  ;;  %v3378_v20 = vadd.f32 %v10323_v21, %v3377_v41  ;;  %v4402_v5 = vadd.f32 %v10323_v21, %v4401_v12  ;;  %v9115_v24 = vld [vmem:[%s9392_s9 + $0x3b8] sm:$0xff]  }
 0x21b   : > { %v7699_v40 = vpack.c.bf16 %v5708_v11, %v5707_v48  ;;  %v7859_v19 = vpack.c.bf16 %v5772_v0, %v5771_v17  ;;  %v8401_v10 = vpop.f32.mrf.mxu0  ;;  %8496 = vmatmul.mubr.msk.bf16.gmra.mxu0 %vm2059_vm0, %v9107_v18  ;;  %v8657_v45 = vpop.f32.mrf.mxu1  ;;  %8752 = vmatmul.mubr.msk.bf16.gmra.mxu1 %vm2059_vm0, %v9108_v63  ;;  %v5040_v60 = vmax.f32 %v3386_v7, 0.0  ;;  %v5296_v22 = vmax.f32 %v4410_v35, 0.0  ;;  %v9116_v7 = vld [vmem:[%s9392_s9 + $0x7b8] sm:$0xff]   ;;  %v9117_v35 = vld [vmem:[%s9392_s9 + $0x3c0] sm:$0xff]  }
 0x21c   : > { %v3399_v1 = vadd.f32 %v10323_v21, %v8401_v10  ;;  %v4423_v43 = vadd.f32 %v10323_v21, %v8657_v45  ;;  %8499 = vmatprep.mubr.msk.bf16.mxu0 %vm2059_vm0, %v9109_v14  ;;  %v5038_v55 = vmax.f32 %v3378_v20, 0.0  ;;  %v5294_v33 = vmax.f32 %v4402_v5, 0.0  ;;  %8755 = vmatprep.mubr.msk.bf16.mxu1 %vm2059_vm0, %v9110_v13 }
 0x21d   : > { %7956 = vst [vmem:[%s9403_s26 + $0xe0] sm:$0xff] %v7699_v40   ;;  %7988 = vst [vmem:[%s9403_s26 + $0x220] sm:$0xff] %v7859_v19   ;;  %v3390_v59 = vpop.f32.mrf.mxu0  ;;  %v4414_v25 = vpop.f32.mrf.mxu1  ;;  %v9118_v19 = vld [vmem:[%s9392_s9 + $0x7c0] sm:$0xff]  }
 0x21e   : > { %v3391_v8 = vadd.f32 %v10323_v21, %v3390_v59  ;;  %v4415_v9 = vadd.f32 %v10323_v21, %v4414_v25  ;;  %v10519_v61 = vmax.f32 %v5038_v55, %v5040_v60  ;;  %v10521_v23 = vmax.f32 %v5294_v33, %v5296_v22 }
 0x21f   : > { %v5043_v47 = vmax.f32 %v3399_v1, 0.0  ;;  %v8402_v62 = vpop.f32.mrf.mxu0  ;;  %v8658_v26 = vpop.f32.mrf.mxu1  ;;  %v5299_v31 = vmax.f32 %v4423_v43, 0.0 }
 0x220   : > { %v5041_v28 = vmax.f32 %v3391_v8, 0.0  ;;  %v5297_v15 = vmax.f32 %v4415_v9, 0.0  ;;  %v3402_v29 = vadd.f32 %v10323_v21, %v8402_v62  ;;  %v4426_v16 = vadd.f32 %v10323_v21, %v8658_v26 }
 0x221   : > { %v3393_v38 = vpop.f32.mrf.mxu0  ;;  %v4417_v36 = vpop.f32.mrf.mxu1 }
 0x222   : > { %v10529_v57 = vmax.f32 %v5041_v28, %v5043_v47  ;;  %v10531_v32 = vmax.f32 %v5297_v15, %v5299_v31  ;;  %v3394_v46 = vadd.f32 %v10323_v21, %v3393_v38  ;;  %v4418_v58 = vadd.f32 %v10323_v21, %v4417_v36  ;;  %v9119_v15 = vld [vmem:[%s9392_s9 + $0x3c8] sm:$0xff]   ;;  %v9121_v36 = vld [vmem:[%s9392_s9 + $0x3d0] sm:$0xff]  }
 0x223   : > { %v8405_v56 = vpop.f32.mrf.mxu0  ;;  %8500 = vmatmul.mubr.msk.bf16.gmra.mxu0 %vm2059_vm0, %v9111_v27  ;;  %v5044_v3 = vmax.f32 %v3402_v29, 0.0  ;;  %v8661_v2 = vpop.f32.mrf.mxu1  ;;  %8756 = vmatmul.mubr.msk.bf16.gmra.mxu1 %vm2059_vm0, %v9112_v6  ;;  %v5300_v51 = vmax.f32 %v4426_v16, 0.0  ;;  %v9120_v38 = vld [vmem:[%s9392_s9 + $0x7c8] sm:$0xff]  }
 0x224   : > { %v3415_v30 = vadd.f32 %v10323_v21, %v8405_v56  ;;  %8503 = vmatprep.mubr.msk.bf16.mxu0 %vm2059_vm0, %v9113_v34  ;;  %v5042_v48 = vmax.f32 %v3394_v46, 0.0  ;;  %v5298_v17 = vmax.f32 %v4418_v58, 0.0  ;;  %v4439_v44 = vadd.f32 %v10323_v21, %v8661_v2  ;;  %8759 = vmatprep.mubr.msk.bf16.mxu1 %vm2059_vm0, %v9114_v42 }
 0x225   : > { %v3406_v49 = vpop.f32.mrf.mxu0  ;;  %v4430_v52 = vpop.f32.mrf.mxu1 }
 0x226   : > { %v3407_v50 = vadd.f32 %v10323_v21, %v3406_v49  ;;  %v10542_v18 = vmax.f32 %v5042_v48, %v5044_v3  ;;  %v10544_v53 = vmax.f32 %v5298_v17, %v5300_v51  ;;  %v4431_v4 = vadd.f32 %v10323_v21, %v4430_v52  ;;  %v9122_v3 = vld [vmem:[%s9392_s9 + $0x7d0] sm:$0xff]  }
 0x227   : > { %v8406_v54 = vpop.f32.mrf.mxu0  ;;  %v5047_v63 = vmax.f32 %v3415_v30, 0.0  ;;  %v8662_v0 = vpop.f32.mrf.mxu1  ;;  %v5303_v41 = vmax.f32 %v4439_v44, 0.0 }
 0x228   : > { %v5045_v14 = vmax.f32 %v3407_v50, 0.0  ;;  %v3418_v11 = vadd.f32 %v10323_v21, %v8406_v54  ;;  %v5301_v12 = vmax.f32 %v4431_v4, 0.0  ;;  %v4442_v13 = vadd.f32 %v10323_v21, %v8662_v0 }
 0x229   : > { %v3409_v40 = vpop.f32.mrf.mxu0  ;;  %v4433_v10 = vpop.f32.mrf.mxu1 }
 0x22a   : > { %v10553_v20 = vmax.f32 %v5045_v14, %v5047_v63  ;;  %v3410_v5 = vadd.f32 %v10323_v21, %v3409_v40  ;;  %v10556_v45 = vmax.f32 %v5301_v12, %v5303_v41  ;;  %v4434_v1 = vadd.f32 %v10323_v21, %v4433_v10 }
 0x22b   : > { %v8409_v43 = vpop.f32.mrf.mxu0  ;;  %8504 = vmatmul.mubr.msk.bf16.gmra.mxu0 %vm2059_vm0, %v9115_v24  ;;  %v5048_v60 = vmax.f32 %v3418_v11, 0.0  ;;  %v8665_v33 = vpop.f32.mrf.mxu1  ;;  %8760 = vmatmul.mubr.msk.bf16.gmra.mxu1 %vm2059_vm0, %v9116_v7  ;;  %v5304_v59 = vmax.f32 %v4442_v13, 0.0  ;;  %v9123_v13 = vld [vmem:[%s9392_s9 + $0x3d8] sm:$0xff]  }
 0x22c   : > { %v5046_v22 = vmax.f32 %v3410_v5, 0.0  ;;  %v3431_v55 = vadd.f32 %v10323_v21, %v8409_v43  ;;  %8507 = vmatprep.mubr.msk.bf16.mxu0 %vm2059_vm0, %v9117_v35  ;;  %v5302_v25 = vmax.f32 %v4434_v1, 0.0  ;;  %v4455_v8 = vadd.f32 %v10323_v21, %v8665_v33  ;;  %8763 = vmatprep.mubr.msk.bf16.mxu1 %vm2059_vm0, %v9118_v19  ;;  %v9124_v1 = vld [vmem:[%s9392_s9 + $0x7d8] sm:$0xff]   ;;  %v9125_v43 = vld [vmem:[%s9392_s9 + $0x3e0] sm:$0xff]  }
 0x22d   : > { %v3422_v9 = vpop.f32.mrf.mxu0  ;;  %v4446_v26 = vpop.f32.mrf.mxu1 }
 0x22e   : > { %v10565_v47 = vmax.f32 %v5046_v22, %v5048_v60  ;;  %v3423_v62 = vadd.f32 %v10323_v21, %v3422_v9  ;;  %v10568_v27 = vmax.f32 %v5302_v25, %v5304_v59  ;;  %v4447_v31 = vadd.f32 %v10323_v21, %v4446_v26  ;;  %v9126_v59 = vld [vmem:[%s9392_s9 + $0x7e0] sm:$0xff]  }
 0x22f   : > { %v8410_v28 = vpop.f32.mrf.mxu0  ;;  %v5051_v29 = vmax.f32 %v3431_v55, 0.0  ;;  %v8666_v16 = vpop.f32.mrf.mxu1  ;;  %v5307_v42 = vmax.f32 %v4455_v8, 0.0 }
 0x230   : > { %v5049_v6 = vmax.f32 %v3423_v62, 0.0  ;;  %v3434_v34 = vadd.f32 %v10323_v21, %v8410_v28  ;;  %v5305_v46 = vmax.f32 %v4447_v31, 0.0  ;;  %v4458_v58 = vadd.f32 %v10323_v21, %v8666_v16 }
 0x231   : > { %v3425_v56 = vpop.f32.mrf.mxu0  ;;  %v4449_v51 = vpop.f32.mrf.mxu1 }
 0x232   : > { %v10577_v30 = vmax.f32 %v5049_v6, %v5051_v29  ;;  %v3426_v2 = vadd.f32 %v10323_v21, %v3425_v56  ;;  %v10580_v48 = vmax.f32 %v5305_v46, %v5307_v42  ;;  %v4450_v17 = vadd.f32 %v10323_v21, %v4449_v51  ;;  %v9127_v51 = vld [vmem:[%s9392_s9 + $0x3e8] sm:$0xff]  }
 0x233   : > { %v8413_v44 = vpop.f32.mrf.mxu0  ;;  %8508 = vmatmul.mubr.msk.bf16.gmra.mxu0 %vm2059_vm0, %v9119_v15  ;;  %v5052_v49 = vmax.f32 %v3434_v34, 0.0  ;;  %v8669_v4 = vpop.f32.mrf.mxu1  ;;  %8764 = vmatmul.mubr.msk.bf16.gmra.mxu1 %vm2059_vm0, %v9120_v38  ;;  %v5308_v54 = vmax.f32 %v4458_v58, 0.0  ;;  %v10611_v38 = vld [vmem:[#allocation7] ss:$0 sm:$0xff] }
 0x234   : > { %v5050_v50 = vmax.f32 %v3426_v2, 0.0  ;;  %v3447_v52 = vadd.f32 %v10323_v21, %v8413_v44  ;;  %8511 = vmatprep.mubr.msk.bf16.mxu0 %vm2059_vm0, %v9121_v36  ;;  %v5306_v24 = vmax.f32 %v4450_v17, 0.0  ;;  %v4471_v63 = vadd.f32 %v10323_v21, %v8669_v4  ;;  %8767 = vmatprep.mubr.msk.bf16.mxu1 %vm2059_vm0, %v9122_v3  ;;  %v9129_v4 = vld [vmem:[%s9392_s9 + $0x3f0] sm:$0xff]  }
 0x235   : > { %v3438_v14 = vpop.f32.mrf.mxu0  ;;  %v4462_v7 = vpop.f32.mrf.mxu1 }
 0x236   : > { %v10589_v11 = vmax.f32 %v5050_v50, %v5052_v49  ;;  %v3439_v0 = vadd.f32 %v10323_v21, %v3438_v14  ;;  %v10592_v35 = vmax.f32 %v5306_v24, %v5308_v54  ;;  %v4463_v41 = vadd.f32 %v10323_v21, %v4462_v7 }
 0x237   : > { %v8414_v12 = vpop.f32.mrf.mxu0  ;;  %v5055_v40 = vmax.f32 %v3447_v52, 0.0  ;;  %v8670_v10 = vpop.f32.mrf.mxu1  ;;  %v5311_v60 = vmax.f32 %v4471_v63, 0.0  ;;  %v9128_v52 = vld [vmem:[%s9392_s9 + $0x7e8] sm:$0xff]  }
 0x238   : > { %v5053_v19 = vmax.f32 %v3439_v0, 0.0  ;;  %v3450_v5 = vadd.f32 %v10323_v21, %v8414_v12  ;;  %v5309_v22 = vmax.f32 %v4463_v41, 0.0  ;;  %v4474_v55 = vadd.f32 %v10323_v21, %v8670_v10  ;;  %v9130_v0 = vld [vmem:[%s9392_s9 + $0x7f0] sm:$0xff]  }
 0x239   : > { %v3441_v33 = vpop.f32.mrf.mxu0  ;;  %v4465_v9 = vpop.f32.mrf.mxu1 }
 0x23a   : > { %v10601_v25 = vmax.f32 %v5053_v19, %v5055_v40  ;;  %v3442_v8 = vadd.f32 %v10323_v21, %v3441_v33  ;;  %v10604_v62 = vmax.f32 %v5309_v22, %v5311_v60  ;;  %v4466_v26 = vadd.f32 %v10323_v21, %v4465_v9 }
 0x23b   : > { %v8417_v31 = vpop.f32.mrf.mxu0  ;;  %8512 = vmatmul.mubr.msk.bf16.gmra.mxu0 %vm2059_vm0, %v9123_v13  ;;  %v5056_v28 = vmax.f32 %v3450_v5, 0.0  ;;  %v8673_v6 = vpop.f32.mrf.mxu1  ;;  %8768 = vmatmul.mubr.msk.bf16.gmra.mxu1 %vm2059_vm0, %v9124_v1  ;;  %v5312_v34 = vmax.f32 %v4474_v55, 0.0 }
 0x23c   : > { %v5054_v15 = vmax.f32 %v3442_v8, 0.0  ;;  %v3463_v29 = vadd.f32 %v10323_v21, %v8417_v31  ;;  %8515 = vmatprep.mubr.msk.bf16.mxu0 %vm2059_vm0, %v9125_v43  ;;  %v5310_v16 = vmax.f32 %v4466_v26, 0.0  ;;  %v4487_v36 = vadd.f32 %v10611_v38, %v8673_v6  ;;  %8771 = vmatprep.mubr.msk.bf16.mxu1 %vm2059_vm0, %v9126_v59 }
 0x23d   : > { %v3454_v42 = vpop.f32.mrf.mxu0  ;;  %v4478_v58 = vpop.f32.mrf.mxu1 }
 0x23e   : > { %v10615_v46 = vmax.f32 %v5054_v15, %v5056_v28  ;;  %v3455_v21 = vadd.f32 %v10611_v38, %v3454_v42  ;;  %v10618_v56 = vmax.f32 %v5310_v16, %v5312_v34  ;;  %v4479_v3 = vadd.f32 %v10611_v38, %v4478_v58  ;;  %v9131_v15 = vld [vmem:[%s9392_s9 + $0x3f8] sm:$0xff]  }
 0x23f   : > { %v8418_v2 = vpop.f32.mrf.mxu0  ;;  %v5059_v17 = vmax.f32 %v3463_v29, 0.0  ;;  %v8674_v50 = vpop.f32.mrf.mxu1  ;;  %v5315_v54 = vmax.f32 %v4487_v36, 0.0  ;;  %v9132_v36 = vld [vmem:[%s9392_s9 + $0x7f8] sm:$0xff]  }
 0x240   : > { %v5057_v44 = vmax.f32 %v3455_v21, 0.0  ;;  %v3466_v49 = vadd.f32 %v10611_v38, %v8418_v2  ;;  %v5313_v24 = vmax.f32 %v4479_v3, 0.0  ;;  %v4490_v63 = vadd.f32 %v10611_v38, %v8674_v50 }
 0x241   : > { %v3457_v14 = vpop.f32.mrf.mxu0  ;;  %v4481_v12 = vpop.f32.mrf.mxu1 }
 0x242   : > { %v10627_v7 = vmax.f32 %v5057_v44, %v5059_v17  ;;  %v3458_v41 = vadd.f32 %v10611_v38, %v3457_v14  ;;  %v10630_v13 = vmax.f32 %v5313_v24, %v5315_v54  ;;  %v4482_v40 = vadd.f32 %v10611_v38, %v4481_v12 }
 0x243   : > { %v8421_v19 = vpop.f32.mrf.mxu0  ;;  %8516 = vmatmul.mubr.msk.bf16.gmra.mxu0 %vm2059_vm0, %v9127_v51  ;;  %v5060_v5 = vmax.f32 %v3466_v49, 0.0  ;;  %v8677_v43 = vpop.f32.mrf.mxu1  ;;  %8772 = vmatmul.mubr.msk.bf16.gmra.mxu1 %vm2059_vm0, %v9128_v52  ;;  %v5316_v60 = vmax.f32 %v4490_v63, 0.0 }
 0x244   : > { %v5058_v10 = vmax.f32 %v3458_v41, 0.0  ;;  %v3479_v1 = vadd.f32 %v10611_v38, %v8421_v19  ;;  %8519 = vmatprep.mubr.msk.bf16.mxu0 %vm2059_vm0, %v9129_v4  ;;  %v5314_v22 = vmax.f32 %v4482_v40, 0.0  ;;  %v4503_v55 = vadd.f32 %v10611_v38, %v8677_v43  ;;  %8775 = vmatprep.mubr.msk.bf16.mxu1 %vm2059_vm0, %v9130_v0 }
 0x245   : > { %v3470_v33 = vpop.f32.mrf.mxu0  ;;  %v4494_v9 = vpop.f32.mrf.mxu1 }
 0x246   : > { %v10639_v59 = vmax.f32 %v5058_v10, %v5060_v5  ;;  %v3471_v8 = vadd.f32 %v10611_v38, %v3470_v33  ;;  %v10642_v26 = vmax.f32 %v5314_v22, %v5316_v60  ;;  %v4495_v31 = vadd.f32 %v10611_v38, %v4494_v9 }
 0x247   : > { %v8422_v28 = vpop.f32.mrf.mxu0  ;;  %v5063_v29 = vmax.f32 %v3479_v1, 0.0  ;;  %v8678_v16 = vpop.f32.mrf.mxu1  ;;  %v5319_v42 = vmax.f32 %v4503_v55, 0.0 }
 0x248   : > { %v5061_v6 = vmax.f32 %v3471_v8, 0.0  ;;  %v3482_v34 = vadd.f32 %v10611_v38, %v8422_v28  ;;  %v5317_v21 = vmax.f32 %v4495_v31, 0.0  ;;  %v4506_v58 = vadd.f32 %v10611_v38, %v8678_v16 }
 0x249   : > { %v3473_v3 = vpop.f32.mrf.mxu0  ;;  %v4497_v17 = vpop.f32.mrf.mxu1 }
 0x24a   : > { %v10649_v2 = vmax.f32 %v5061_v6, %v5063_v29  ;;  %v3474_v51 = vadd.f32 %v10611_v38, %v3473_v3  ;;  %v10652_v44 = vmax.f32 %v5317_v21, %v5319_v42  ;;  %v4498_v49 = vadd.f32 %v10611_v38, %v4497_v17 }
 0x24b   : > { %v8425_v50 = vpop.f32.mrf.mxu0  ;;  %8520 = vmatmul.mubr.msk.bf16.gmra.mxu0 %vm2059_vm0, %v9131_v15  ;;  %v5064_v52 = vmax.f32 %v3482_v34, 0.0  ;;  %v8681_v24 = vpop.f32.mrf.mxu1  ;;  %8776 = vmatmul.mubr.msk.bf16.gmra.mxu1 %vm2059_vm0, %v9132_v36  ;;  %v5320_v63 = vmax.f32 %v4506_v58, 0.0 }
 0x24c   : > { %v5062_v4 = vmax.f32 %v3474_v51, 0.0  ;;  %v3495_v54 = vadd.f32 %v10611_v38, %v8425_v50  ;;  %v5318_v14 = vmax.f32 %v4498_v49, 0.0  ;;  %v4519_v0 = vadd.f32 %v10611_v38, %v8681_v24 }
 0x24d   : > { %v3486_v41 = vpop.f32.mrf.mxu0  ;;  %v4510_v19 = vpop.f32.mrf.mxu1 }
 0x24e   : > { %v10659_v12 = vmax.f32 %v5062_v4, %v5064_v52  ;;  %v3487_v40 = vadd.f32 %v10611_v38, %v3486_v41  ;;  %v10662_v5 = vmax.f32 %v5318_v14, %v5320_v63  ;;  %v4511_v10 = vadd.f32 %v10611_v38, %v4510_v19 }
 0x24f   : > { %v8426_v1 = vpop.f32.mrf.mxu0  ;;  %v5067_v43 = vmax.f32 %v3495_v54, 0.0  ;;  %v8682_v55 = vpop.f32.mrf.mxu1  ;;  %v5323_v33 = vmax.f32 %v4519_v0, 0.0 }
 0x250   : > { %v5065_v60 = vmax.f32 %v3487_v40, 0.0  ;;  %v3498_v22 = vadd.f32 %v10611_v38, %v8426_v1  ;;  %v5321_v8 = vmax.f32 %v4511_v10, 0.0  ;;  %v4522_v9 = vadd.f32 %v10611_v38, %v8682_v55 }
 0x251   : > { %v3489_v31 = vpop.f32.mrf.mxu0  ;;  %v4513_v29 = vpop.f32.mrf.mxu1 }
 0x252   : > { %v10667_v28 = vmax.f32 %v5065_v60, %v5067_v43  ;;  %v3490_v15 = vadd.f32 %v10611_v38, %v3489_v31  ;;  %v10670_v6 = vmax.f32 %v5321_v8, %v5323_v33  ;;  %v4514_v34 = vadd.f32 %v10611_v38, %v4513_v29 }
 0x253   : > { %v8429_v16 = vpop.f32.mrf.mxu0  ;;  %v5068_v36 = vmax.f32 %v3498_v22, 0.0  ;;  %v8685_v21 = vpop.f32.mrf.mxu1  ;;  %v5324_v58 = vmax.f32 %v4522_v9, 0.0 }
 0x254   : > { %v5066_v42 = vmax.f32 %v3490_v15, 0.0  ;;  %v5322_v3 = vmax.f32 %v4514_v34, 0.0  ;;  %v3511_v51 = vadd.f32 %v10611_v38, %v8429_v16  ;;  %v4535_v17 = vadd.f32 %v10611_v38, %v8685_v21 }
 0x255   : > { %v3502_v49 = vpop.f32.mrf.mxu0  ;;  %v4526_v4 = vpop.f32.mrf.mxu1 }
 0x256   : > { %v10675_v50 = vmax.f32 %v5066_v42, %v5068_v36  ;;  %v3503_v52 = vadd.f32 %v10611_v38, %v3502_v49  ;;  %v10678_v54 = vmax.f32 %v5322_v3, %v5324_v58  ;;  %v4527_v24 = vadd.f32 %v10611_v38, %v4526_v4 }
 0x257   : > { %v8430_v63 = vpop.f32.mrf.mxu0  ;;  %v8686_v41 = vpop.f32.mrf.mxu1  ;;  %v5071_v40 = vmax.f32 %v3511_v51, 0.0  ;;  %v5327_v19 = vmax.f32 %v4535_v17, 0.0 }
 0x258   : > { %v5069_v14 = vmax.f32 %v3503_v52, 0.0  ;;  %v3514_v0 = vadd.f32 %v10611_v38, %v8430_v63  ;;  %v5325_v10 = vmax.f32 %v4527_v24, 0.0  ;;  %v4538_v1 = vadd.f32 %v10611_v38, %v8686_v41 }
 0x259   : > { %v3505_v43 = vpop.f32.mrf.mxu0  ;;  %v4529_v22 = vpop.f32.mrf.mxu1 }
 0x25a   : > { %v3506_v60 = vadd.f32 %v10611_v38, %v3505_v43  ;;  %v5501_v55 = vmax.f32 %v5069_v14, %v5071_v40  ;;  %v5629_v33 = vmax.f32 %v5325_v10, %v5327_v19  ;;  %v4530_v8 = vadd.f32 %v10611_v38, %v4529_v22 }
 0x25b   : > { %v8433_v9 = vpop.f32.mrf.mxu0  ;;  %v5072_v31 = vmax.f32 %v3514_v0, 0.0  ;;  %v8689_v34 = vpop.f32.mrf.mxu1  ;;  %v5328_v16 = vmax.f32 %v4538_v1, 0.0 }
 0x25c   : > { %v5070_v15 = vmax.f32 %v3506_v60, 0.0  ;;  %v3527_v29 = vadd.f32 %v10611_v38, %v8433_v9  ;;  %v5326_v36 = vmax.f32 %v4530_v8, 0.0  ;;  %v4551_v42 = vadd.f32 %v10611_v38, %v8689_v34 }
 0x25d   : > { %v3518_v21 = vpop.f32.mrf.mxu0  ;;  %v4542_v51 = vpop.f32.mrf.mxu1  ;;  %v5709_v17 = vmax.f32 %v10503_v39, %v5501_v55  ;;  %v5773_v49 = vmax.f32 %v10505_v37, %v5629_v33 }
 0x25e   : > { %v5502_v58 = vmax.f32 %v5070_v15, %v5072_v31  ;;  %v3519_v3 = vadd.f32 %v10611_v38, %v3518_v21  ;;  %v5630_v52 = vmax.f32 %v5326_v36, %v5328_v16  ;;  %v4543_v4 = vadd.f32 %v10611_v38, %v4542_v51 }
 0x25f   : > { %v8434_v24 = vpop.f32.mrf.mxu0  ;;  %v5075_v14 = vmax.f32 %v3527_v29, 0.0  ;;  %v8690_v40 = vpop.f32.mrf.mxu1  ;;  %v5331_v10 = vmax.f32 %v4551_v42, 0.0 }
 0x260   : > { %v5710_v63 = vmax.f32 %v10519_v61, %v5502_v58  ;;  %v5073_v0 = vmax.f32 %v3519_v3, 0.0  ;;  %v3530_v41 = vadd.f32 %v10611_v38, %v8434_v24  ;;  %v5774_v19 = vmax.f32 %v10521_v23, %v5630_v52 }
 0x261   : > { %v5329_v1 = vmax.f32 %v4543_v4, 0.0  ;;  %v4554_v39 = vadd.f32 %v10611_v38, %v8690_v40  ;;  %v3521_v37 = vpop.f32.mrf.mxu0  ;;  %v4545_v22 = vpop.f32.mrf.mxu1 }
 0x262   : > { %v7704_v43 = vpack.c.bf16 %v5710_v63, %v5709_v17  ;;  %v3522_v60 = vadd.f32 %v10611_v38, %v3521_v37  ;;  %v7864_v55 = vpack.c.bf16 %v5774_v19, %v5773_v49  ;;  %v5503_v61 = vmax.f32 %v5073_v0, %v5075_v14 }
 0x263   : > { %v5631_v33 = vmax.f32 %v5329_v1, %v5331_v10  ;;  %v4546_v8 = vadd.f32 %v10611_v38, %v4545_v22  ;;  %v8437_v9 = vpop.f32.mrf.mxu0  ;;  %v5076_v31 = vmax.f32 %v3530_v41, 0.0  ;;  %v8693_v29 = vpop.f32.mrf.mxu1  ;;  %v5332_v34 = vmax.f32 %v4554_v39, 0.0 }
 0x264   : > { %7957 = vst [vmem:[%s9403_s26 + $0xf8] sm:$0xff] %v7704_v43   ;;  %v5074_v15 = vmax.f32 %v3522_v60, 0.0  ;;  %v3543_v23 = vadd.f32 %v10611_v38, %v8437_v9  ;;  %7989 = vst [vmem:[%s9403_s26 + $0x238] sm:$0xff] %v7864_v55   ;;  %v4567_v36 = vadd.f32 %v10611_v38, %v8693_v29  ;;  %v5711_v51 = vmax.f32 %v10529_v57, %v5503_v61 }
 0x265   : > { %v5330_v16 = vmax.f32 %v4546_v8, 0.0  ;;  %v3534_v42 = vpop.f32.mrf.mxu0  ;;  %v4558_v3 = vpop.f32.mrf.mxu1  ;;  %v5775_v17 = vmax.f32 %v10531_v32, %v5631_v33 }
 0x266   : > { %v5504_v21 = vmax.f32 %v5074_v15, %v5076_v31  ;;  %v3535_v58 = vadd.f32 %v10611_v38, %v3534_v42  ;;  %v4559_v52 = vadd.f32 %v10611_v38, %v4558_v3  ;;  %v5079_v63 = vmax.f32 %v3543_v23, 0.0 }
 0x267   : > { %v5632_v49 = vmax.f32 %v5330_v16, %v5332_v34  ;;  %v8438_v4 = vpop.f32.mrf.mxu0  ;;  %v8694_v41 = vpop.f32.mrf.mxu1  ;;  %v5335_v19 = vmax.f32 %v4567_v36, 0.0 }
 0x268   : > { %v5712_v24 = vmax.f32 %v10542_v18, %v5504_v21  ;;  %v5077_v14 = vmax.f32 %v3535_v58, 0.0  ;;  %v3546_v0 = vadd.f32 %v10611_v38, %v8438_v4  ;;  %v5333_v10 = vmax.f32 %v4559_v52, 0.0 }
 0x269   : > { %v5776_v40 = vmax.f32 %v10544_v53, %v5632_v49  ;;  %v4570_v57 = vadd.f32 %v10611_v38, %v8694_v41  ;;  %v3537_v32 = vpop.f32.mrf.mxu0  ;;  %v4561_v37 = vpop.f32.mrf.mxu1 }
 0x26a   : > { %v7709_v1 = vpack.c.bf16 %v5712_v24, %v5711_v51  ;;  %v3538_v39 = vadd.f32 %v10611_v38, %v3537_v32  ;;  %v5505_v18 = vmax.f32 %v5077_v14, %v5079_v63  ;;  %v5633_v60 = vmax.f32 %v5333_v10, %v5335_v19 }
 0x26b   : > { %v7869_v43 = vpack.c.bf16 %v5776_v40, %v5775_v17  ;;  %v4562_v22 = vadd.f32 %v10611_v38, %v4561_v37  ;;  %v8441_v55 = vpop.f32.mrf.mxu0  ;;  %v5080_v61 = vmax.f32 %v3546_v0, 0.0  ;;  %v8697_v8 = vpop.f32.mrf.mxu1  ;;  %v5336_v9 = vmax.f32 %v4570_v57, 0.0 }
 0x26c   : > { %7958 = vst [vmem:[%s9403_s26 + $0x100] sm:$0xff] %v7709_v1   ;;  %v5078_v33 = vmax.f32 %v3538_v39, 0.0  ;;  %v3559_v53 = vadd.f32 %v10611_v38, %v8441_v55  ;;  %v4583_v15 = vadd.f32 %v10611_v38, %v8697_v8  ;;  %v5713_v36 = vmax.f32 %v10553_v20, %v5505_v18 }
 0x26d   : > { %7990 = vst [vmem:[%s9403_s26 + $0x240] sm:$0xff] %v7869_v43   ;;  %v5334_v31 = vmax.f32 %v4562_v22, 0.0  ;;  %v3550_v23 = vpop.f32.mrf.mxu0  ;;  %v4574_v16 = vpop.f32.mrf.mxu1  ;;  %v5777_v42 = vmax.f32 %v10556_v45, %v5633_v60 }
 0x26e   : > { %v5506_v29 = vmax.f32 %v5078_v33, %v5080_v61  ;;  %v3551_v34 = vadd.f32 %v10611_v38, %v3550_v23  ;;  %v4575_v58 = vadd.f32 %v10611_v38, %v4574_v16  ;;  %v5083_v17 = vmax.f32 %v3559_v53, 0.0 }
 0x26f   : > { %v5634_v21 = vmax.f32 %v5334_v31, %v5336_v9  ;;  %v8442_v3 = vpop.f32.mrf.mxu0  ;;  %v8698_v4 = vpop.f32.mrf.mxu1  ;;  %v5339_v63 = vmax.f32 %v4583_v15, 0.0 }
 0x270   : > { %v5714_v51 = vmax.f32 %v10565_v47, %v5506_v29  ;;  %v5081_v49 = vmax.f32 %v3551_v34, 0.0  ;;  %v3562_v52 = vadd.f32 %v10611_v38, %v8442_v3  ;;  %v5337_v14 = vmax.f32 %v4575_v58, 0.0 }
 0x271   : > { %v5778_v24 = vmax.f32 %v10568_v27, %v5634_v21  ;;  %v4586_v20 = vadd.f32 %v10611_v38, %v8698_v4  ;;  %v3553_v45 = vpop.f32.mrf.mxu0  ;;  %v4577_v40 = vpop.f32.mrf.mxu1 }
 0x272   : > { %v7714_v0 = vpack.c.bf16 %v5714_v51, %v5713_v36  ;;  %v3554_v41 = vadd.f32 %v10611_v38, %v3553_v45  ;;  %v5507_v47 = vmax.f32 %v5081_v49, %v5083_v17  ;;  %v5635_v10 = vmax.f32 %v5337_v14, %v5339_v63 }
 0x273   : > { %v7874_v19 = vpack.c.bf16 %v5778_v24, %v5777_v42  ;;  %v4578_v57 = vadd.f32 %v10611_v38, %v4577_v40  ;;  %v8445_v32 = vpop.f32.mrf.mxu0  ;;  %v5084_v1 = vmax.f32 %v3562_v52, 0.0  ;;  %v8701_v37 = vpop.f32.mrf.mxu1  ;;  %v5340_v43 = vmax.f32 %v4586_v20, 0.0 }
 0x274   : > { %7959 = vst [vmem:[%s9403_s26 + $0x108] sm:$0xff] %v7714_v0   ;;  %v5082_v39 = vmax.f32 %v3554_v41, 0.0  ;;  %v3575_v27 = vadd.f32 %v10611_v38, %v8445_v32  ;;  %v4599_v60 = vadd.f32 %v10611_v38, %v8701_v37  ;;  %v5715_v53 = vmax.f32 %v10577_v30, %v5507_v47 }
 0x275   : > { %7991 = vst [vmem:[%s9403_s26 + $0x248] sm:$0xff] %v7874_v19   ;;  %v5338_v18 = vmax.f32 %v4578_v57, 0.0  ;;  %v3566_v22 = vpop.f32.mrf.mxu0  ;;  %v4590_v33 = vpop.f32.mrf.mxu1  ;;  %v5779_v8 = vmax.f32 %v10580_v48, %v5635_v10 }
 0x276   : > { %v5508_v55 = vmax.f32 %v5082_v39, %v5084_v1  ;;  %v3567_v61 = vadd.f32 %v10611_v38, %v3566_v22  ;;  %v4591_v31 = vadd.f32 %v10611_v38, %v4590_v33  ;;  %v5087_v29 = vmax.f32 %v3575_v27, 0.0 }
 0x277   : > { %v5636_v9 = vmax.f32 %v5338_v18, %v5340_v43  ;;  %v8446_v15 = vpop.f32.mrf.mxu0  ;;  %v8702_v36 = vpop.f32.mrf.mxu1  ;;  %v5343_v21 = vmax.f32 %v4599_v60, 0.0 }
 0x278   : > { %v5716_v23 = vmax.f32 %v10589_v11, %v5508_v55  ;;  %v5085_v34 = vmax.f32 %v3567_v61, 0.0  ;;  %v3578_v16 = vadd.f32 %v10611_v38, %v8446_v15  ;;  %v5341_v58 = vmax.f32 %v4591_v31, 0.0 }
 0x279   : > { %v5780_v42 = vmax.f32 %v10592_v35, %v5636_v9  ;;  %v4602_v30 = vadd.f32 %v10611_v38, %v8702_v36  ;;  %v3569_v48 = vpop.f32.mrf.mxu0  ;;  %v4593_v17 = vpop.f32.mrf.mxu1 }
 0x27a   : > { %v7719_v3 = vpack.c.bf16 %v5716_v23, %v5715_v53  ;;  %v3570_v51 = vadd.f32 %v10611_v38, %v3569_v48  ;;  %v5509_v11 = vmax.f32 %v5085_v34, %v5087_v29  ;;  %v5637_v52 = vmax.f32 %v5341_v58, %v5343_v21 }
 0x27b   : > { %v7879_v49 = vpack.c.bf16 %v5780_v42, %v5779_v8  ;;  %v4594_v4 = vadd.f32 %v10611_v38, %v4593_v17  ;;  %v8449_v24 = vpop.f32.mrf.mxu0  ;;  %v5088_v63 = vmax.f32 %v3578_v16, 0.0  ;;  %v8705_v20 = vpop.f32.mrf.mxu1  ;;  %v5344_v45 = vmax.f32 %v4602_v30, 0.0 }
 0x27c   : > { %7960 = vst [vmem:[%s9403_s26 + $0x110] sm:$0xff] %v7719_v3   ;;  %v5086_v14 = vmax.f32 %v3570_v51, 0.0  ;;  %v3591_v35 = vadd.f32 %v10611_v38, %v8449_v24  ;;  %v4615_v41 = vadd.f32 %v10611_v38, %v8705_v20  ;;  %v5717_v57 = vmax.f32 %v10601_v25, %v5509_v11 }
 0x27d   : > { %7992 = vst [vmem:[%s9403_s26 + $0x250] sm:$0xff] %v7879_v49   ;;  %v5342_v0 = vmax.f32 %v4594_v4, 0.0  ;;  %v3582_v40 = vpop.f32.mrf.mxu0  ;;  %v4606_v10 = vpop.f32.mrf.mxu1  ;;  %v5781_v32 = vmax.f32 %v10604_v62, %v5637_v52 }
 0x27e   : > { %v5510_v19 = vmax.f32 %v5086_v14, %v5088_v63  ;;  %v3583_v47 = vadd.f32 %v10611_v38, %v3582_v40  ;;  %v4607_v39 = vadd.f32 %v10611_v38, %v4606_v10  ;;  %v5091_v43 = vmax.f32 %v3591_v35, 0.0 }
 0x27f   : > { %v5638_v1 = vmax.f32 %v5342_v0, %v5344_v45  ;;  %v8450_v27 = vpop.f32.mrf.mxu0  ;;  %v8706_v22 = vpop.f32.mrf.mxu1  ;;  %v5347_v61 = vmax.f32 %v4615_v41, 0.0 }
 0x280   : > { %v5718_v37 = vmax.f32 %v10615_v46, %v5510_v19  ;;  %v5089_v18 = vmax.f32 %v3583_v47, 0.0  ;;  %v3594_v60 = vadd.f32 %v10611_v38, %v8450_v27  ;;  %v5345_v33 = vmax.f32 %v4607_v39, 0.0 }
 0x281   : > { %v5782_v55 = vmax.f32 %v10618_v56, %v5638_v1  ;;  %v4618_v25 = vadd.f32 %v10611_v38, %v8706_v22  ;;  %v3585_v62 = vpop.f32.mrf.mxu0  ;;  %v4609_v9 = vpop.f32.mrf.mxu1 }
 0x282   : > { %v7724_v53 = vpack.c.bf16 %v5718_v37, %v5717_v57  ;;  %v3586_v8 = vadd.f32 %v10611_v38, %v3585_v62  ;;  %v5511_v46 = vmax.f32 %v5089_v18, %v5091_v43  ;;  %v5639_v15 = vmax.f32 %v5345_v33, %v5347_v61 }
 0x283   : > { %v7884_v31 = vpack.c.bf16 %v5782_v55, %v5781_v32  ;;  %v4610_v23 = vadd.f32 %v10611_v38, %v4609_v9  ;;  %v8453_v29 = vpop.f32.mrf.mxu0  ;;  %v5092_v34 = vmax.f32 %v3594_v60, 0.0  ;;  %v8709_v36 = vpop.f32.mrf.mxu1  ;;  %v5348_v42 = vmax.f32 %v4618_v25, 0.0 }
 0x284   : > { %7961 = vst [vmem:[%s9403_s26 + $0x118] sm:$0xff] %v7724_v53   ;;  %v5090_v16 = vmax.f32 %v3586_v8, 0.0  ;;  %v3607_v56 = vadd.f32 %v10611_v38, %v8453_v29  ;;  %v4631_v58 = vadd.f32 %v10611_v38, %v8709_v36  ;;  %v5719_v17 = vmax.f32 %v10627_v7, %v5511_v46 }
 0x285   : > { %7993 = vst [vmem:[%s9403_s26 + $0x258] sm:$0xff] %v7884_v31   ;;  %v5346_v21 = vmax.f32 %v4610_v23, 0.0  ;;  %v3598_v30 = vpop.f32.mrf.mxu0  ;;  %v4622_v51 = vpop.f32.mrf.mxu1  ;;  %v5783_v49 = vmax.f32 %v10630_v13, %v5639_v15 }
 0x286   : > { %v5512_v48 = vmax.f32 %v5090_v16, %v5092_v34  ;;  %v3599_v3 = vadd.f32 %v10611_v38, %v3598_v30  ;;  %v4623_v52 = vadd.f32 %v10611_v38, %v4622_v51  ;;  %v5095_v63 = vmax.f32 %v3607_v56, 0.0 }
 0x287   : > { %v5640_v11 = vmax.f32 %v5346_v21, %v5348_v42  ;;  %v8454_v4 = vpop.f32.mrf.mxu0  ;;  %v8710_v20 = vpop.f32.mrf.mxu1  ;;  %v5351_v0 = vmax.f32 %v4631_v58, 0.0 }
 0x288   : > { %v5720_v24 = vmax.f32 %v10639_v59, %v5512_v48  ;;  %v5093_v14 = vmax.f32 %v3599_v3, 0.0  ;;  %v3610_v35 = vadd.f32 %v10611_v38, %v8454_v4  ;;  %v5349_v41 = vmax.f32 %v4623_v52, 0.0 }
 0x289   : > { %v5784_v45 = vmax.f32 %v10642_v26, %v5640_v11  ;;  %v4634_v7 = vadd.f32 %v10611_v38, %v8710_v20  ;;  %v3601_v13 = vpop.f32.mrf.mxu0  ;;  %v4625_v47 = vpop.f32.mrf.mxu1 }
 0x28a   : > { %v7729_v40 = vpack.c.bf16 %v5720_v24, %v5719_v17  ;;  %v3602_v19 = vadd.f32 %v10611_v38, %v3601_v13  ;;  %v5513_v59 = vmax.f32 %v5093_v14, %v5095_v63  ;;  %v5641_v57 = vmax.f32 %v5349_v41, %v5351_v0 }
 0x28b   : > { %v7889_v10 = vpack.c.bf16 %v5784_v45, %v5783_v49  ;;  %v4626_v32 = vadd.f32 %v10611_v38, %v4625_v47  ;;  %v8457_v1 = vpop.f32.mrf.mxu0  ;;  %v5096_v39 = vmax.f32 %v3610_v35, 0.0  ;;  %v8713_v37 = vpop.f32.mrf.mxu1  ;;  %v5352_v43 = vmax.f32 %v4634_v7, 0.0 }
 0x28c   : > { %7962 = vst [vmem:[%s9403_s26 + $0x120] sm:$0xff] %v7729_v40   ;;  %v5094_v27 = vmax.f32 %v3602_v19, 0.0  ;;  %v3623_v26 = vadd.f32 %v10611_v38, %v8457_v1  ;;  %v4647_v60 = vadd.f32 %v10611_v38, %v8713_v37  ;;  %v5721_v25 = vmax.f32 %v10649_v2, %v5513_v59 }
 0x28d   : > { %7994 = vst [vmem:[%s9403_s26 + $0x260] sm:$0xff] %v7889_v10   ;;  %v5350_v18 = vmax.f32 %v4626_v32, 0.0  ;;  %v3614_v22 = vpop.f32.mrf.mxu0  ;;  %v4638_v33 = vpop.f32.mrf.mxu1  ;;  %v5785_v62 = vmax.f32 %v10652_v44, %v5641_v57 }
 0x28e   : > { %v5514_v55 = vmax.f32 %v5094_v27, %v5096_v39  ;;  %v3615_v61 = vadd.f32 %v10611_v38, %v3614_v22  ;;  %v4639_v8 = vadd.f32 %v10611_v38, %v4638_v33  ;;  %v5099_v46 = vmax.f32 %v3623_v26, 0.0 }
 0x28f   : > { %v5642_v53 = vmax.f32 %v5350_v18, %v5352_v43  ;;  %v8458_v9 = vpop.f32.mrf.mxu0  ;;  %v8714_v29 = vpop.f32.mrf.mxu1  ;;  %v5355_v16 = vmax.f32 %v4647_v60, 0.0 }
 0x290   : > { %v5722_v31 = vmax.f32 %v10659_v12, %v5514_v55  ;;  %v5097_v15 = vmax.f32 %v3615_v61, 0.0  ;;  %v3626_v23 = vadd.f32 %v10611_v38, %v8458_v9  ;;  %v5353_v56 = vmax.f32 %v4639_v8, 0.0 }
 0x291   : > { %v5786_v34 = vmax.f32 %v10662_v5, %v5642_v53  ;;  %v4650_v2 = vadd.f32 %v10611_v38, %v8714_v29  ;;  %v3617_v44 = vpop.f32.mrf.mxu0  ;;  %v4641_v21 = vpop.f32.mrf.mxu1 }
 0x292   : > { %v7734_v36 = vpack.c.bf16 %v5722_v31, %v5721_v25  ;;  %v3618_v42 = vadd.f32 %v10611_v38, %v3617_v44  ;;  %v5515_v12 = vmax.f32 %v5097_v15, %v5099_v46  ;;  %v5643_v30 = vmax.f32 %v5353_v56, %v5355_v16 }
 0x293   : > { %v7894_v58 = vpack.c.bf16 %v5786_v34, %v5785_v62  ;;  %v4642_v48 = vadd.f32 %v10611_v38, %v4641_v21  ;;  %v8461_v3 = vpop.f32.mrf.mxu0  ;;  %v5100_v51 = vmax.f32 %v3626_v23, 0.0  ;;  %v8717_v49 = vpop.f32.mrf.mxu1  ;;  %v5356_v11 = vmax.f32 %v4650_v2, 0.0 }
 0x294   : > { %7963 = vst [vmem:[%s9403_s26 + $0x128] sm:$0xff] %v7734_v36   ;;  %v5098_v17 = vmax.f32 %v3618_v42, 0.0  ;;  %v3639_v5 = vadd.f32 %v10611_v38, %v8461_v3  ;;  %v4663_v4 = vadd.f32 %v10611_v38, %v8717_v49  ;;  %v5723_v20 = vmax.f32 %v10667_v28, %v5515_v12 }
 0x295   : > { %7995 = vst [vmem:[%s9403_s26 + $0x268] sm:$0xff] %v7894_v58   ;;  %v5354_v52 = vmax.f32 %v4642_v48, 0.0  ;;  %v3630_v24 = vpop.f32.mrf.mxu0  ;;  %v4654_v35 = vpop.f32.mrf.mxu1  ;;  %v5787_v45 = vmax.f32 %v10670_v6, %v5643_v30 }
 0x296   : > { %v5516_v63 = vmax.f32 %v5098_v17, %v5100_v51  ;;  %v3631_v14 = vadd.f32 %v10611_v38, %v3630_v24  ;;  %v4655_v41 = vadd.f32 %v10611_v38, %v4654_v35  ;;  %v5103_v40 = vmax.f32 %v3639_v5, 0.0 }
 0x297   : > { %v5644_v0 = vmax.f32 %v5354_v52, %v5356_v11  ;;  %v8462_v7 = vpop.f32.mrf.mxu0  ;;  %v8718_v10 = vpop.f32.mrf.mxu1  ;;  %v5359_v57 = vmax.f32 %v4663_v4, 0.0 }
 0x298   : > { %v5724_v13 = vmax.f32 %v10675_v50, %v5516_v63  ;;  %v5101_v19 = vmax.f32 %v3631_v14, 0.0  ;;  %v3642_v47 = vadd.f32 %v10611_v38, %v8462_v7  ;;  %v5357_v32 = vmax.f32 %v4655_v41, 0.0 }
 0x299   : > { %v5788_v59 = vmax.f32 %v10678_v54, %v5644_v0  ;;  %v4666_v28 = vadd.f32 %v10611_v38, %v8718_v10  ;;  %v3633_v6 = vpop.f32.mrf.mxu0  ;;  %v4657_v50 = vpop.f32.mrf.mxu1 }
 0x29a   : > { %v7739_v1 = vpack.c.bf16 %v5724_v13, %v5723_v20  ;;  %v10793_v39 = vmax.f32 %v5101_v19, %v5103_v40  ;;  %v3634_v27 = vadd.f32 %v10611_v38, %v3633_v6  ;;  %v10796_v37 = vmax.f32 %v5357_v32, %v5359_v57 }
 0x29b   : > { %v7899_v26 = vpack.c.bf16 %v5788_v59, %v5787_v45  ;;  %v4658_v43 = vadd.f32 %v10611_v38, %v4657_v50  ;;  %v8465_v18 = vpop.f32.mrf.mxu0  ;;  %v5104_v54 = vmax.f32 %v3642_v47, 0.0  ;;  %v8721_v55 = vpop.f32.mrf.mxu1  ;;  %v5360_v61 = vmax.f32 %v4666_v28, 0.0 }
 0x29c   : > { %7964 = vst [vmem:[%s9403_s26 + $0x130] sm:$0xff] %v7739_v1   ;;  %v5102_v60 = vmax.f32 %v3634_v27, 0.0  ;;  %v3655_v22 = vadd.f32 %v10611_v38, %v8465_v18  ;;  %v4679_v25 = vadd.f32 %v10611_v38, %v8721_v55 }
 0x29d   : > { %7996 = vst [vmem:[%s9403_s26 + $0x270] sm:$0xff] %v7899_v26   ;;  %v5358_v33 = vmax.f32 %v4658_v43, 0.0  ;;  %v3646_v62 = vpop.f32.mrf.mxu0  ;;  %v4670_v9 = vpop.f32.mrf.mxu1 }
 0x29e   : > { %v10803_v53 = vmax.f32 %v5102_v60, %v5104_v54  ;;  %v3647_v8 = vadd.f32 %v10611_v38, %v3646_v62  ;;  %v4671_v46 = vadd.f32 %v10611_v38, %v4670_v9  ;;  %v5107_v23 = vmax.f32 %v3655_v22, 0.0 }
 0x29f   : > { %v10806_v31 = vmax.f32 %v5358_v33, %v5360_v61  ;;  %v8466_v15 = vpop.f32.mrf.mxu0  ;;  %v8722_v16 = vpop.f32.mrf.mxu1  ;;  %v5363_v56 = vmax.f32 %v4679_v25, 0.0 }
 0x2a0   : > { %v5105_v29 = vmax.f32 %v3647_v8, 0.0  ;;  %v3658_v34 = vadd.f32 %v10611_v38, %v8466_v15  ;;  %v5361_v2 = vmax.f32 %v4671_v46, 0.0  ;;  %v4682_v44 = vadd.f32 %v10611_v38, %v8722_v16 }
 0x2a1   : > { %v3649_v36 = vpop.f32.mrf.mxu0  ;;  %v4673_v58 = vpop.f32.mrf.mxu1 }
 0x2a2   : > { %v10811_v42 = vmax.f32 %v5105_v29, %v5107_v23  ;;  %v3650_v21 = vadd.f32 %v10611_v38, %v3649_v36  ;;  %v10814_v12 = vmax.f32 %v5361_v2, %v5363_v56  ;;  %v4674_v30 = vadd.f32 %v10611_v38, %v4673_v58 }
 0x2a3   : > { %v8469_v48 = vpop.f32.mrf.mxu0  ;;  %v5108_v3 = vmax.f32 %v3658_v34, 0.0  ;;  %v8725_v5 = vpop.f32.mrf.mxu1  ;;  %v5364_v49 = vmax.f32 %v4682_v44, 0.0 }
 0x2a4   : > { %v5106_v51 = vmax.f32 %v3650_v21, 0.0  ;;  %v3671_v17 = vadd.f32 %v10611_v38, %v8469_v48  ;;  %v5362_v11 = vmax.f32 %v4674_v30, 0.0  ;;  %v4695_v52 = vadd.f32 %v10611_v38, %v8725_v5 }
 0x2a5   : > { %v3662_v4 = vpop.f32.mrf.mxu0  ;;  %v4686_v14 = vpop.f32.mrf.mxu1 }
 0x2a6   : > { %v10819_v24 = vmax.f32 %v5106_v51, %v5108_v3  ;;  %v3663_v63 = vadd.f32 %v10611_v38, %v3662_v4  ;;  %v10822_v35 = vmax.f32 %v5362_v11, %v5364_v49  ;;  %v4687_v20 = vadd.f32 %v10611_v38, %v4686_v14 }
 0x2a7   : > { %v8470_v45 = vpop.f32.mrf.mxu0  ;;  %v5111_v0 = vmax.f32 %v3671_v17, 0.0  ;;  %v8726_v13 = vpop.f32.mrf.mxu1  ;;  %v5367_v40 = vmax.f32 %v4695_v52, 0.0 }
 0x2a8   : > { %v5109_v41 = vmax.f32 %v3663_v63, 0.0  ;;  %v3674_v7 = vadd.f32 %v10611_v38, %v8470_v45  ;;  %v5365_v19 = vmax.f32 %v4687_v20, 0.0  ;;  %v4698_v47 = vadd.f32 %v10611_v38, %v8726_v13 }
 0x2a9   : > { %v3665_v10 = vpop.f32.mrf.mxu0  ;;  %v4689_v32 = vpop.f32.mrf.mxu1 }
 0x2aa   : > { %v10827_v59 = vmax.f32 %v5109_v41, %v5111_v0  ;;  %v3666_v57 = vadd.f32 %v10611_v38, %v3665_v10  ;;  %v10830_v28 = vmax.f32 %v5365_v19, %v5367_v40  ;;  %v4690_v6 = vadd.f32 %v10611_v38, %v4689_v32 }
 0x2ab   : > { %v8473_v1 = vpop.f32.mrf.mxu0  ;;  %v5112_v27 = vmax.f32 %v3674_v7, 0.0  ;;  %v8729_v43 = vpop.f32.mrf.mxu1  ;;  %v5368_v18 = vmax.f32 %v4698_v47, 0.0 }
 0x2ac   : > { %v5110_v50 = vmax.f32 %v3666_v57, 0.0  ;;  %v3687_v26 = vadd.f32 %v10611_v38, %v8473_v1  ;;  %v5366_v54 = vmax.f32 %v4690_v6, 0.0  ;;  %v4711_v60 = vadd.f32 %v10611_v38, %v8729_v43  ;;  %v10861_v6 = vld [vmem:[#allocation7] ss:$0 sm:$0xff] }
 0x2ad   : > { %v3678_v22 = vpop.f32.mrf.mxu0  ;;  %v4702_v33 = vpop.f32.mrf.mxu1 }
 0x2ae   : > { %v10835_v55 = vmax.f32 %v5110_v50, %v5112_v27  ;;  %v3679_v61 = vadd.f32 %v10611_v38, %v3678_v22  ;;  %v10838_v25 = vmax.f32 %v5366_v54, %v5368_v18  ;;  %v4703_v62 = vadd.f32 %v10611_v38, %v4702_v33 }
 0x2af   : > { %v8474_v8 = vpop.f32.mrf.mxu0  ;;  %v5115_v9 = vmax.f32 %v3687_v26, 0.0  ;;  %v8730_v23 = vpop.f32.mrf.mxu1  ;;  %v5371_v29 = vmax.f32 %v4711_v60, 0.0 }
 0x2b0   : > { %v5113_v46 = vmax.f32 %v3679_v61, 0.0  ;;  %v3690_v15 = vadd.f32 %v10611_v38, %v8474_v8  ;;  %v5369_v34 = vmax.f32 %v4703_v62, 0.0  ;;  %v4714_v16 = vadd.f32 %v10611_v38, %v8730_v23 }
 0x2b1   : > { %v3681_v56 = vpop.f32.mrf.mxu0  ;;  %v4705_v36 = vpop.f32.mrf.mxu1 }
 0x2b2   : > { %v10843_v2 = vmax.f32 %v5113_v46, %v5115_v9  ;;  %v3682_v44 = vadd.f32 %v10611_v38, %v3681_v56  ;;  %v10846_v21 = vmax.f32 %v5369_v34, %v5371_v29  ;;  %v4706_v58 = vadd.f32 %v10611_v38, %v4705_v36 }
 0x2b3   : > { %v8477_v30 = vpop.f32.mrf.mxu0  ;;  %v5116_v48 = vmax.f32 %v3690_v15, 0.0  ;;  %v8733_v17 = vpop.f32.mrf.mxu1  ;;  %v5372_v5 = vmax.f32 %v4714_v16, 0.0 }
 0x2b4   : > { %v5114_v3 = vmax.f32 %v3682_v44, 0.0  ;;  %v3703_v51 = vadd.f32 %v10611_v38, %v8477_v30  ;;  %v5370_v49 = vmax.f32 %v4706_v58, 0.0  ;;  %v4727_v11 = vadd.f32 %v10611_v38, %v8733_v17 }
 0x2b5   : > { %v3694_v52 = vpop.f32.mrf.mxu0  ;;  %v4718_v14 = vpop.f32.mrf.mxu1 }
 0x2b6   : > { %v10851_v4 = vmax.f32 %v5114_v3, %v5116_v48  ;;  %v3695_v63 = vadd.f32 %v10611_v38, %v3694_v52  ;;  %v10854_v20 = vmax.f32 %v5370_v49, %v5372_v5  ;;  %v4719_v45 = vadd.f32 %v10611_v38, %v4718_v14 }
 0x2b7   : > { %v8478_v0 = vpop.f32.mrf.mxu0  ;;  %v5119_v41 = vmax.f32 %v3703_v51, 0.0  ;;  %v8734_v40 = vpop.f32.mrf.mxu1  ;;  %v5375_v19 = vmax.f32 %v4727_v11, 0.0 }
 0x2b8   : > { %v5117_v7 = vmax.f32 %v3695_v63, 0.0  ;;  %v3706_v13 = vadd.f32 %v10611_v38, %v8478_v0  ;;  %v5373_v47 = vmax.f32 %v4719_v45, 0.0  ;;  %v4730_v10 = vadd.f32 %v10611_v38, %v8734_v40 }
 0x2b9   : > { %v3697_v57 = vpop.f32.mrf.mxu0  ;;  %v4721_v27 = vpop.f32.mrf.mxu1 }
 0x2ba   : > { %v10859_v32 = vmax.f32 %v5117_v7, %v5119_v41  ;;  %v3698_v1 = vadd.f32 %v10861_v6, %v3697_v57  ;;  %v10864_v50 = vmax.f32 %v5373_v47, %v5375_v19  ;;  %v4722_v26 = vadd.f32 %v10861_v6, %v4721_v27 }
 0x2bb   : > { %v8481_v43 = vpop.f32.mrf.mxu0  ;;  %v5120_v18 = vmax.f32 %v3706_v13, 0.0  ;;  %v8737_v22 = vpop.f32.mrf.mxu1  ;;  %v5376_v61 = vmax.f32 %v4730_v10, 0.0 }
 0x2bc   : > { %v5118_v54 = vmax.f32 %v3698_v1, 0.0  ;;  %v3719_v60 = vadd.f32 %v10861_v6, %v8481_v43  ;;  %v5374_v38 = vmax.f32 %v4722_v26, 0.0  ;;  %v4743_v33 = vadd.f32 %v10861_v6, %v8737_v22 }
 0x2bd   : > { %v3710_v62 = vpop.f32.mrf.mxu0  ;;  %v4734_v46 = vpop.f32.mrf.mxu1 }
 0x2be   : > { %v10869_v8 = vmax.f32 %v5118_v54, %v5120_v18  ;;  %v3711_v9 = vadd.f32 %v10861_v6, %v3710_v62  ;;  %v10872_v15 = vmax.f32 %v5374_v38, %v5376_v61  ;;  %v4735_v23 = vadd.f32 %v10861_v6, %v4734_v46 }
 0x2bf   : > { %v8482_v29 = vpop.f32.mrf.mxu0  ;;  %v5123_v34 = vmax.f32 %v3719_v60, 0.0  ;;  %v8738_v44 = vpop.f32.mrf.mxu1  ;;  %v5379_v36 = vmax.f32 %v4743_v33, 0.0 }
 0x2c0   : > { %v5121_v16 = vmax.f32 %v3711_v9, 0.0  ;;  %v3722_v56 = vadd.f32 %v10861_v6, %v8482_v29  ;;  %v5377_v58 = vmax.f32 %v4735_v23, 0.0  ;;  %v4746_v30 = vadd.f32 %v10861_v6, %v8738_v44 }
 0x2c1   : > { %v3713_v48 = vpop.f32.mrf.mxu0  ;;  %v4737_v17 = vpop.f32.mrf.mxu1 }
 0x2c2   : > { %v10877_v3 = vmax.f32 %v5121_v16, %v5123_v34  ;;  %v3714_v51 = vadd.f32 %v10861_v6, %v3713_v48  ;;  %v10880_v5 = vmax.f32 %v5377_v58, %v5379_v36  ;;  %v4738_v49 = vadd.f32 %v10861_v6, %v4737_v17 }
 0x2c3   : > { %v8485_v11 = vpop.f32.mrf.mxu0  ;;  %v5124_v52 = vmax.f32 %v3722_v56, 0.0  ;;  %v8741_v45 = vpop.f32.mrf.mxu1  ;;  %v5380_v0 = vmax.f32 %v4746_v30, 0.0 }
 0x2c4   : > { %v5122_v63 = vmax.f32 %v3714_v51, 0.0  ;;  %v3735_v14 = vadd.f32 %v10861_v6, %v8485_v11  ;;  %v5378_v41 = vmax.f32 %v4738_v49, 0.0  ;;  %v4759_v7 = vadd.f32 %v10861_v6, %v8741_v45 }
 0x2c5   : > { %v3726_v13 = vpop.f32.mrf.mxu0  ;;  %v4750_v47 = vpop.f32.mrf.mxu1 }
 0x2c6   : > { %v10885_v40 = vmax.f32 %v5122_v63, %v5124_v52  ;;  %v3727_v19 = vadd.f32 %v10861_v6, %v3726_v13  ;;  %v10888_v10 = vmax.f32 %v5378_v41, %v5380_v0  ;;  %v4751_v57 = vadd.f32 %v10861_v6, %v4750_v47 }
 0x2c7   : > { %v8486_v1 = vpop.f32.mrf.mxu0  ;;  %v5127_v27 = vmax.f32 %v3735_v14, 0.0  ;;  %v8742_v18 = vpop.f32.mrf.mxu1  ;;  %v5383_v54 = vmax.f32 %v4759_v7, 0.0 }
 0x2c8   : > { %v5125_v26 = vmax.f32 %v3727_v19, 0.0  ;;  %v3738_v43 = vadd.f32 %v10861_v6, %v8486_v1  ;;  %v5381_v60 = vmax.f32 %v4751_v57, 0.0  ;;  %v4762_v22 = vadd.f32 %v10861_v6, %v8742_v18 }
 0x2c9   : > { %v3729_v61 = vpop.f32.mrf.mxu0  ;;  %v4753_v62 = vpop.f32.mrf.mxu1 }
 0x2ca   : > { %v10893_v38 = vmax.f32 %v5125_v26, %v5127_v27  ;;  %v3730_v33 = vadd.f32 %v10861_v6, %v3729_v61  ;;  %v10896_v9 = vmax.f32 %v5381_v60, %v5383_v54  ;;  %v4754_v46 = vadd.f32 %v10861_v6, %v4753_v62 }
 0x2cb   : > { %v8489_v23 = vpop.f32.mrf.mxu0  ;;  %v5128_v29 = vmax.f32 %v3738_v43, 0.0  ;;  %v8745_v56 = vpop.f32.mrf.mxu1  ;;  %v5384_v44 = vmax.f32 %v4762_v22, 0.0 }
 0x2cc   : > { %v5126_v34 = vmax.f32 %v3730_v33, 0.0  ;;  %v3751_v16 = vadd.f32 %v10861_v6, %v8489_v23  ;;  %v5382_v36 = vmax.f32 %v4754_v46, 0.0  ;;  %v4775_v58 = vadd.f32 %v10861_v6, %v8745_v56 }
 0x2cd   : > { %v3742_v30 = vpop.f32.mrf.mxu0  ;;  %v4766_v17 = vpop.f32.mrf.mxu1 }
 0x2ce   : > { %v10901_v48 = vmax.f32 %v5126_v34, %v5128_v29  ;;  %v3743_v51 = vadd.f32 %v10861_v6, %v3742_v30  ;;  %v10904_v49 = vmax.f32 %v5382_v36, %v5384_v44  ;;  %v4767_v11 = vadd.f32 %v10861_v6, %v4766_v17 }
 0x2cf   : > { %v8490_v52 = vpop.f32.mrf.mxu0  ;;  %v5131_v63 = vmax.f32 %v3751_v16, 0.0  ;;  %v8746_v0 = vpop.f32.mrf.mxu1  ;;  %v5387_v41 = vmax.f32 %v4775_v58, 0.0 }
 0x2d0   : > { %v5129_v14 = vmax.f32 %v3743_v51, 0.0  ;;  %v3754_v45 = vadd.f32 %v10861_v6, %v8490_v52  ;;  %v5385_v7 = vmax.f32 %v4767_v11, 0.0  ;;  %v4778_v13 = vadd.f32 %v10861_v6, %v8746_v0 }
 0x2d1   : > { %v3745_v19 = vpop.f32.mrf.mxu0  ;;  %v4769_v1 = vpop.f32.mrf.mxu1 }
 0x2d2   : > { %v10909_v47 = vmax.f32 %v5129_v14, %v5131_v63  ;;  %v3746_v57 = vadd.f32 %v10861_v6, %v3745_v19  ;;  %v10912_v27 = vmax.f32 %v5385_v7, %v5387_v41  ;;  %v4770_v26 = vadd.f32 %v10861_v6, %v4769_v1 }
 0x2d3   : > { %v8493_v43 = vpop.f32.mrf.mxu0  ;;  %v5132_v18 = vmax.f32 %v3754_v45, 0.0  ;;  %v8749_v60 = vpop.f32.mrf.mxu1  ;;  %v5388_v22 = vmax.f32 %v4778_v13, 0.0 }
 0x2d4   : > { %v5130_v54 = vmax.f32 %v3746_v57, 0.0  ;;  %v5386_v61 = vmax.f32 %v4770_v26, 0.0  ;;  %v3767_v46 = vadd.f32 %v10861_v6, %v8493_v43  ;;  %v4791_v16 = vadd.f32 %v10861_v6, %v8749_v60 }
 0x2d5   : > { %v3758_v33 = vpop.f32.mrf.mxu0  ;;  %v4782_v29 = vpop.f32.mrf.mxu1 }
 0x2d6   : > { %v10915_v62 = vmax.f32 %v5130_v54, %v5132_v18  ;;  %v3759_v23 = vadd.f32 %v10861_v6, %v3758_v33  ;;  %v10919_v34 = vmax.f32 %v5386_v61, %v5388_v22  ;;  %v4783_v56 = vadd.f32 %v10861_v6, %v4782_v29 }
 0x2d7   : > { %v8494_v44 = vpop.f32.mrf.mxu0  ;;  %v8750_v30 = vpop.f32.mrf.mxu1  ;;  %v5135_v52 = vmax.f32 %v3767_v46, 0.0  ;;  %v5391_v45 = vmax.f32 %v4791_v16, 0.0 }
 0x2d8   : > { %v5133_v36 = vmax.f32 %v3759_v23, 0.0  ;;  %v3770_v58 = vadd.f32 %v10861_v6, %v8494_v44  ;;  %v5389_v51 = vmax.f32 %v4783_v56, 0.0  ;;  %v4794_v17 = vadd.f32 %v10861_v6, %v8750_v30 }
 0x2d9   : > { %v3761_v11 = vpop.f32.mrf.mxu0  ;;  %v4785_v14 = vpop.f32.mrf.mxu1 }
 0x2da   : > { %v3762_v63 = vadd.f32 %v10861_v6, %v3761_v11  ;;  %v4786_v0 = vadd.f32 %v10861_v6, %v4785_v14  ;;  %v5533_v7 = vmax.f32 %v5133_v36, %v5135_v52  ;;  %v5136_v13 = vmax.f32 %v3770_v58, 0.0 }
 0x2db   : > { %v8497_v41 = vpop.f32.mrf.mxu0  ;;  %v8753_v57 = vpop.f32.mrf.mxu1  ;;  %v5661_v1 = vmax.f32 %v5389_v51, %v5391_v45  ;;  %v5392_v26 = vmax.f32 %v4794_v17, 0.0 }
 0x2dc   : > { %v5134_v19 = vmax.f32 %v3762_v63, 0.0  ;;  %v5390_v43 = vmax.f32 %v4786_v0, 0.0  ;;  %v3783_v60 = vadd.f32 %v10861_v6, %v8497_v41  ;;  %v4807_v46 = vadd.f32 %v10861_v6, %v8753_v57 }
 0x2dd   : > { %v3774_v18 = vpop.f32.mrf.mxu0  ;;  %v4798_v61 = vpop.f32.mrf.mxu1  ;;  %v5725_v16 = vmax.f32 %v10793_v39, %v5533_v7  ;;  %v5789_v30 = vmax.f32 %v10796_v37, %v5661_v1 }
 0x2de   : > { %v5534_v54 = vmax.f32 %v5134_v19, %v5136_v13  ;;  %v3775_v22 = vadd.f32 %v10861_v6, %v3774_v18  ;;  %v5662_v33 = vmax.f32 %v5390_v43, %v5392_v26  ;;  %v4799_v23 = vadd.f32 %v10861_v6, %v4798_v61 }
 0x2df   : > { %v8498_v29 = vpop.f32.mrf.mxu0  ;;  %v8754_v58 = vpop.f32.mrf.mxu1  ;;  %v5139_v14 = vmax.f32 %v3783_v60, 0.0  ;;  %v5395_v0 = vmax.f32 %v4807_v46, 0.0 }
 0x2e0   : > { %v5726_v56 = vmax.f32 %v10803_v53, %v5534_v54  ;;  %v5137_v44 = vmax.f32 %v3775_v22, 0.0  ;;  %v3786_v36 = vadd.f32 %v10861_v6, %v8498_v29  ;;  %v5790_v51 = vmax.f32 %v10806_v31, %v5662_v33 }
 0x2e1   : > { %v5393_v17 = vmax.f32 %v4799_v23, 0.0  ;;  %v4810_v11 = vadd.f32 %v10861_v6, %v8754_v58  ;;  %v3777_v52 = vpop.f32.mrf.mxu0  ;;  %v4801_v45 = vpop.f32.mrf.mxu1 }
 0x2e2   : > { %v7744_v63 = vpack.c.bf16 %v5726_v56, %v5725_v16  ;;  %v3778_v39 = vadd.f32 %v10861_v6, %v3777_v52  ;;  %v7904_v53 = vpack.c.bf16 %v5790_v51, %v5789_v30  ;;  %v4802_v41 = vadd.f32 %v10861_v6, %v4801_v45 }
 0x2e3   : > { %v8501_v7 = vpop.f32.mrf.mxu0  ;;  %v5535_v13 = vmax.f32 %v5137_v44, %v5139_v14  ;;  %v5140_v37 = vmax.f32 %v3786_v36, 0.0  ;;  %v8757_v31 = vpop.f32.mrf.mxu1  ;;  %v5663_v57 = vmax.f32 %v5393_v17, %v5395_v0  ;;  %v5396_v1 = vmax.f32 %v4810_v11, 0.0 }
 0x2e4   : > { %7965 = vst [vmem:[%s9403_s26 + $0x148] sm:$0xff] %v7744_v63   ;;  %v5138_v19 = vmax.f32 %v3778_v39, 0.0  ;;  %7997 = vst [vmem:[%s9403_s26 + $0x288] sm:$0xff] %v7904_v53   ;;  %v5394_v26 = vmax.f32 %v4802_v41, 0.0  ;;  %v3799_v54 = vadd.f32 %v10861_v6, %v8501_v7  ;;  %v4823_v33 = vadd.f32 %v10861_v6, %v8757_v31 }
 0x2e5   : > { %v3790_v43 = vpop.f32.mrf.mxu0  ;;  %v4814_v22 = vpop.f32.mrf.mxu1  ;;  %v5727_v29 = vmax.f32 %v10811_v42, %v5535_v13  ;;  %v5791_v58 = vmax.f32 %v10814_v12, %v5663_v57 }
 0x2e6   : > { %v5536_v18 = vmax.f32 %v5138_v19, %v5140_v37  ;;  %v3791_v60 = vadd.f32 %v10861_v6, %v3790_v43  ;;  %v5664_v61 = vmax.f32 %v5394_v26, %v5396_v1  ;;  %v4815_v46 = vadd.f32 %v10861_v6, %v4814_v22 }
 0x2e7   : > { %v8502_v23 = vpop.f32.mrf.mxu0  ;;  %v8758_v36 = vpop.f32.mrf.mxu1  ;;  %v5143_v63 = vmax.f32 %v3799_v54, 0.0  ;;  %v5399_v39 = vmax.f32 %v4823_v33, 0.0 }
 0x2e8   : > { %v5728_v16 = vmax.f32 %v10819_v24, %v5536_v18  ;;  %v5141_v56 = vmax.f32 %v3791_v60, 0.0  ;;  %v3802_v44 = vadd.f32 %v10861_v6, %v8502_v23  ;;  %v5792_v30 = vmax.f32 %v10822_v35, %v5664_v61 }
 0x2e9   : > { %v5397_v51 = vmax.f32 %v4815_v46, 0.0  ;;  %v4826_v17 = vadd.f32 %v10861_v6, %v8758_v36  ;;  %v3793_v11 = vpop.f32.mrf.mxu0  ;;  %v4817_v14 = vpop.f32.mrf.mxu1 }
 0x2ea   : > { %v7749_v52 = vpack.c.bf16 %v5728_v16, %v5727_v29  ;;  %v3794_v42 = vadd.f32 %v10861_v6, %v3793_v11  ;;  %v7909_v24 = vpack.c.bf16 %v5792_v30, %v5791_v58  ;;  %v4818_v45 = vadd.f32 %v10861_v6, %v4817_v14 }
 0x2eb   : > { %v8505_v53 = vpop.f32.mrf.mxu0  ;;  %v5537_v0 = vmax.f32 %v5141_v56, %v5143_v63  ;;  %v5144_v12 = vmax.f32 %v3802_v44, 0.0  ;;  %v8761_v35 = vpop.f32.mrf.mxu1  ;;  %v5665_v7 = vmax.f32 %v5397_v51, %v5399_v39  ;;  %v5400_v13 = vmax.f32 %v4826_v17, 0.0 }
 0x2ec   : > { %7966 = vst [vmem:[%s9403_s26 + $0x150] sm:$0xff] %v7749_v52   ;;  %v5142_v41 = vmax.f32 %v3794_v42, 0.0  ;;  %7998 = vst [vmem:[%s9403_s26 + $0x290] sm:$0xff] %v7909_v24   ;;  %v5398_v37 = vmax.f32 %v4818_v45, 0.0  ;;  %v3815_v57 = vadd.f32 %v10861_v6, %v8505_v53  ;;  %v4839_v18 = vadd.f32 %v10861_v6, %v8761_v35 }
 0x2ed   : > { %v3806_v19 = vpop.f32.mrf.mxu0  ;;  %v4830_v26 = vpop.f32.mrf.mxu1  ;;  %v5729_v22 = vmax.f32 %v10827_v59, %v5537_v0  ;;  %v5793_v29 = vmax.f32 %v10830_v28, %v5665_v7 }
 0x2ee   : > { %v5538_v31 = vmax.f32 %v5142_v41, %v5144_v12  ;;  %v3807_v1 = vadd.f32 %v10861_v6, %v3806_v19  ;;  %v5666_v43 = vmax.f32 %v5398_v37, %v5400_v13  ;;  %v4831_v54 = vadd.f32 %v10861_v6, %v4830_v26 }
 0x2ef   : > { %v8506_v60 = vpop.f32.mrf.mxu0  ;;  %v8762_v23 = vpop.f32.mrf.mxu1  ;;  %v5147_v30 = vmax.f32 %v3815_v57, 0.0  ;;  %v5403_v17 = vmax.f32 %v4839_v18, 0.0 }
 0x2f0   : > { %v5730_v61 = vmax.f32 %v10835_v55, %v5538_v31  ;;  %v5145_v33 = vmax.f32 %v3807_v1, 0.0  ;;  %v3818_v46 = vadd.f32 %v10861_v6, %v8506_v60  ;;  %v5794_v16 = vmax.f32 %v10838_v25, %v5666_v43 }
 0x2f1   : > { %v5401_v56 = vmax.f32 %v4831_v54, 0.0  ;;  %v4842_v44 = vadd.f32 %v10861_v6, %v8762_v23  ;;  %v3809_v36 = vpop.f32.mrf.mxu0  ;;  %v4833_v51 = vpop.f32.mrf.mxu1 }
 0x2f2   : > { %v7754_v58 = vpack.c.bf16 %v5730_v61, %v5729_v22  ;;  %v3810_v59 = vadd.f32 %v10861_v6, %v3809_v36  ;;  %v7914_v55 = vpack.c.bf16 %v5794_v16, %v5793_v29  ;;  %v4834_v11 = vadd.f32 %v10861_v6, %v4833_v51 }
 0x2f3   : > { %v8509_v52 = vpop.f32.mrf.mxu0  ;;  %v5539_v63 = vmax.f32 %v5145_v33, %v5147_v30  ;;  %v5148_v28 = vmax.f32 %v3818_v46, 0.0  ;;  %v8765_v25 = vpop.f32.mrf.mxu1  ;;  %v5667_v14 = vmax.f32 %v5401_v56, %v5403_v17  ;;  %v5404_v24 = vmax.f32 %v4842_v44, 0.0 }
 0x2f4   : > { %7967 = vst [vmem:[%s9403_s26 + $0x158] sm:$0xff] %v7754_v58   ;;  %v5146_v42 = vmax.f32 %v3810_v59, 0.0  ;;  %7999 = vst [vmem:[%s9403_s26 + $0x298] sm:$0xff] %v7914_v55   ;;  %v5402_v39 = vmax.f32 %v4834_v11, 0.0  ;;  %v3831_v0 = vadd.f32 %v10861_v6, %v8509_v52  ;;  %v4855_v7 = vadd.f32 %v10861_v6, %v8765_v25 }
 0x2f5   : > { %v3822_v45 = vpop.f32.mrf.mxu0  ;;  %v4846_v41 = vpop.f32.mrf.mxu1  ;;  %v5731_v19 = vmax.f32 %v10843_v2, %v5539_v63  ;;  %v5795_v43 = vmax.f32 %v10846_v21, %v5667_v14 }
 0x2f6   : > { %v5540_v53 = vmax.f32 %v5146_v42, %v5148_v28  ;;  %v3823_v12 = vadd.f32 %v10861_v6, %v3822_v45  ;;  %v5668_v35 = vmax.f32 %v5402_v39, %v5404_v24  ;;  %v4847_v13 = vadd.f32 %v10861_v6, %v4846_v41 }
 0x2f7   : > { %v8510_v37 = vpop.f32.mrf.mxu0  ;;  %v8766_v26 = vpop.f32.mrf.mxu1  ;;  %v5151_v33 = vmax.f32 %v3831_v0, 0.0  ;;  %v5407_v23 = vmax.f32 %v4855_v7, 0.0 }
 0x2f8   : > { %v5732_v31 = vmax.f32 %v10851_v4, %v5540_v53  ;;  %v5149_v57 = vmax.f32 %v3823_v12, 0.0  ;;  %v3834_v1 = vadd.f32 %v10861_v6, %v8510_v37  ;;  %v5796_v18 = vmax.f32 %v10854_v20, %v5668_v35 }
 0x2f9   : > { %v5405_v54 = vmax.f32 %v4847_v13, 0.0  ;;  %v4858_v60 = vadd.f32 %v10861_v6, %v8766_v26  ;;  %v3825_v22 = vpop.f32.mrf.mxu0  ;;  %v4849_v46 = vpop.f32.mrf.mxu1 }
 0x2fa   : > { %v7759_v61 = vpack.c.bf16 %v5732_v31, %v5731_v19  ;;  %v3826_v2 = vadd.f32 %v10861_v6, %v3825_v22  ;;  %v7919_v4 = vpack.c.bf16 %v5796_v18, %v5795_v43  ;;  %v4850_v29 = vadd.f32 %v10861_v6, %v4849_v46 }
 0x2fb   : > { %v8513_v16 = vpop.f32.mrf.mxu0  ;;  %v5541_v56 = vmax.f32 %v5149_v57, %v5151_v33  ;;  %v5152_v21 = vmax.f32 %v3834_v1, 0.0  ;;  %v8769_v20 = vpop.f32.mrf.mxu1  ;;  %v5669_v36 = vmax.f32 %v5405_v54, %v5407_v23  ;;  %v5408_v58 = vmax.f32 %v4858_v60, 0.0 }
 0x2fc   : > { %7968 = vst [vmem:[%s9403_s26 + $0x160] sm:$0xff] %v7759_v61   ;;  %v5150_v44 = vmax.f32 %v3826_v2, 0.0  ;;  %8000 = vst [vmem:[%s9403_s26 + $0x2a0] sm:$0xff] %v7919_v4   ;;  %v5406_v30 = vmax.f32 %v4850_v29, 0.0  ;;  %v3847_v55 = vadd.f32 %v10861_v6, %v8513_v16  ;;  %v4871_v63 = vadd.f32 %v10861_v6, %v8769_v20 }
 0x2fd   : > { %v3838_v59 = vpop.f32.mrf.mxu0  ;;  %v4862_v11 = vpop.f32.mrf.mxu1  ;;  %v5733_v25 = vmax.f32 %v10859_v32, %v5541_v56  ;;  %v5797_v53 = vmax.f32 %v10864_v50, %v5669_v36 }
 0x2fe   : > { %v5542_v51 = vmax.f32 %v5150_v44, %v5152_v21  ;;  %v3839_v17 = vadd.f32 %v10861_v6, %v3838_v59  ;;  %v5670_v52 = vmax.f32 %v5406_v30, %v5408_v58  ;;  %v4863_v28 = vadd.f32 %v10861_v6, %v4862_v11 }
 0x2ff   : > { %v8514_v42 = vpop.f32.mrf.mxu0  ;;  %v8770_v45 = vpop.f32.mrf.mxu1  ;;  %v5155_v13 = vmax.f32 %v3847_v55, 0.0  ;;  %v5411_v19 = vmax.f32 %v4871_v63, 0.0 }
 0x300   : > { %v5734_v14 = vmax.f32 %v10869_v8, %v5542_v51  ;;  %v5153_v24 = vmax.f32 %v3839_v17, 0.0  ;;  %v3850_v39 = vadd.f32 %v10861_v6, %v8514_v42  ;;  %v5798_v0 = vmax.f32 %v10872_v15, %v5670_v52 }
 0x301   : > { %v5409_v12 = vmax.f32 %v4863_v28, 0.0  ;;  %v4874_v41 = vadd.f32 %v10861_v6, %v8770_v45  ;;  %v3841_v35 = vpop.f32.mrf.mxu0  ;;  %v4865_v37 = vpop.f32.mrf.mxu1 }
 0x302   : > { %v7764_v7 = vpack.c.bf16 %v5734_v14, %v5733_v25  ;;  %v3842_v32 = vadd.f32 %v10861_v6, %v3841_v35  ;;  %v7924_v8 = vpack.c.bf16 %v5798_v0, %v5797_v53  ;;  %v4866_v31 = vadd.f32 %v10861_v6, %v4865_v37 }
 0x303   : > { %v8517_v57 = vpop.f32.mrf.mxu0  ;;  %v5543_v1 = vmax.f32 %v5153_v24, %v5155_v13  ;;  %v5156_v50 = vmax.f32 %v3850_v39, 0.0  ;;  %v8773_v15 = vpop.f32.mrf.mxu1  ;;  %v5671_v43 = vmax.f32 %v5409_v12, %v5411_v19  ;;  %v5412_v18 = vmax.f32 %v4874_v41, 0.0 }
 0x304   : > { %7969 = vst [vmem:[%s9403_s26 + $0x168] sm:$0xff] %v7764_v7   ;;  %v5154_v26 = vmax.f32 %v3842_v32, 0.0  ;;  %8001 = vst [vmem:[%s9403_s26 + $0x2a8] sm:$0xff] %v7924_v8   ;;  %v5410_v54 = vmax.f32 %v4866_v31, 0.0  ;;  %v3863_v61 = vadd.f32 %v10861_v6, %v8517_v57  ;;  %v4887_v4 = vadd.f32 %v10861_v6, %v8773_v15 }
 0x305   : > { %v3854_v60 = vpop.f32.mrf.mxu0  ;;  %v4878_v2 = vpop.f32.mrf.mxu1  ;;  %v5735_v16 = vmax.f32 %v10877_v3, %v5543_v1  ;;  %v5799_v36 = vmax.f32 %v10880_v5, %v5671_v43 }
 0x306   : > { %v5544_v22 = vmax.f32 %v5154_v26, %v5156_v50  ;;  %v3855_v33 = vadd.f32 %v10861_v6, %v3854_v60  ;;  %v5672_v46 = vmax.f32 %v5410_v54, %v5412_v18  ;;  %v4879_v23 = vadd.f32 %v10861_v6, %v4878_v2 }
 0x307   : > { %v8518_v29 = vpop.f32.mrf.mxu0  ;;  %v8774_v20 = vpop.f32.mrf.mxu1  ;;  %v5159_v17 = vmax.f32 %v3863_v61, 0.0  ;;  %v5415_v52 = vmax.f32 %v4887_v4, 0.0 }
 0x308   : > { %v5736_v56 = vmax.f32 %v10885_v40, %v5544_v22  ;;  %v5157_v21 = vmax.f32 %v3855_v33, 0.0  ;;  %v3866_v44 = vadd.f32 %v10861_v6, %v8518_v29  ;;  %v5800_v58 = vmax.f32 %v10888_v10, %v5672_v46 }
 0x309   : > { %v5413_v30 = vmax.f32 %v4879_v23, 0.0  ;;  %v4890_v59 = vadd.f32 %v10861_v6, %v8774_v20  ;;  %v3857_v51 = vpop.f32.mrf.mxu0  ;;  %v4881_v11 = vpop.f32.mrf.mxu1 }
 0x30a   : > { %v7769_v55 = vpack.c.bf16 %v5736_v56, %v5735_v16  ;;  %v3858_v3 = vadd.f32 %v10861_v6, %v3857_v51  ;;  %v7929_v40 = vpack.c.bf16 %v5800_v58, %v5799_v36  ;;  %v4882_v63 = vadd.f32 %v10861_v6, %v4881_v11 }
 0x30b   : > { %v8521_v28 = vpop.f32.mrf.mxu0  ;;  %v5545_v42 = vmax.f32 %v5157_v21, %v5159_v17  ;;  %v5160_v5 = vmax.f32 %v3866_v44, 0.0  ;;  %v8777_v10 = vpop.f32.mrf.mxu1  ;;  %v5673_v14 = vmax.f32 %v5413_v30, %v5415_v52  ;;  %v5416_v24 = vmax.f32 %v4890_v59, 0.0 }
 0x30c   : > { %7970 = vst [vmem:[%s9403_s26 + $0x170] sm:$0xff] %v7769_v55   ;;  %v5158_v25 = vmax.f32 %v3858_v3, 0.0  ;;  %8002 = vst [vmem:[%s9403_s26 + $0x2b0] sm:$0xff] %v7929_v40   ;;  %v5414_v39 = vmax.f32 %v4882_v63, 0.0  ;;  %v3879_v0 = vadd.f32 %v10861_v6, %v8521_v28  ;;  %v4903_v7 = vadd.f32 %v10861_v6, %v8777_v10 }
 0x30d   : > { %v3870_v45 = vpop.f32.mrf.mxu0  ;;  %v4894_v41 = vpop.f32.mrf.mxu1  ;;  %v5737_v37 = vmax.f32 %v10893_v38, %v5545_v42  ;;  %v5801_v1 = vmax.f32 %v10896_v9, %v5673_v14 }
 0x30e   : > { %v5546_v53 = vmax.f32 %v5158_v25, %v5160_v5  ;;  %v3871_v12 = vadd.f32 %v10861_v6, %v3870_v45  ;;  %v5674_v35 = vmax.f32 %v5414_v39, %v5416_v24  ;;  %v4895_v13 = vadd.f32 %v10861_v6, %v4894_v41 }
 0x30f   : > { %v8522_v32 = vpop.f32.mrf.mxu0  ;;  %v8778_v57 = vpop.f32.mrf.mxu1  ;;  %v5163_v54 = vmax.f32 %v3879_v0, 0.0  ;;  %v5419_v22 = vmax.f32 %v4903_v7, 0.0 }
 0x310   : > { %v5738_v8 = vmax.f32 %v10901_v48, %v5546_v53  ;;  %v5161_v19 = vmax.f32 %v3871_v12, 0.0  ;;  %v3882_v31 = vadd.f32 %v10861_v6, %v8522_v32  ;;  %v5802_v50 = vmax.f32 %v10904_v49, %v5674_v35 }
 0x311   : > { %v5417_v26 = vmax.f32 %v4895_v13, 0.0  ;;  %v4906_v15 = vadd.f32 %v10861_v6, %v8778_v57  ;;  %v3873_v43 = vpop.f32.mrf.mxu0  ;;  %v4897_v60 = vpop.f32.mrf.mxu1 }
 0x312   : > { %v7774_v18 = vpack.c.bf16 %v5738_v8, %v5737_v37  ;;  %v3874_v38 = vadd.f32 %v10861_v6, %v3873_v43  ;;  %v7934_v48 = vpack.c.bf16 %v5802_v50, %v5801_v1  ;;  %v4898_v61 = vadd.f32 %v10861_v6, %v4897_v60 }
 0x313   : > { %v5547_v33 = vmax.f32 %v5161_v19, %v5163_v54  ;;  %v5164_v9 = vmax.f32 %v3882_v31, 0.0  ;;  %v5675_v2 = vmax.f32 %v5417_v26, %v5419_v22  ;;  %v5420_v46 = vmax.f32 %v4906_v15, 0.0 }
 0x314   : > { %7971 = vst [vmem:[%s9403_s26 + $0x178] sm:$0xff] %v7774_v18   ;;  %v5162_v49 = vmax.f32 %v3874_v38, 0.0  ;;  %8003 = vst [vmem:[%s9403_s26 + $0x2b8] sm:$0xff] %v7934_v48   ;;  %v5418_v4 = vmax.f32 %v4898_v61, 0.0 }
 0x315   : > { %v5739_v16 = vmax.f32 %v10909_v47, %v5547_v33  ;;  %v5803_v21 = vmax.f32 %v10912_v27, %v5675_v2 }
 0x316   : > { %v5548_v23 = vmax.f32 %v5162_v49, %v5164_v9  ;;  %v5676_v29 = vmax.f32 %v5418_v4, %v5420_v46 }
 0x318   : > { %v5740_v56 = vmax.f32 %v10915_v62, %v5548_v23  ;;  %v5804_v6 = vmax.f32 %v10919_v34, %v5676_v29 }
 0x31a   : > { %v7779_v44 = vpack.c.bf16 %v5740_v56, %v5739_v16  ;;  %v7939_v20 = vpack.c.bf16 %v5804_v6, %v5803_v21 }
 0x31c   : > { %7972 = vst [vmem:[%s9403_s26 + $0x180] sm:$0xff] %v7779_v44   ;;  %8004 = vst [vmem:[%s9403_s26 + $0x2c0] sm:$0xff] %v7939_v20  }
 0x31d   : > { %s7620_s20 = sshll.u32 %s9292_s16, 7  ;;  %s6545_s4 = sshll.u32 %s9403_s26, 4  ;;  %s6546_s4 = int_to_ptr.vmem [resolvable:$true] %s6545_s4 }
 0x31e   : > { %s6534_s11 = scalar_lea.hbm %s11072_s3, %s7620_s20  ;;  %s9244_s17 = smov 128  }
 0x31f   : > { %p11083_p6 = scmp.ne.s32.totalorder %s11077_s24, 0  ;;  %s9245_s19 = smov 256  }
 0x320   : > { %s9246_s27 = smov 2   ;;  %s9247_s28 = smov 64  }
 0x321   : > { %8801 = sst [smem:[#allocation12]] (%p11083_p6), %s9244_s17  ;;  %s9248_s16 = smov 4  }
 0x322   : > { %8802 = sst [smem:[#allocation12 + $0x1]] (%p11083_p6), %s9245_s19  ;;  %s9249_s29 = smov 131072  }
 0x323   : > { %8803 = sst [smem:[#allocation12 + $0x2]] (%p11083_p6), %s9246_s27  ;;  %s9250_s30 = smov 0  }
 0x324   : > { %8804 = sst [smem:[#allocation12 + $0x3]] (%p11083_p6), %s9247_s28 }
 0x325   : > { %8805 = sst [smem:[#allocation12 + $0x4]] (%p11083_p6), %s9247_s28 }
 0x326   : > { %8806 = sst [smem:[#allocation12 + $0x5]] (%p11083_p6), %s9248_s16 }
 0x327   : > { %8807 = dma.general (%p11083_p6), %s6546_s4, 12800, %s6534_s11, %s6522_s23, %s9249_s29, [#allocation12], %s9250_s30, 0  }
 0x328 PF: > { %s6573_s5 = sand.u32 1, %s9219_s12   ;;  %p11084_p11 = scmp.ne.s32.totalorder %s11078_s25, 0 }
 0x329   : > { %s6574_s6 = scalar_lea.sflag [#allocation4], %s6573_s5 }
 0x32a   : > { %p8817_p13 = pnand %p6654_p10, %p11084_p11 }
 0x32c   : > { %p8818_p2 = pneg %p8817_p13 }
 0x32e   : > { %9214 = dma.done.wait (%p8818_p2), %s6574_s6, 12800  }
 0x32f   : > { %9216 = vsyncadd (%p8818_p2), %s6574_s6, 4294954496  ;;  %p17_p0 = scmp.ge.s32.totalorder %s9296_s18, 4   ;;  %s11085_s12 = smov %s9223_s13 }
 0x330   : > { %s11086_s13 = smov %s9227_s14  ;;  %s11087_s14 = smov %s9308_s21 }
 0x331   : > { %s11088_s15 = smov %s9296_s18  ;;  %19 = sbr.rel (!%p17_p0) target bundleno = 6 (0x6), region = 99 }
 0x336   :  { %6579 = vsyncpa [#allocation3], 1 }
 0x337   :  { %6581 = vsyncpa [#allocation3 + $0x1], 1 }
 0x338   :  { %6582 = vsyncpa [#allocation6], 1 }
 0x339   :  { %6583 = vsyncpa [#allocation4], 1 }
 0x33a   :  { %6585 = vsyncpa [#allocation4 + $0x1], 1 }

</bundles_post_ra>
